<compile_context>
chip_gen: v5e
topology: v5e:2x2
jax: 0.10.0
libtpu: 0.0.40
codegen_flags: <defaults>
</compile_context>

<pallas_src>
import math
from functools import partial

import jax
import jax.numpy as jnp
from jax.experimental import pallas as pl
from jax.experimental.pallas import tpu as pltpu

# ----------------------------- configuration --------------------------------
B = 2          # batch
N = 64         # tokens (8 x 8 spatial)
DIM = 128      # channels (lane-dense: multiple of 128)
MLP_RATIO = 4
HIDDEN = DIM * MLP_RATIO   # 512 (lane-dense)

_INV_SQRT2 = 0.7071067811865476


# ------------------------------ in-kernel math -------------------------------
def _fast_recip(x):
    # EUP approximate reciprocal + one Newton-Raphson step: keeps the divide
    # off the VALU slot while remaining float32-accurate.  Note: this is one
    # extra EUP push per element next to exp (EUP has a single bundle slot).
    r = pl.reciprocal(x, approx=True)
    return r * (2.0 - x * r)


def _gelu_exact(x):
    # nn.GELU() default (approximate='none'): 0.5 * x * (1 + erf(x / sqrt(2))).
    # erf via Abramowitz & Stegun 7.1.26 (|abs err| < 1.5e-7), sign folded out:
    #   erf(x/sqrt(2)) = sign(x) * y,  y = erf(|x|/sqrt(2)) >= 0
    #   gelu(x)        = 0.5*(x + |x|*y)          (no jnp.sign / select needed)
    a1, a2, a3, a4, a5 = 0.254829592, -0.284496736, 1.421413741, -1.453152027, 1.061405429
    p = 0.3275911
    ax = jnp.abs(x)
    az = ax * _INV_SQRT2
    t = _fast_recip(1.0 + p * az)
    poly = ((((a5 * t + a4) * t + a3) * t + a2) * t + a1) * t
    y = 1.0 - poly * jnp.exp(-az * az)
    return 0.5 * (x + ax * y)


# --------------------------- fused MLP forward kernel -------------------------
def _mlp_kernel(x_ref, w1_ref, b1_ref, w2_ref, b2_ref, out_ref, *, n_chunks, chunk):
    x = x_ref[...]                                   # (tr, C), f32 or bf16
    rows_t = x_ref.shape[0]
    cols = out_ref.shape[1]
    acc = jnp.zeros((rows_t, cols), jnp.float32)

    # HIDDEN-chunked fc1 -> GELU -> fc2: live intermediate is one (tr, chunk)
    # slab; fc2(k) MXU pushes overlap with GELU(k+1) VPU/EUP work.
    for k in range(n_chunks):                        # static unroll (n_chunks small)
        lo = k * chunk
        h = jnp.dot(x, w1_ref[:, lo:lo + chunk],
                    preferred_element_type=jnp.float32) + b1_ref[:, lo:lo + chunk]
        g = _gelu_exact(h)                           # f32
        acc = acc + jnp.dot(g.astype(w2_ref.dtype), w2_ref[lo:lo + chunk, :],
                            preferred_element_type=jnp.float32)

    out_ref[...] = (acc + b2_ref[...]).astype(out_ref.dtype)


# ------------------------------ tiling heuristics -----------------------------
def _num_tensorcores():
    """2 on v7x (two TensorCores share 'parallel' grid axes), 1 on v5e/v6e."""
    try:
        kind = jax.devices()[0].device_kind.lower()
    except Exception:
        return 1
    return 2 if "v7" in kind else 1


def _auto_row_tile(rows):
    """One step on single-TC chips at small row counts, two steps on v7x,
    <=512-row tiles for realistic ConvNeXt token counts."""
    n_tc = _num_tensorcores()
    per_core = max(1, rows // n_tc)
    target = min(512, per_core)
    if rows % 8 != 0 or target < 8:
        return rows                      # tiny/odd slab: single full-array step
    t = target - (target % 8)
    while t > 8 and rows % t != 0:
        t -= 8
    return t if rows % t == 0 else rows


# ------------------------------ pallas wrapper --------------------------------
def mlp_pallas(x, params, *, row_tile=None, use_bf16=False):
    """Fused MLP forward: fc2(gelu(fc1(x))).  x: (B, N, C) float32."""
    b, n, c = x.shape
    rows = b * n
    hidden = params["w1"].shape[1]

    if row_tile is None:
        row_tile = _auto_row_tile(rows)
    assert rows % row_tile == 0, (rows, row_tile)

    chunk = 128 if hidden % 128 == 0 else hidden     # lane-dense hidden chunks
    n_chunks = hidden // chunk

    x2 = x.reshape(rows, c)   # contiguous reshape: free layout plumbing
    w1, w2 = params["w1"], params["w2"]
    if use_bf16:
        # bf16 MXU operands: ~3x fewer vmatmul passes, half the weight-prologue
        # HBM bytes; accumulation stays f32 (preferred_element_type).
        x2 = x2.astype(jnp.bfloat16)
        w1 = w1.astype(jnp.bfloat16)
        w2 = w2.astype(jnp.bfloat16)

    grid = (rows // row_tile,)
    kernel = partial(_mlp_kernel, n_chunks=n_chunks, chunk=chunk)

    out2 = pl.pallas_call(
        kernel,
        out_shape=jax.ShapeDtypeStruct((rows, c), jnp.float32),
        grid=grid,
        in_specs=[
            pl.BlockSpec((row_tile, c), lambda i: (i, 0)),
            # Constant-index weight/bias specs: DMA'd once, VMEM-resident
            # across all row steps.
            pl.BlockSpec((c, hidden), lambda i: (0, 0)),
            pl.BlockSpec((1, hidden), lambda i: (0, 0)),
            pl.BlockSpec((hidden, c), lambda i: (0, 0)),
            pl.BlockSpec((1, c), lambda i: (0, 0)),
        ],
        out_specs=pl.BlockSpec((row_tile, c), lambda i: (i, 0)),
        compiler_params=pltpu.CompilerParams(dimension_semantics=("parallel",)),
    )(x2, w1, params["b1"], w2, params["b2"])

    return out2.reshape(b, n, c)


# ------------------------------ pure-JAX reference ----------------------------
def mlp_reference(x, p):
    hp = jax.lax.Precision.HIGHEST
    h = jnp.einsum("bnc,ch->bnh", x, p["w1"], precision=hp) + p["b1"]
    h = 0.5 * h * (1.0 + jax.lax.erf(h * _INV_SQRT2))      # exact GELU
    y = jnp.einsum("bnh,hc->bnc", h, p["w2"], precision=hp) + p["b2"]
    return y


# ------------------------------ parameter init --------------------------------
def init_params(key):
    k1, k2, k3, k4 = jax.random.split(key, 4)
    s1 = 1.0 / math.sqrt(DIM)
    s2 = 1.0 / math.sqrt(HIDDEN)
    return dict(
        # Linear weights stored pre-transposed so the kernel computes x @ W.
        w1=s1 * jax.random.normal(k1, (DIM, HIDDEN), jnp.float32),
        b1=0.02 * jax.random.normal(k2, (1, HIDDEN), jnp.float32),
        w2=s2 * jax.random.normal(k3, (HIDDEN, DIM), jnp.float32),
        b2=0.02 * jax.random.normal(k4, (1, DIM), jnp.float32),
    )


# ----------------------------------- main --------------------------------------
if __name__ == "__main__":
    kx, kp = jax.random.split(jax.random.PRNGKey(0))
    x = jax.random.normal(kx, (B, N, DIM), jnp.float32)
    params = init_params(kp)

    ref = mlp_reference(x, params)

    # Default (f32 operands): tight check vs HIGHEST-precision reference.
    out = jax.block_until_ready(mlp_pallas(x, params))
    assert out.shape == (B, N, DIM), out.shape
    err = float(jnp.max(jnp.abs(out - ref)))
    if err > 1e-3:
        raise RuntimeError(f"f32 Pallas output mismatch vs reference, max abs err = {err}")

    # bf16 MXU-operand path (the main roofline lever on v6e/v7x); accumulation
    # error vs the f32 reference is expected, so the tolerance is looser.
    out_bf16 = jax.block_until_ready(mlp_pallas(x, params, use_bf16=True))
    err_bf16 = float(jnp.max(jnp.abs(out_bf16 - ref)))
    if err_bf16 > 5e-2:
        raise RuntimeError(f"bf16 Pallas output mismatch vs reference, max abs err = {err_bf16}")

    print("KERNEL_OK")
</pallas_src>

<mosaic_0001>
module attributes {stable_mosaic.version = 11 : i64} {
  func.func @_mlp_kernel(%arg0: i32, %arg1: memref<128x128xf32, #tpu.memory_space<vmem>>, %arg2: memref<128x512xf32, #tpu.memory_space<vmem>>, %arg3: memref<1x512xf32, #tpu.memory_space<vmem>>, %arg4: memref<512x128xf32, #tpu.memory_space<vmem>>, %arg5: memref<1x128xf32, #tpu.memory_space<vmem>>, %arg6: memref<128x128xf32, #tpu.memory_space<vmem>>) attributes {dimension_semantics = [#tpu.dimension_semantics<parallel>], iteration_bounds = array<i64: 1>, scalar_prefetch = 0 : i64, scratch_operands = 0 : i64, tpu.core_type = #tpu.core_type<tc>, window_params = [{transform_indices = @transform_0, window_bounds = array<i64: 128, 128>}, {pipeline_mode = #tpu.pipeline_mode<synchronous>, transform_indices = @transform_1, window_bounds = array<i64: 128, 512>}, {pipeline_mode = #tpu.pipeline_mode<synchronous>, transform_indices = @transform_2, window_bounds = array<i64: 1, 512>}, {pipeline_mode = #tpu.pipeline_mode<synchronous>, transform_indices = @transform_3, window_bounds = array<i64: 512, 128>}, {pipeline_mode = #tpu.pipeline_mode<synchronous>, transform_indices = @transform_4, window_bounds = array<i64: 1, 128>}, {transform_indices = @transform_5, window_bounds = array<i64: 128, 128>}]} {
    %c0 = arith.constant 0 : index
    %c0_0 = arith.constant 0 : index
    %0 = vector.load %arg1[%c0, %c0_0] : memref<128x128xf32, #tpu.memory_space<vmem>>, vector<128x128xf32>
    %cst = arith.constant 0.000000e+00 : f32
    %1 = vector.broadcast %cst : f32 to vector<128x128xf32>
    %c0_1 = arith.constant 0 : index
    %c0_2 = arith.constant 0 : index
    %2 = vector.load %arg2[%c0_1, %c0_2] : memref<128x512xf32, #tpu.memory_space<vmem>>, vector<128x128xf32>
    %cst_3 = arith.constant dense<0.000000e+00> : vector<128x128xf32>
    %3 = tpu.matmul %0, %2, %cst_3 {dimension_numbers = #tpu.dot_dimension_numbers<[1], [0], [0], [1], [0, 0, 1, 1], [], []>} : vector<128x128xf32>, vector<128x128xf32>, vector<128x128xf32> -> vector<128x128xf32>
    %c0_4 = arith.constant 0 : index
    %c0_5 = arith.constant 0 : index
    %4 = vector.load %arg3[%c0_4, %c0_5] : memref<1x512xf32, #tpu.memory_space<vmem>>, vector<1x128xf32>
    %5 = vector.broadcast %4 : vector<1x128xf32> to vector<128x128xf32>
    %6 = arith.addf %3, %5 : vector<128x128xf32>
    %7 = math.absf %6 : vector<128x128xf32>
    %cst_6 = arith.constant 0.707106769 : f32
    %8 = vector.broadcast %cst_6 : f32 to vector<128x128xf32>
    %9 = arith.mulf %7, %8 : vector<128x128xf32>
    %cst_7 = arith.constant 0.327591091 : f32
    %10 = vector.broadcast %cst_7 : f32 to vector<128x128xf32>
    %11 = arith.mulf %10, %9 : vector<128x128xf32>
    %cst_8 = arith.constant 1.000000e+00 : f32
    %12 = vector.broadcast %cst_8 : f32 to vector<128x128xf32>
    %13 = arith.addf %12, %11 : vector<128x128xf32>
    %14 = tpu.reciprocal %13 {approx = true} : vector<128x128xf32> -> vector<128x128xf32>
    %15 = arith.mulf %13, %14 : vector<128x128xf32>
    %cst_9 = arith.constant 2.000000e+00 : f32
    %16 = vector.broadcast %cst_9 : f32 to vector<128x128xf32>
    %17 = arith.subf %16, %15 : vector<128x128xf32>
    %18 = arith.mulf %14, %17 : vector<128x128xf32>
    %cst_10 = arith.constant 1.06140542 : f32
    %19 = vector.broadcast %cst_10 : f32 to vector<128x128xf32>
    %20 = arith.mulf %19, %18 : vector<128x128xf32>
    %cst_11 = arith.constant -1.45315206 : f32
    %21 = vector.broadcast %cst_11 : f32 to vector<128x128xf32>
    %22 = arith.addf %20, %21 : vector<128x128xf32>
    %23 = arith.mulf %22, %18 : vector<128x128xf32>
    %cst_12 = arith.constant 1.42141378 : f32
    %24 = vector.broadcast %cst_12 : f32 to vector<128x128xf32>
    %25 = arith.addf %23, %24 : vector<128x128xf32>
    %26 = arith.mulf %25, %18 : vector<128x128xf32>
    %cst_13 = arith.constant -0.284496725 : f32
    %27 = vector.broadcast %cst_13 : f32 to vector<128x128xf32>
    %28 = arith.addf %26, %27 : vector<128x128xf32>
    %29 = arith.mulf %28, %18 : vector<128x128xf32>
    %cst_14 = arith.constant 0.254829586 : f32
    %30 = vector.broadcast %cst_14 : f32 to vector<128x128xf32>
    %31 = arith.addf %29, %30 : vector<128x128xf32>
    %32 = arith.mulf %31, %18 : vector<128x128xf32>
    %cst_15 = arith.constant 0.000000e+00 : f32
    %33 = vector.broadcast %cst_15 : f32 to vector<128x128xf32>
    %34 = arith.subf %33, %9 : vector<128x128xf32>
    %35 = arith.mulf %34, %9 : vector<128x128xf32>
    %36 = math.exp %35 : vector<128x128xf32>
    %37 = arith.mulf %32, %36 : vector<128x128xf32>
    %cst_16 = arith.constant 1.000000e+00 : f32
    %38 = vector.broadcast %cst_16 : f32 to vector<128x128xf32>
    %39 = arith.subf %38, %37 : vector<128x128xf32>
    %40 = arith.mulf %7, %39 : vector<128x128xf32>
    %41 = arith.addf %6, %40 : vector<128x128xf32>
    %cst_17 = arith.constant 5.000000e-01 : f32
    %42 = vector.broadcast %cst_17 : f32 to vector<128x128xf32>
    %43 = arith.mulf %42, %41 : vector<128x128xf32>
    %c0_18 = arith.constant 0 : index
    %c0_19 = arith.constant 0 : index
    %44 = vector.load %arg4[%c0_18, %c0_19] : memref<512x128xf32, #tpu.memory_space<vmem>>, vector<128x128xf32>
    %cst_20 = arith.constant dense<0.000000e+00> : vector<128x128xf32>
    %45 = tpu.matmul %43, %44, %cst_20 {dimension_numbers = #tpu.dot_dimension_numbers<[1], [0], [0], [1], [0, 0, 1, 1], [], []>} : vector<128x128xf32>, vector<128x128xf32>, vector<128x128xf32> -> vector<128x128xf32>
    %46 = arith.addf %1, %45 : vector<128x128xf32>
    %c0_21 = arith.constant 0 : index
    %c128 = arith.constant 128 : index
    %47 = vector.load %arg2[%c0_21, %c128] : memref<128x512xf32, #tpu.memory_space<vmem>>, vector<128x128xf32>
    %cst_22 = arith.constant dense<0.000000e+00> : vector<128x128xf32>
    %48 = tpu.matmul %0, %47, %cst_22 {dimension_numbers = #tpu.dot_dimension_numbers<[1], [0], [0], [1], [0, 0, 1, 1], [], []>} : vector<128x128xf32>, vector<128x128xf32>, vector<128x128xf32> -> vector<128x128xf32>
    %c0_23 = arith.constant 0 : index
    %c128_24 = arith.constant 128 : index
    %49 = vector.load %arg3[%c0_23, %c128_24] : memref<1x512xf32, #tpu.memory_space<vmem>>, vector<1x128xf32>
    %50 = vector.broadcast %49 : vector<1x128xf32> to vector<128x128xf32>
    %51 = arith.addf %48, %50 : vector<128x128xf32>
    %52 = math.absf %51 : vector<128x128xf32>
    %cst_25 = arith.constant 0.707106769 : f32
    %53 = vector.broadcast %cst_25 : f32 to vector<128x128xf32>
    %54 = arith.mulf %52, %53 : vector<128x128xf32>
    %cst_26 = arith.constant 0.327591091 : f32
    %55 = vector.broadcast %cst_26 : f32 to vector<128x128xf32>
    %56 = arith.mulf %55, %54 : vector<128x128xf32>
    %cst_27 = arith.constant 1.000000e+00 : f32
    %57 = vector.broadcast %cst_27 : f32 to vector<128x128xf32>
    %58 = arith.addf %57, %56 : vector<128x128xf32>
    %59 = tpu.reciprocal %58 {approx = true} : vector<128x128xf32> -> vector<128x128xf32>
    %60 = arith.mulf %58, %59 : vector<128x128xf32>
    %cst_28 = arith.constant 2.000000e+00 : f32
    %61 = vector.broadcast %cst_28 : f32 to vector<128x128xf32>
    %62 = arith.subf %61, %60 : vector<128x128xf32>
    %63 = arith.mulf %59, %62 : vector<128x128xf32>
    %cst_29 = arith.constant 1.06140542 : f32
    %64 = vector.broadcast %cst_29 : f32 to vector<128x128xf32>
    %65 = arith.mulf %64, %63 : vector<128x128xf32>
    %cst_30 = arith.constant -1.45315206 : f32
    %66 = vector.broadcast %cst_30 : f32 to vector<128x128xf32>
    %67 = arith.addf %65, %66 : vector<128x128xf32>
    %68 = arith.mulf %67, %63 : vector<128x128xf32>
    %cst_31 = arith.constant 1.42141378 : f32
    %69 = vector.broadcast %cst_31 : f32 to vector<128x128xf32>
    %70 = arith.addf %68, %69 : vector<128x128xf32>
    %71 = arith.mulf %70, %63 : vector<128x128xf32>
    %cst_32 = arith.constant -0.284496725 : f32
    %72 = vector.broadcast %cst_32 : f32 to vector<128x128xf32>
    %73 = arith.addf %71, %72 : vector<128x128xf32>
    %74 = arith.mulf %73, %63 : vector<128x128xf32>
    %cst_33 = arith.constant 0.254829586 : f32
    %75 = vector.broadcast %cst_33 : f32 to vector<128x128xf32>
    %76 = arith.addf %74, %75 : vector<128x128xf32>
    %77 = arith.mulf %76, %63 : vector<128x128xf32>
    %cst_34 = arith.constant 0.000000e+00 : f32
    %78 = vector.broadcast %cst_34 : f32 to vector<128x128xf32>
    %79 = arith.subf %78, %54 : vector<128x128xf32>
    %80 = arith.mulf %79, %54 : vector<128x128xf32>
    %81 = math.exp %80 : vector<128x128xf32>
    %82 = arith.mulf %77, %81 : vector<128x128xf32>
    %cst_35 = arith.constant 1.000000e+00 : f32
    %83 = vector.broadcast %cst_35 : f32 to vector<128x128xf32>
    %84 = arith.subf %83, %82 : vector<128x128xf32>
    %85 = arith.mulf %52, %84 : vector<128x128xf32>
    %86 = arith.addf %51, %85 : vector<128x128xf32>
    %cst_36 = arith.constant 5.000000e-01 : f32
    %87 = vector.broadcast %cst_36 : f32 to vector<128x128xf32>
    %88 = arith.mulf %87, %86 : vector<128x128xf32>
    %c128_37 = arith.constant 128 : index
    %c0_38 = arith.constant 0 : index
    %89 = vector.load %arg4[%c128_37, %c0_38] : memref<512x128xf32, #tpu.memory_space<vmem>>, vector<128x128xf32>
    %cst_39 = arith.constant dense<0.000000e+00> : vector<128x128xf32>
    %90 = tpu.matmul %88, %89, %cst_39 {dimension_numbers = #tpu.dot_dimension_numbers<[1], [0], [0], [1], [0, 0, 1, 1], [], []>} : vector<128x128xf32>, vector<128x128xf32>, vector<128x128xf32> -> vector<128x128xf32>
    %91 = arith.addf %46, %90 : vector<128x128xf32>
    %c0_40 = arith.constant 0 : index
    %c256 = arith.constant 256 : index
    %92 = vector.load %arg2[%c0_40, %c256] : memref<128x512xf32, #tpu.memory_space<vmem>>, vector<128x128xf32>
    %cst_41 = arith.constant dense<0.000000e+00> : vector<128x128xf32>
    %93 = tpu.matmul %0, %92, %cst_41 {dimension_numbers = #tpu.dot_dimension_numbers<[1], [0], [0], [1], [0, 0, 1, 1], [], []>} : vector<128x128xf32>, vector<128x128xf32>, vector<128x128xf32> -> vector<128x128xf32>
    %c0_42 = arith.constant 0 : index
    %c256_43 = arith.constant 256 : index
    %94 = vector.load %arg3[%c0_42, %c256_43] : memref<1x512xf32, #tpu.memory_space<vmem>>, vector<1x128xf32>
    %95 = vector.broadcast %94 : vector<1x128xf32> to vector<128x128xf32>
    %96 = arith.addf %93, %95 : vector<128x128xf32>
    %97 = math.absf %96 : vector<128x128xf32>
    %cst_44 = arith.constant 0.707106769 : f32
    %98 = vector.broadcast %cst_44 : f32 to vector<128x128xf32>
    %99 = arith.mulf %97, %98 : vector<128x128xf32>
    %cst_45 = arith.constant 0.327591091 : f32
    %100 = vector.broadcast %cst_45 : f32 to vector<128x128xf32>
    %101 = arith.mulf %100, %99 : vector<128x128xf32>
    %cst_46 = arith.constant 1.000000e+00 : f32
    %102 = vector.broadcast %cst_46 : f32 to vector<128x128xf32>
    %103 = arith.addf %102, %101 : vector<128x128xf32>
    %104 = tpu.reciprocal %103 {approx = true} : vector<128x128xf32> -> vector<128x128xf32>
    %105 = arith.mulf %103, %104 : vector<128x128xf32>
    %cst_47 = arith.constant 2.000000e+00 : f32
    %106 = vector.broadcast %cst_47 : f32 to vector<128x128xf32>
    %107 = arith.subf %106, %105 : vector<128x128xf32>
    %108 = arith.mulf %104, %107 : vector<128x128xf32>
    %cst_48 = arith.constant 1.06140542 : f32
    %109 = vector.broadcast %cst_48 : f32 to vector<128x128xf32>
    %110 = arith.mulf %109, %108 : vector<128x128xf32>
    %cst_49 = arith.constant -1.45315206 : f32
    %111 = vector.broadcast %cst_49 : f32 to vector<128x128xf32>
    %112 = arith.addf %110, %111 : vector<128x128xf32>
    %113 = arith.mulf %112, %108 : vector<128x128xf32>
    %cst_50 = arith.constant 1.42141378 : f32
    %114 = vector.broadcast %cst_50 : f32 to vector<128x128xf32>
    %115 = arith.addf %113, %114 : vector<128x128xf32>
    %116 = arith.mulf %115, %108 : vector<128x128xf32>
    %cst_51 = arith.constant -0.284496725 : f32
    %117 = vector.broadcast %cst_51 : f32 to vector<128x128xf32>
    %118 = arith.addf %116, %117 : vector<128x128xf32>
    %119 = arith.mulf %118, %108 : vector<128x128xf32>
    %cst_52 = arith.constant 0.254829586 : f32
    %120 = vector.broadcast %cst_52 : f32 to vector<128x128xf32>
    %121 = arith.addf %119, %120 : vector<128x128xf32>
    %122 = arith.mulf %121, %108 : vector<128x128xf32>
    %cst_53 = arith.constant 0.000000e+00 : f32
    %123 = vector.broadcast %cst_53 : f32 to vector<128x128xf32>
    %124 = arith.subf %123, %99 : vector<128x128xf32>
    %125 = arith.mulf %124, %99 : vector<128x128xf32>
    %126 = math.exp %125 : vector<128x128xf32>
    %127 = arith.mulf %122, %126 : vector<128x128xf32>
    %cst_54 = arith.constant 1.000000e+00 : f32
    %128 = vector.broadcast %cst_54 : f32 to vector<128x128xf32>
    %129 = arith.subf %128, %127 : vector<128x128xf32>
    %130 = arith.mulf %97, %129 : vector<128x128xf32>
    %131 = arith.addf %96, %130 : vector<128x128xf32>
    %cst_55 = arith.constant 5.000000e-01 : f32
    %132 = vector.broadcast %cst_55 : f32 to vector<128x128xf32>
    %133 = arith.mulf %132, %131 : vector<128x128xf32>
    %c256_56 = arith.constant 256 : index
    %c0_57 = arith.constant 0 : index
    %134 = vector.load %arg4[%c256_56, %c0_57] : memref<512x128xf32, #tpu.memory_space<vmem>>, vector<128x128xf32>
    %cst_58 = arith.constant dense<0.000000e+00> : vector<128x128xf32>
    %135 = tpu.matmul %133, %134, %cst_58 {dimension_numbers = #tpu.dot_dimension_numbers<[1], [0], [0], [1], [0, 0, 1, 1], [], []>} : vector<128x128xf32>, vector<128x128xf32>, vector<128x128xf32> -> vector<128x128xf32>
    %136 = arith.addf %91, %135 : vector<128x128xf32>
    %c0_59 = arith.constant 0 : index
    %c384 = arith.constant 384 : index
    %137 = vector.load %arg2[%c0_59, %c384] : memref<128x512xf32, #tpu.memory_space<vmem>>, vector<128x128xf32>
    %cst_60 = arith.constant dense<0.000000e+00> : vector<128x128xf32>
    %138 = tpu.matmul %0, %137, %cst_60 {dimension_numbers = #tpu.dot_dimension_numbers<[1], [0], [0], [1], [0, 0, 1, 1], [], []>} : vector<128x128xf32>, vector<128x128xf32>, vector<128x128xf32> -> vector<128x128xf32>
    %c0_61 = arith.constant 0 : index
    %c384_62 = arith.constant 384 : index
    %139 = vector.load %arg3[%c0_61, %c384_62] : memref<1x512xf32, #tpu.memory_space<vmem>>, vector<1x128xf32>
    %140 = vector.broadcast %139 : vector<1x128xf32> to vector<128x128xf32>
    %141 = arith.addf %138, %140 : vector<128x128xf32>
    %142 = math.absf %141 : vector<128x128xf32>
    %cst_63 = arith.constant 0.707106769 : f32
    %143 = vector.broadcast %cst_63 : f32 to vector<128x128xf32>
    %144 = arith.mulf %142, %143 : vector<128x128xf32>
    %cst_64 = arith.constant 0.327591091 : f32
    %145 = vector.broadcast %cst_64 : f32 to vector<128x128xf32>
    %146 = arith.mulf %145, %144 : vector<128x128xf32>
    %cst_65 = arith.constant 1.000000e+00 : f32
    %147 = vector.broadcast %cst_65 : f32 to vector<128x128xf32>
    %148 = arith.addf %147, %146 : vector<128x128xf32>
    %149 = tpu.reciprocal %148 {approx = true} : vector<128x128xf32> -> vector<128x128xf32>
    %150 = arith.mulf %148, %149 : vector<128x128xf32>
    %cst_66 = arith.constant 2.000000e+00 : f32
    %151 = vector.broadcast %cst_66 : f32 to vector<128x128xf32>
    %152 = arith.subf %151, %150 : vector<128x128xf32>
    %153 = arith.mulf %149, %152 : vector<128x128xf32>
    %cst_67 = arith.constant 1.06140542 : f32
    %154 = vector.broadcast %cst_67 : f32 to vector<128x128xf32>
    %155 = arith.mulf %154, %153 : vector<128x128xf32>
    %cst_68 = arith.constant -1.45315206 : f32
    %156 = vector.broadcast %cst_68 : f32 to vector<128x128xf32>
    %157 = arith.addf %155, %156 : vector<128x128xf32>
    %158 = arith.mulf %157, %153 : vector<128x128xf32>
    %cst_69 = arith.constant 1.42141378 : f32
    %159 = vector.broadcast %cst_69 : f32 to vector<128x128xf32>
    %160 = arith.addf %158, %159 : vector<128x128xf32>
    %161 = arith.mulf %160, %153 : vector<128x128xf32>
    %cst_70 = arith.constant -0.284496725 : f32
    %162 = vector.broadcast %cst_70 : f32 to vector<128x128xf32>
    %163 = arith.addf %161, %162 : vector<128x128xf32>
    %164 = arith.mulf %163, %153 : vector<128x128xf32>
    %cst_71 = arith.constant 0.254829586 : f32
    %165 = vector.broadcast %cst_71 : f32 to vector<128x128xf32>
    %166 = arith.addf %164, %165 : vector<128x128xf32>
    %167 = arith.mulf %166, %153 : vector<128x128xf32>
    %cst_72 = arith.constant 0.000000e+00 : f32
    %168 = vector.broadcast %cst_72 : f32 to vector<128x128xf32>
    %169 = arith.subf %168, %144 : vector<128x128xf32>
    %170 = arith.mulf %169, %144 : vector<128x128xf32>
    %171 = math.exp %170 : vector<128x128xf32>
    %172 = arith.mulf %167, %171 : vector<128x128xf32>
    %cst_73 = arith.constant 1.000000e+00 : f32
    %173 = vector.broadcast %cst_73 : f32 to vector<128x128xf32>
    %174 = arith.subf %173, %172 : vector<128x128xf32>
    %175 = arith.mulf %142, %174 : vector<128x128xf32>
    %176 = arith.addf %141, %175 : vector<128x128xf32>
    %cst_74 = arith.constant 5.000000e-01 : f32
    %177 = vector.broadcast %cst_74 : f32 to vector<128x128xf32>
    %178 = arith.mulf %177, %176 : vector<128x128xf32>
    %c384_75 = arith.constant 384 : index
    %c0_76 = arith.constant 0 : index
    %179 = vector.load %arg4[%c384_75, %c0_76] : memref<512x128xf32, #tpu.memory_space<vmem>>, vector<128x128xf32>
    %cst_77 = arith.constant dense<0.000000e+00> : vector<128x128xf32>
    %180 = tpu.matmul %178, %179, %cst_77 {dimension_numbers = #tpu.dot_dimension_numbers<[1], [0], [0], [1], [0, 0, 1, 1], [], []>} : vector<128x128xf32>, vector<128x128xf32>, vector<128x128xf32> -> vector<128x128xf32>
    %181 = arith.addf %136, %180 : vector<128x128xf32>
    %c0_78 = arith.constant 0 : index
    %c0_79 = arith.constant 0 : index
    %182 = vector.load %arg5[%c0_78, %c0_79] : memref<1x128xf32, #tpu.memory_space<vmem>>, vector<1x128xf32>
    %183 = vector.broadcast %182 : vector<1x128xf32> to vector<128x128xf32>
    %184 = arith.addf %181, %183 : vector<128x128xf32>
    %c0_80 = arith.constant 0 : index
    %c0_81 = arith.constant 0 : index
    %185 = vector.load %arg6[%c0_80, %c0_81] : memref<128x128xf32, #tpu.memory_space<vmem>>, vector<128x128xf32>
    tpu.vector_store %arg6[%c0_80, %c0_81], %184 {strides = array<i32>} : memref<128x128xf32, #tpu.memory_space<vmem>>, vector<128x128xf32>,
    return
  }
  func.func @transform_0(%arg0: i32) -> (i32, i32) {
    %c0_i32 = arith.constant 0 : i32
    %c0_i32_0 = arith.constant 0 : i32
    return %arg0, %c0_i32 : i32, i32
  }
  func.func @transform_1(%arg0: i32) -> (i32, i32) {
    %c0_i32 = arith.constant 0 : i32
    %c0_i32_0 = arith.constant 0 : i32
    %c0_i32_1 = arith.constant 0 : i32
    return %c0_i32, %c0_i32_0 : i32, i32
  }
  func.func @transform_2(%arg0: i32) -> (i32, i32) {
    %c0_i32 = arith.constant 0 : i32
    %c0_i32_0 = arith.constant 0 : i32
    %c0_i32_1 = arith.constant 0 : i32
    return %c0_i32, %c0_i32_0 : i32, i32
  }
  func.func @transform_3(%arg0: i32) -> (i32, i32) {
    %c0_i32 = arith.constant 0 : i32
    %c0_i32_0 = arith.constant 0 : i32
    %c0_i32_1 = arith.constant 0 : i32
    return %c0_i32, %c0_i32_0 : i32, i32
  }
  func.func @transform_4(%arg0: i32) -> (i32, i32) {
    %c0_i32 = arith.constant 0 : i32
    %c0_i32_0 = arith.constant 0 : i32
    %c0_i32_1 = arith.constant 0 : i32
    return %c0_i32, %c0_i32_0 : i32, i32
  }
  func.func @transform_5(%arg0: i32) -> (i32, i32) {
    %c0_i32 = arith.constant 0 : i32
    %c0_i32_0 = arith.constant 0 : i32
    return %arg0, %c0_i32 : i32, i32
  }
}

</mosaic_0001>

<bundles_post_ra>
// kernel: tpu_custom_call.1
= control target key start
LH: loop header
LB: loop body
LE: loop exit
PB: predicated region body
PF: predicated region fallthrough
CT: control target
= control target key end

     0   :  { %10 = vsyncpa [#allocation3], 0  ;;  %s4702_s0 = inlined_call_operand.hbm [shape: f32[128,128], index: 0, kind: input, shape index: {}]   ;;  %s4703_s1 = inlined_call_operand.hbm [shape: f32[128,512], index: 1, kind: input, shape index: {}]   ;;  %s4704_s2 = inlined_call_operand.hbm [shape: f32[1,512], index: 2, kind: input, shape index: {}]   ;;  %s4705_s3 = inlined_call_operand.hbm [shape: f32[512,128], index: 3, kind: input, shape index: {}]   ;;  %s4706_s4 = inlined_call_operand.vmem [shape: f32[1,128], index: 4, kind: input, shape index: {}]   ;;  %s4707_s5 = inlined_call_operand.hbm [shape: f32[128,128], index: 5, kind: output, shape index: {}]  }
   0x1   :  { %11 = vsyncpa [#allocation6], 0 }
   0x2   :  { %12 = vsyncpa [#allocation9], 0  ;;  %s31_s20 = sshll.u32 %s4703_s1, 4  ;;  %s32_s20 = int_to_ptr.hbm [resolvable:$true] %s31_s20 }
   0x3   :  { %13 = vsyncpa [#allocation4], 0  ;;  %s2935_s21 = smov [#allocation5]   ;;  %s18_s25 = sshll.u32 %s4702_s0, 4  ;;  %s19_s25 = int_to_ptr.hbm [resolvable:$true] %s18_s25 }
   0x4   :  { %s33_s22 = sshll.u32 %s2935_s21, 4  ;;  %s2936_s26 = smov 512   ;;  %s34_s22 = int_to_ptr.vmem [resolvable:$true] %s33_s22 }
   0x5   :  { %s2937_s27 = smov 32   ;;  %s2938_s28 = smov [#allocation2]  }
   0x6   :  { %39 = dma.hbm_to_vmem [thread:$0]  %s32_s20, 8192, %s34_s22, [#allocation6], %s2936_s26, %s2936_s26, %s2937_s27  }
   0x7   :  { %s20_s29 = sshll.u32 %s2938_s28, 4  ;;  %s2939_s30 = smov 128   ;;  %s21_s29 = int_to_ptr.vmem [resolvable:$true] %s20_s29 }
   0x8   :  { %s2940_s6 = smov 8   ;;  %s45_s8 = sshll.u32 %s4704_s2, 4  ;;  %s46_s8 = int_to_ptr.hbm [resolvable:$true] %s45_s8 }
   0x9   :  { %26 = dma.hbm_to_vmem [thread:$0]  %s19_s25, 2048, %s21_s29, [#allocation3], %s2939_s30, %s2939_s30, %s2940_s6  }
   0xa   :  { %s2941_s9 = smov [#allocation7]   ;;  %s55_s12 = sshll.u32 %s4705_s3, 4  ;;  %s56_s12 = int_to_ptr.hbm [resolvable:$true] %s55_s12 }
   0xb   :  { %s47_s0 = sshll.u32 %s2941_s9, 4  ;;  %s2942_s13 = smov [#allocation8]   ;;  %s48_s0 = int_to_ptr.vmem [resolvable:$true] %s47_s0 }
   0xc   :  { %50 = dma.hbm_to_vmem [thread:$0]  %s46_s8, 64, %s48_s0, [#allocation6]  }
   0xd   :  { %s57_s14 = sshll.u32 %s2942_s13, 4  ;;  %s58_s14 = int_to_ptr.vmem [resolvable:$true] %s57_s14 }
   0xe   :  { %63 = dma.hbm_to_vmem [thread:$0]  %s56_s12, 8192, %s58_s14, [#allocation9], %s2939_s30, %s2939_s30, %s2940_s6  }
   0xf   :  { %2927 = dma.done.wait [#allocation3], 2048  }
  0x10   :  { %2928 = vsyncadd [#allocation3], 4294965248 }
  0x11   :  { %2929 = dma.done.wait [#allocation6], 8256  }
  0x12   :  { %2930 = vsyncadd [#allocation6], 4294959040 }
  0x13   :  { %2931 = dma.done.wait [#allocation9], 8192  }
  0x14   :  { %2932 = vsyncadd [#allocation9], 4294959104  ;;  %v113_v0 = vld [vmem:[#allocation5 + $0x1e0] sm:$0xff]  ;;  %v630_v1 = vld [vmem:[#allocation5 + $0x1e8] sm:$0xff]  ;;  %s2500_s18 = sshll.u32 %s4707_s5, 4  ;;  %s2501_s18 = int_to_ptr.hbm [resolvable:$true] %s2500_s18 }
  0x15   :  { %v112_v2 = vld [vmem:[#allocation5 + $0x1c0] sm:$0xff]  ;;  %118 = vmatpush.msra.mxu0 %v113_v0  ;;  %635 = vmatpush.msra.mxu1 %v630_v1  ;;  %v629_v3 = vld [vmem:[#allocation5 + $0x1c8] sm:$0xff]  ;;  %v3000_v34 = vld [vmem:[#allocation2 + $0x10] sm:$0xff] }
  0x16   :  { %v111_v4 = vld [vmem:[#allocation5 + $0x1a0] sm:$0xff]  ;;  %v628_v5 = vld [vmem:[#allocation5 + $0x1a8] sm:$0xff]  ;;  %v3004_v35 = vld [vmem:[#allocation2 + $0x18] sm:$0xff] }
  0x17   :  { %119 = vmatpush.msra.mxu0 %v112_v2  ;;  %636 = vmatpush.msra.mxu1 %v629_v3  ;;  %v110_v6 = vld [vmem:[#allocation5 + $0x180] sm:$0xff]  ;;  %v627_v7 = vld [vmem:[#allocation5 + $0x188] sm:$0xff]  ;;  %v3016_v38 = vld [vmem:[#allocation2 + $0x30] sm:$0xff] }
  0x18   :  { %v109_v8 = vld [vmem:[#allocation5 + $0x160] sm:$0xff]  ;;  %v626_v9 = vld [vmem:[#allocation5 + $0x168] sm:$0xff]  ;;  %v3020_v39 = vld [vmem:[#allocation2 + $0x38] sm:$0xff] }
  0x19   :  { %120 = vmatpush.msra.mxu0 %v111_v4  ;;  %637 = vmatpush.msra.mxu1 %v628_v5  ;;  %v108_v10 = vld [vmem:[#allocation5 + $0x140] sm:$0xff]  ;;  %v625_v11 = vld [vmem:[#allocation5 + $0x148] sm:$0xff]  ;;  %v1277_v41 = vld [vmem:[#allocation5 + $0x1f0] sm:$0xff] }
  0x1a   :  { %v107_v12 = vld [vmem:[#allocation5 + $0x120] sm:$0xff]  ;;  %v624_v13 = vld [vmem:[#allocation5 + $0x128] sm:$0xff]  ;;  %v1276_v42 = vld [vmem:[#allocation5 + $0x1d0] sm:$0xff] }
  0x1b   :  { %121 = vmatpush.msra.mxu0 %v110_v6  ;;  %638 = vmatpush.msra.mxu1 %v627_v7  ;;  %v106_v14 = vld [vmem:[#allocation5 + $0x100] sm:$0xff]  ;;  %v623_v15 = vld [vmem:[#allocation5 + $0x108] sm:$0xff]  ;;  %v1275_v43 = vld [vmem:[#allocation5 + $0x1b0] sm:$0xff] }
  0x1c   :  { %v105_v16 = vld [vmem:[#allocation5 + $0xe0] sm:$0xff]  ;;  %v622_v17 = vld [vmem:[#allocation5 + $0xe8] sm:$0xff]  ;;  %v1274_v44 = vld [vmem:[#allocation5 + $0x190] sm:$0xff] }
  0x1d   :  { %122 = vmatpush.msra.mxu0 %v109_v8  ;;  %639 = vmatpush.msra.mxu1 %v626_v9  ;;  %v104_v18 = vld [vmem:[#allocation5 + $0xc0] sm:$0xff]  ;;  %v621_v19 = vld [vmem:[#allocation5 + $0xc8] sm:$0xff]  ;;  %v1273_v46 = vld [vmem:[#allocation5 + $0x170] sm:$0xff] }
  0x1e   :  { %v103_v20 = vld [vmem:[#allocation5 + $0xa0] sm:$0xff]  ;;  %v620_v21 = vld [vmem:[#allocation5 + $0xa8] sm:$0xff]  ;;  %v1272_v47 = vld [vmem:[#allocation5 + $0x150] sm:$0xff] }
  0x1f   :  { %123 = vmatpush.msra.mxu0 %v108_v10  ;;  %640 = vmatpush.msra.mxu1 %v625_v11  ;;  %v102_v22 = vld [vmem:[#allocation5 + $0x80] sm:$0xff]  ;;  %v619_v23 = vld [vmem:[#allocation5 + $0x88] sm:$0xff]  ;;  %v1271_v48 = vld [vmem:[#allocation5 + $0x130] sm:$0xff] }
  0x20   :  { %v101_v24 = vld [vmem:[#allocation5 + $0x60] sm:$0xff]  ;;  %v618_v25 = vld [vmem:[#allocation5 + $0x68] sm:$0xff]  ;;  %v1270_v49 = vld [vmem:[#allocation5 + $0x110] sm:$0xff] }
  0x21   :  { %124 = vmatpush.msra.mxu0 %v107_v12  ;;  %641 = vmatpush.msra.mxu1 %v624_v13  ;;  %v100_v26 = vld [vmem:[#allocation5 + $0x40] sm:$0xff]  ;;  %v617_v27 = vld [vmem:[#allocation5 + $0x48] sm:$0xff]  ;;  %v3032_v50 = vld [vmem:[#allocation2 + $0x50] sm:$0xff] }
  0x22   :  { %v99_v28 = vld [vmem:[#allocation5 + $0x20] sm:$0xff]  ;;  %v616_v29 = vld [vmem:[#allocation5 + $0x28] sm:$0xff]  ;;  %v1269_v51 = vld [vmem:[#allocation5 + $0xf0] sm:$0xff] }
  0x23   :  { %125 = vmatpush.msra.mxu0 %v106_v14  ;;  %642 = vmatpush.msra.mxu1 %v623_v15  ;;  %v98_v30 = vld [vmem:[#allocation5] sm:$0xff]  ;;  %v615_v31 = vld [vmem:[#allocation5 + $0x8] sm:$0xff]  ;;  %v1268_v52 = vld [vmem:[#allocation5 + $0xd0] sm:$0xff] }
  0x24   :  { %v2992_v32 = vld [vmem:[#allocation2] sm:$0xff]  ;;  %v2996_v33 = vld [vmem:[#allocation2 + $0x8] sm:$0xff]  ;;  %v1267_v53 = vld [vmem:[#allocation5 + $0xb0] sm:$0xff] }
  0x25   :  { %126 = vmatpush.msra.mxu0 %v105_v16  ;;  %643 = vmatpush.msra.mxu1 %v622_v17  ;;  %v3008_v36 = vld [vmem:[#allocation2 + $0x20] sm:$0xff]  ;;  %v3012_v37 = vld [vmem:[#allocation2 + $0x28] sm:$0xff]  ;;  %v1266_v54 = vld [vmem:[#allocation5 + $0x90] sm:$0xff] }
  0x26   :  { %v3024_v40 = vld [vmem:[#allocation2 + $0x40] sm:$0xff]  ;;  %v3028_v45 = vld [vmem:[#allocation2 + $0x48] sm:$0xff]  ;;  %v3036_v55 = vld [vmem:[#allocation2 + $0x58] sm:$0xff] }
  0x27   :  { %127 = vmatpush.msra.mxu0 %v104_v18  ;;  %644 = vmatpush.msra.mxu1 %v621_v19  ;;  %v1265_v56 = vld [vmem:[#allocation5 + $0x70] sm:$0xff]  ;;  %v3040_v58 = vld [vmem:[#allocation2 + $0x60] sm:$0xff]  ;;  %v95_v61 = vld [vmem:[#allocation2 + $0x68] sm:$0xff] }
  0x28   :  { %v1264_v57 = vld [vmem:[#allocation5 + $0x50] sm:$0xff]  ;;  %v1131_v63 = vld [vmem:[#allocation8 + $0xf8] sm:$0xff]  ;;  %v1128_v6 = vld [vmem:[#allocation8 + $0xe0] sm:$0xff] }
  0x29   :  { %128 = vmatpush.msra.mxu0 %v103_v20  ;;  %645 = vmatpush.msra.mxu1 %v620_v21  ;;  %v1263_v59 = vld [vmem:[#allocation5 + $0x30] sm:$0xff]  ;;  %v614_v0 = vld [vmem:[#allocation8 + $0x78] sm:$0xff]  ;;  %v611_v7 = vld [vmem:[#allocation8 + $0x60] sm:$0xff] }
  0x2a   :  { %v1262_v60 = vld [vmem:[#allocation5 + $0x10] sm:$0xff]  ;;  %1132 = vmatpush.msra.mxu2 %v1131_v63  ;;  %1197 = vmatpush.msra.mxu3 %v614_v0  ;;  %v97_v1 = vld [vmem:[#allocation2 + $0x78] sm:$0xff]  ;;  %v3044_v8 = vld [vmem:[#allocation7] ss:$0 sm:$0xff] }
  0x2b   :  { %129 = vmatpush.msra.mxu0 %v102_v22  ;;  %646 = vmatpush.msra.mxu1 %v619_v23  ;;  %v96_v62 = vld [vmem:[#allocation2 + $0x70] sm:$0xff]  ;;  %v3046_v9 = vld [vmem:[#allocation7 + $0x1] ss:$0 sm:$0xff]  ;;  %v1124_v22 = vld [vmem:[#allocation8 + $0xc0] sm:$0xff] }
  0x2c   :  { %v1130_v2 = vld [vmem:[#allocation8 + $0xf0] sm:$0xff]  ;;  %v1129_v4 = vld [vmem:[#allocation8 + $0xe8] sm:$0xff]  ;;  %v1127_v10 = vld [vmem:[#allocation8 + $0xd8] sm:$0xff] }
  0x2d   :  { %130 = vmatpush.msra.mxu0 %v101_v24  ;;  %647 = vmatpush.msra.mxu1 %v618_v25  ;;  %v613_v3 = vld [vmem:[#allocation8 + $0x70] sm:$0xff]  ;;  %v612_v5 = vld [vmem:[#allocation8 + $0x68] sm:$0xff]  ;;  %v610_v11 = vld [vmem:[#allocation8 + $0x58] sm:$0xff] }
  0x2e   :  { %1133 = vmatpush.msra.mxu2 %v1130_v2  ;;  %1198 = vmatpush.msra.mxu3 %v613_v3  ;;  %v1126_v14 = vld [vmem:[#allocation8 + $0xd0] sm:$0xff]  ;;  %v1125_v18 = vld [vmem:[#allocation8 + $0xc8] sm:$0xff]  ;;  %v607_v23 = vld [vmem:[#allocation8 + $0x40] sm:$0xff] }
  0x2f   :  { %131 = vmatpush.msra.mxu0 %v100_v26  ;;  %648 = vmatpush.msra.mxu1 %v617_v27  ;;  %v609_v15 = vld [vmem:[#allocation8 + $0x50] sm:$0xff]  ;;  %v608_v19 = vld [vmem:[#allocation8 + $0x48] sm:$0xff]  ;;  %v1123_v26 = vld [vmem:[#allocation8 + $0xb8] sm:$0xff] }
  0x30   :  { %1134 = vmatpush.msra.mxu2 %v1129_v4  ;;  %1199 = vmatpush.msra.mxu3 %v612_v5  ;;  %v606_v27 = vld [vmem:[#allocation8 + $0x38] sm:$0xff]  ;;  %v601_v63 = vld [vmem:[#allocation8 + $0x10] sm:$0xff]  ;;  %v1117_v3 = vld [vmem:[#allocation8 + $0x88] sm:$0xff] }
  0x31   :  { %132 = vmatpush.msra.mxu0 %v99_v28  ;;  %649 = vmatpush.msra.mxu1 %v616_v29  ;;  %v600_v4 = vld [vmem:[#allocation8 + $0x8] sm:$0xff] }
  0x32   :  { %1135 = vmatpush.msra.mxu2 %v1128_v6  ;;  %1200 = vmatpush.msra.mxu3 %v611_v7 }
  0x33   :  { %133 = vmatpush.msra.mxu0 %v98_v30  ;;  %650 = vmatpush.msra.mxu1 %v615_v31 }
  0x34   :  { %134 = vmatmul.f32.vlgmr.msra.gmra.mxu0 %v2992_v32  ;;  %651 = vmatmul.f32.vlgmr.msra.gmra.mxu1 %v2992_v32 }
  0x35   :  { %1282 = vmatpush.msrb.mxu0 %v1277_v41  ;;  %1136 = vmatpush.msra.mxu2 %v1127_v10  ;;  %v605_v41 = vld [vmem:[#allocation8 + $0x30] sm:$0xff] }
  0x36   :  { %1201 = vmatpush.msra.mxu3 %v610_v11  ;;  %v1116_v11 = vld [vmem:[#allocation8 + $0x80] sm:$0xff] }
  0x37   :  { %1283 = vmatpush.msrb.mxu0 %v1276_v42  ;;  %1137 = vmatpush.msra.mxu2 %v1126_v14 }
  0x38   :  { %1202 = vmatpush.msra.mxu3 %v609_v15 }
  0x39   :  { %1284 = vmatpush.msrb.mxu0 %v1275_v43  ;;  %1138 = vmatpush.msra.mxu2 %v1125_v18 }
  0x3a   :  { %1203 = vmatpush.msra.mxu3 %v608_v19 }
  0x3b   :  { %1285 = vmatpush.msrb.mxu0 %v1274_v44  ;;  %1139 = vmatpush.msra.mxu2 %v1124_v22 }
  0x3c   :  { %137 = vmatmul.f32.gmra.mxu0 %v2996_v33  ;;  %654 = vmatmul.f32.gmra.mxu1 %v2996_v33 }
  0x3d   :  { %1286 = vmatpush.msrb.mxu0 %v1273_v46  ;;  %1204 = vmatpush.msra.mxu3 %v607_v23  ;;  %v1121_v46 = vld [vmem:[#allocation8 + $0xa8] sm:$0xff] }
  0x3e   :  { %1140 = vmatpush.msra.mxu2 %v1123_v26 }
  0x3f   :  { %1287 = vmatpush.msrb.mxu0 %v1272_v47  ;;  %1205 = vmatpush.msra.mxu3 %v606_v27  ;;  %v604_v47 = vld [vmem:[#allocation8 + $0x28] sm:$0xff] }
  0x41   :  { %1288 = vmatpush.msrb.mxu0 %v1271_v48  ;;  %1206 = vmatpush.msra.mxu3 %v605_v41 }
  0x43   :  { %1289 = vmatpush.msrb.mxu0 %v1270_v49  ;;  %1207 = vmatpush.msra.mxu3 %v604_v47  ;;  %v1120_v49 = vld [vmem:[#allocation8 + $0xa0] sm:$0xff] }
  0x44   :  { %140 = vmatmul.f32.gmra.mxu0 %v3000_v34  ;;  %657 = vmatmul.f32.gmra.mxu1 %v3000_v34 }
  0x45   :  { %1290 = vmatpush.msrb.mxu0 %v1269_v51  ;;  %v603_v51 = vld [vmem:[#allocation8 + $0x20] sm:$0xff] }
  0x46   :  { %1208 = vmatpush.msra.mxu3 %v603_v51 }
  0x47   :  { %1291 = vmatpush.msrb.mxu0 %v1268_v52 }
  0x49   :  { %1292 = vmatpush.msrb.mxu0 %v1267_v53  ;;  %v1119_v53 = vld [vmem:[#allocation8 + $0x98] sm:$0xff] }
  0x4b   :  { %1293 = vmatpush.msrb.mxu0 %v1266_v54  ;;  %v602_v54 = vld [vmem:[#allocation8 + $0x18] sm:$0xff] }
  0x4c   :  { %143 = vmatmul.f32.gmra.mxu0 %v3004_v35  ;;  %660 = vmatmul.f32.gmra.mxu1 %v3004_v35 }
  0x4d   :  { %1294 = vmatpush.msrb.mxu0 %v1265_v56  ;;  %1209 = vmatpush.msra.mxu3 %v602_v54 }
  0x4f   :  { %1295 = vmatpush.msrb.mxu0 %v1264_v57  ;;  %1210 = vmatpush.msra.mxu3 %v601_v63 }
  0x51   :  { %1296 = vmatpush.msrb.mxu0 %v1263_v59  ;;  %1211 = vmatpush.msra.mxu3 %v600_v4 }
  0x53   :  { %1297 = vmatpush.msrb.mxu0 %v1262_v60 }
  0x54   :  { %146 = vmatmul.f32.gmra.mxu0 %v3008_v36  ;;  %663 = vmatmul.f32.gmra.mxu1 %v3008_v36 }
  0x5c   :  { %149 = vmatmul.f32.gmra.mxu0 %v3012_v37  ;;  %666 = vmatmul.f32.gmra.mxu1 %v3012_v37 }
  0x64   :  { %152 = vmatmul.f32.gmra.mxu0 %v3016_v38  ;;  %669 = vmatmul.f32.gmra.mxu1 %v3016_v38 }
  0x6c   :  { %155 = vmatmul.f32.gmra.mxu0 %v3020_v39  ;;  %672 = vmatmul.f32.gmra.mxu1 %v3020_v39 }
  0x74   :  { %158 = vmatmul.f32.gmra.mxu0 %v3024_v40  ;;  %675 = vmatmul.f32.gmra.mxu1 %v3024_v40 }
  0x7c   :  { %161 = vmatmul.f32.gmra.mxu0 %v3028_v45  ;;  %678 = vmatmul.f32.gmra.mxu1 %v3028_v45 }
  0x84   :  { %164 = vmatmul.f32.gmra.mxu0 %v3032_v50  ;;  %681 = vmatmul.f32.gmra.mxu1 %v3032_v50 }
  0x8c   :  { %167 = vmatmul.f32.gmra.mxu0 %v3036_v55  ;;  %684 = vmatmul.f32.gmra.mxu1 %v3036_v55 }
  0x94   :  { %170 = vmatmul.f32.gmra.mxu0 %v3040_v58  ;;  %687 = vmatmul.f32.gmra.mxu1 %v3040_v58 }
  0x9c   :  { %173 = vmatmul.f32.gmra.mxu0 %v95_v61  ;;  %690 = vmatmul.f32.gmra.mxu1 %v95_v61 }
  0xa4   :  { %176 = vmatmul.f32.gmra.mxu0 %v96_v62  ;;  %693 = vmatmul.f32.gmra.mxu1 %v96_v62  ;;  %v1118_v62 = vld [vmem:[#allocation8 + $0x90] sm:$0xff] }
  0xac   :  { %179 = vmatmul.f32.gmra.mxu0 %v97_v1  ;;  %696 = vmatmul.f32.gmra.mxu1 %v97_v1 }
  0xb1   :  { %v135_v12 = vpop.f32.mrf.mxu0  ;;  %v652_v13 = vpop.f32.mrf.mxu1 }
  0xb2   :  { %v3049_v16 = vadd.f32 %v3044_v8, %v135_v12  ;;  %v3052_v17 = vadd.f32 %v3046_v9, %v652_v13  ;;  %v599_v12 = vld [vmem:[#allocation8] sm:$0xff] }
  0xb3   :  { %1212 = vmatpush.msra.mxu3 %v599_v12 }
  0xb4   :  { %v183_v20 = vand.u32 2147483647, %v3049_v16  ;;  %v700_v21 = vand.u32 2147483647, %v3052_v17  ;;  %1298 = vmatmul.f32.vlgmr.msrb.gmra.mxu0 %v2992_v32  ;;  %v1122_v32 = vld [vmem:[#allocation8 + $0xb0] sm:$0xff] }
  0xb5   :  { %1141 = vmatpush.msra.mxu2 %v1122_v32 }
  0xb6   :  { %v3059_v24 = vmul.f32 0.70710677, %v183_v20  ;;  %v3063_v25 = vmul.f32 0.70710677, %v700_v21 }
  0xb7   :  { %1142 = vmatpush.msra.mxu2 %v1121_v46 }
  0xb8   :  { %v215_v28 = vmul.f32 0.3275911, %v3059_v24  ;;  %v732_v29 = vmul.f32 0.3275911, %v3063_v25  ;;  %v455_v13 = vsub.f32 0.0, %v3059_v24  ;;  %v972_v23 = vsub.f32 0.0, %v3063_v25 }
  0xb9   :  { %v138_v30 = vpop.f32.mrf.mxu0  ;;  %v655_v31 = vpop.f32.mrf.mxu1  ;;  %1143 = vmatpush.msra.mxu2 %v1120_v49 }
  0xba   :  { %v231_v42 = vadd.f32 1.0, %v215_v28  ;;  %v748_v43 = vadd.f32 1.0, %v732_v29  ;;  %v3068_v44 = vadd.f32 %v3044_v8, %v138_v30  ;;  %v3071_v48 = vadd.f32 %v3046_v9, %v655_v31 }
  0xbb   :  { %1144 = vmatpush.msra.mxu2 %v1119_v53  ;;  %v471_v30 = vmul.f32 %v455_v13, %v3059_v24  ;;  %v988_v24 = vmul.f32 %v972_v23, %v3063_v25 }
  0xbc   :  { %2529 = vrcp.f32 %v231_v42  ;;  %1301 = vmatmul.f32.gmra.mxu0 %v2996_v33  ;;  %v4717_v52 = vand.u32 2147483647, %v3068_v44  ;;  %v4719_v56 = vand.u32 2147483647, %v3071_v48 }
  0xbd   :  { %2531 = vrcp.f32 %v748_v43  ;;  %1145 = vmatpush.msra.mxu2 %v1118_v62 }
  0xbe   :  { %v200_v2 = vmul.f32 0.70710677, %v4717_v52  ;;  %v717_v6 = vmul.f32 0.70710677, %v4719_v56  ;;  %v1874_v56 = vld [vmem:[#allocation5 + $0x1d8] sm:$0xff] }
  0xbf   :  { %1146 = vmatpush.msra.mxu2 %v1117_v3  ;;  %v1004_v3 = vmul.f32 1.442695, %v988_v24 }
  0xc0   :  { %v216_v19 = vmul.f32 0.3275911, %v200_v2  ;;  %v456_v47 = vsub.f32 0.0, %v200_v2  ;;  %v973_v54 = vsub.f32 0.0, %v717_v6 }
  0xc1   :  { %v141_v57 = vpop.f32.mrf.mxu0  ;;  %v658_v59 = vpop.f32.mrf.mxu1  ;;  %1147 = vmatpush.msra.mxu2 %v1116_v11 }
  0xc2   :  { %v2530_v60 = vpop.eup %2529  ;;  %v3077_v33 = vadd.f32 %v3044_v8, %v141_v57  ;;  %v3080_v61 = vadd.f32 %v3046_v9, %v658_v59  ;;  %v232_v41 = vadd.f32 1.0, %v216_v19  ;;  %v989_v11 = vmul.f32 %v973_v54, %v717_v6 }
  0xc3   :  { %v2532_v0 = vpop.eup %2531  ;;  %v263_v1 = vmul.f32 %v2530_v60, %v231_v42 }
  0xc4   :  { %v780_v5 = vmul.f32 %v2532_v0, %v748_v43  ;;  %1304 = vmatmul.f32.gmra.mxu0 %v3000_v34  ;;  %v4713_v10 = vand.u32 2147483647, %v3077_v33  ;;  %v4714_v15 = vand.u32 2147483647, %v3080_v61  ;;  %v733_v34 = vmul.f32 0.3275911, %v717_v6 }
  0xc5   :  { %v279_v7 = vsub.f32 2.0, %v263_v1  ;;  %2533 = vrcp.f32 %v232_v41 }
  0xc6   :  { %v796_v14 = vsub.f32 2.0, %v780_v5  ;;  %v201_v26 = vmul.f32 0.70710677, %v4713_v10  ;;  %v718_v31 = vmul.f32 0.70710677, %v4714_v15  ;;  %v749_v49 = vadd.f32 1.0, %v733_v34 }
  0xc7   :  { %v3090_v18 = vmul.f32 %v2530_v60, %v279_v7  ;;  %v487_v60 = vmul.f32 1.442695, %v471_v30 }
  0xc8   :  { %v3092_v22 = vmul.f32 %v2532_v0, %v796_v14  ;;  %v217_v53 = vmul.f32 0.3275911, %v201_v26  ;;  %v734_v57 = vmul.f32 0.3275911, %v718_v31  ;;  %v472_v0 = vmul.f32 %v456_v47, %v200_v2 }
  0xc9   :  { %v144_v27 = vpop.f32.mrf.mxu0  ;;  %v661_v28 = vpop.f32.mrf.mxu1  ;;  %v311_v29 = vmul.f32 1.0614054, %v3090_v18  ;;  %2535 = vrcp.f32 %v749_v49  ;;  %v457_v4 = vsub.f32 0.0, %v201_v26  ;;  %v974_v13 = vsub.f32 0.0, %v718_v31 }
  0xca   :  { %v3102_v32 = vadd.f32 %v3044_v8, %v144_v27  ;;  %v3105_v42 = vadd.f32 %v3046_v9, %v661_v28  ;;  %v828_v43 = vmul.f32 1.0614054, %v3092_v22  ;;  %v3118_v25 = vadd.f32 1.0, %v217_v53 }
  0xcb   :  { %v327_v46 = vadd.f32 -1.4531521, %v311_v29  ;;  %v3120_v12 = vadd.f32 1.0, %v734_v57  ;;  %2537 = vpow2.f32 %v487_v60  ;;  %v489_v27 = vmul.f32 1.442695, %v472_v0  ;;  %v2534_v6 = vpop.eup %2533  ;;  %v1875_v60 = vld [vmem:[#allocation5 + $0x1f8] sm:$0xff] }
  0xcc   :  { %v4710_v51 = vand.u32 2147483647, %v3102_v32  ;;  %1307 = vmatmul.f32.gmra.mxu0 %v3004_v35  ;;  %v844_v59 = vadd.f32 -1.4531521, %v828_v43  ;;  %v4712_v62 = vand.u32 2147483647, %v3105_v42  ;;  %2539 = vrcp.f32 %v3118_v25  ;;  %1880 = vmatpush.msrb.mxu2 %v1875_v60 }
  0xcd   :  { %v343_v63 = vmul.f32 %v327_v46, %v3090_v18  ;;  %v473_v29 = vmul.f32 %v457_v4, %v201_v26  ;;  %2541 = vpow2.f32 %v1004_v3  ;;  %v1006_v46 = vmul.f32 1.442695, %v989_v11 }
  0xce   :  { %v3115_v1 = vmul.f32 0.70710677, %v4710_v51  ;;  %v860_v35 = vmul.f32 %v844_v59, %v3092_v22  ;;  %v3127_v2 = vmul.f32 0.70710677, %v4712_v62  ;;  %v990_v47 = vmul.f32 %v974_v13, %v718_v31  ;;  %1881 = vmatpush.msrb.mxu2 %v1874_v56 }
  0xcf   :  { %v359_v23 = vadd.f32 1.4214138, %v343_v63  ;;  %v2536_v43 = vpop.eup %2535  ;;  %2543 = vrcp.f32 %v3120_v12  ;;  %v264_v57 = vmul.f32 %v2534_v6, %v232_v41  ;;  %v491_v0 = vmul.f32 1.442695, %v473_v29 }
  0xd0   :  { %v876_v34 = vadd.f32 1.4214138, %v860_v35  ;;  %v218_v28 = vmul.f32 0.3275911, %v3115_v1  ;;  %v735_v53 = vmul.f32 0.3275911, %v3127_v2  ;;  %2545 = vpow2.f32 %v489_v27 }
  0xd1   :  { %v147_v5 = vpop.f32.mrf.mxu0  ;;  %v664_v7 = vpop.f32.mrf.mxu1  ;;  %v781_v63 = vmul.f32 %v2536_v43, %v749_v49  ;;  %v458_v31 = vsub.f32 0.0, %v3115_v1  ;;  %2547 = vpow2.f32 %v1006_v46  ;;  %v1008_v41 = vmul.f32 1.442695, %v990_v47 }
  0xd2   :  { %v3123_v14 = vadd.f32 %v3044_v8, %v147_v5  ;;  %v3130_v19 = vadd.f32 %v3046_v9, %v664_v7  ;;  %v892_v24 = vmul.f32 %v876_v34, %v3092_v22  ;;  %v3141_v59 = vadd.f32 1.0, %v218_v28  ;;  %v3148_v5 = vpop.eup %2537 }
  0xd3   :  { %v2540_v49 = vpop.eup %2539  ;;  %v3156_v13 = vadd.f32 1.0, %v735_v53  ;;  %v280_v29 = vsub.f32 2.0, %v264_v57  ;;  %v975_v46 = vsub.f32 0.0, %v3127_v2  ;;  %v797_v53 = vsub.f32 2.0, %v781_v63 }
  0xd4   :  { %1310 = vmatmul.f32.gmra.mxu0 %v3008_v36  ;;  %v4708_v30 = vand.u32 2147483647, %v3123_v14  ;;  %v4709_v54 = vand.u32 2147483647, %v3130_v19  ;;  %v375_v36 = vmul.f32 %v359_v23, %v3090_v18  ;;  %v908_v26 = vadd.f32 -0.28449672, %v892_v24  ;;  %v2542_v28 = vpop.eup %2541 }
  0xd5   :  { %2549 = vrcp.f32 %v3141_v59  ;;  %v3167_v24 = vpop.eup %2543  ;;  %v474_v60 = vmul.f32 %v458_v31, %v3115_v1  ;;  %v3184_v31 = vmul.f32 %v2534_v6, %v280_v29 }
  0xd6   :  { %v3146_v35 = vmul.f32 0.70710677, %v4708_v30  ;;  %v3160_v34 = vmul.f32 0.70710677, %v4709_v54  ;;  %v924_v23 = vmul.f32 %v908_v26, %v3092_v22  ;;  %v391_v27 = vadd.f32 -0.28449672, %v375_v36  ;;  %v3171_v26 = vpop.eup %2545 }
  0xd7   :  { %2551 = vpow2.f32 %v491_v0  ;;  %v265_v36 = vmul.f32 %v2540_v49, %v3118_v25  ;;  %v3182_v0 = vpop.eup %2547  ;;  %v782_v25 = vmul.f32 %v3167_v24, %v3120_v12  ;;  %v3190_v30 = vmul.f32 %v2536_v43, %v797_v53 }
  0xd8   :  { %2553 = vpow2.f32 %v1008_v41  ;;  %v407_v1 = vmul.f32 %v391_v27, %v3090_v18  ;;  %v991_v41 = vmul.f32 %v975_v46, %v3127_v2  ;;  %v493_v54 = vmul.f32 1.442695, %v474_v60 }
  0xd9   :  { %v150_v3 = vpop.f32.mrf.mxu0  ;;  %v667_v4 = vpop.f32.mrf.mxu1  ;;  %2555 = vrcp.f32 %v3156_v13  ;;  %v281_v15 = vsub.f32 2.0, %v265_v36 }
  0xda   :  { %v3151_v7 = vadd.f32 %v3044_v8, %v150_v3  ;;  %v3154_v11 = vadd.f32 %v3046_v9, %v667_v4  ;;  %v219_v3 = vmul.f32 0.3275911, %v3146_v35  ;;  %v940_v4 = vadd.f32 0.2548296, %v924_v23 }
  0xdb   :  { %v2550_v10 = vpop.eup %2549  ;;  %v423_v53 = vadd.f32 0.2548296, %v407_v1  ;;  %v1010_v36 = vmul.f32 1.442695, %v991_v41  ;;  %v3221_v1 = vmul.f32 %v2540_v49, %v281_v15 }
  0xdc   :  { %4762 = vst [vmem:[#allocation15_spill] sm:$0xff] %v3151_v7  ;;  %v4711_v47 = vand.u32 2147483647, %v3151_v7  ;;  %1313 = vmatmul.f32.gmra.mxu0 %v3012_v37  ;;  %v4715_v57 = vand.u32 2147483647, %v3154_v11  ;;  %v956_v23 = vmul.f32 %v940_v4, %v3092_v22  ;;  %v3192_v51 = vadd.f32 1.0, %v219_v3 }
  0xdd   :  { %v736_v37 = vmul.f32 0.3275911, %v3160_v34  ;;  %v3205_v2 = vpop.eup %2551  ;;  %v798_v3 = vsub.f32 2.0, %v782_v25  ;;  %v976_v4 = vsub.f32 0.0, %v3160_v34 }
  0xde   :  { %v3179_v63 = vmul.f32 0.70710677, %v4711_v47  ;;  %v459_v47 = vsub.f32 0.0, %v3146_v35  ;;  %v3197_v6 = vmul.f32 0.70710677, %v4715_v57  ;;  %v1036_v46 = vmul.f32 %v2542_v28, %v956_v23  ;;  %v3210_v60 = vpop.eup %2553 }
  0xdf   :  { %v3207_v43 = vadd.f32 1.0, %v736_v37  ;;  %v266_v57 = vmul.f32 %v2550_v10, %v3141_v59  ;;  %2557 = vrcp.f32 %v3192_v51  ;;  %v439_v59 = vmul.f32 %v423_v53, %v3090_v18 }
  0xe0   :  { %v220_v29 = vmul.f32 0.3275911, %v3179_v63  ;;  %v475_v37 = vmul.f32 %v459_v47, %v3146_v35  ;;  %2559 = vpow2.f32 %v493_v54  ;;  %v737_v25 = vmul.f32 0.3275911, %v3197_v6 }
  0xe1   :  { %v153_v62 = vpop.f32.mrf.mxu0  ;;  %v670_v27 = vpop.f32.mrf.mxu1  ;;  %v1052_v41 = vsub.f32 1.0, %v1036_v46  ;;  %2561 = vrcp.f32 %v3207_v43  ;;  %v992_v15 = vmul.f32 %v976_v4, %v3160_v34  ;;  %v282_v49 = vsub.f32 2.0, %v266_v57 }
  0xe2   :  { %v3200_v12 = vadd.f32 %v3044_v8, %v153_v62  ;;  %v3203_v22 = vadd.f32 %v3046_v9, %v670_v27  ;;  %v3215_v27 = vpop.eup %2555  ;;  %v3225_v23 = vadd.f32 1.0, %v220_v29  ;;  %2563 = vpow2.f32 %v1010_v36 }
  0xe3   :  { %v783_v35 = vmul.f32 %v3215_v27, %v3156_v13  ;;  %v1068_v54 = vmul.f32 %v1052_v41, %v700_v21  ;;  %v495_v47 = vmul.f32 1.442695, %v475_v37  ;;  %v519_v46 = vmul.f32 %v3148_v5, %v439_v59 }
  0xe4   :  { %4763 = vst [vmem:[#allocation16_spill] sm:$0xff] %v3200_v12  ;;  %v4716_v62 = vand.u32 2147483647, %v3200_v12  ;;  %1316 = vmatmul.f32.gmra.mxu0 %v3016_v38  ;;  %v4718_v28 = vand.u32 2147483647, %v3203_v22  ;;  %v3241_v52 = vadd.f32 1.0, %v737_v25  ;;  %2565 = vrcp.f32 %v3225_v23 }
  0xe5   :  { %4764 = vst [vmem:[#allocation17_spill] sm:$0xff] %v3203_v22  ;;  %v977_v18 = vsub.f32 0.0, %v3197_v6  ;;  %v1084_v13 = vadd.f32 %v1068_v54, %v3052_v17  ;;  %v2558_v53 = vpop.eup %2557  ;;  %v535_v34 = vsub.f32 1.0, %v519_v46  ;;  %v829_v36 = vmul.f32 1.0614054, %v3190_v30 }
  0xe6   :  { %v3229_v38 = vmul.f32 0.70710677, %v4716_v62  ;;  %v722_v29 = vmul.f32 0.70710677, %v4718_v28  ;;  %v460_v62 = vsub.f32 0.0, %v3179_v63  ;;  %v3248_v4 = vpop.eup %2559  ;;  %v3251_v5 = vmul.f32 %v3167_v24, %v798_v3 }
  0xe7   :  { %v799_v37 = vsub.f32 2.0, %v783_v35  ;;  %v1012_v25 = vmul.f32 1.442695, %v992_v15  ;;  %v1100_v41 = vmul.f32 0.5, %v1084_v13  ;;  %v2562_v17 = vpop.eup %2561  ;;  %v3254_v59 = vmul.f32 %v2550_v10, %v282_v49 }
  0xe8   :  { %v221_v21 = vmul.f32 0.3275911, %v3229_v38  ;;  %2567 = vpow2.f32 %v495_v47  ;;  %v738_v54 = vmul.f32 0.3275911, %v722_v29  ;;  %v551_v46 = vmul.f32 %v535_v34, %v183_v20  ;;  %v3258_v12 = vpop.eup %2563 }
  0xe9   :  { %v156_v57 = vpop.f32.mrf.mxu0  ;;  %v673_v28 = vpop.f32.mrf.mxu1  ;;  %v267_v24 = vmul.f32 %v2558_v53, %v3192_v51  ;;  %v476_v3 = vmul.f32 %v460_v62, %v3179_v63  ;;  %2569 = vrcp.f32 %v3241_v52  ;;  %1148 = vmatmul.f32.vlgmr.msra.gmra.mxu2 %v1100_v41  ;;  %v993_v10 = vmul.f32 %v977_v18, %v3197_v6 }
  0xea   :  { %v3267_v35 = vadd.f32 1.0, %v221_v21  ;;  %v567_v20 = vadd.f32 %v551_v46, %v3049_v16  ;;  %v845_v15 = vadd.f32 -1.4531521, %v829_v36  ;;  %v784_v49 = vmul.f32 %v2562_v17, %v3207_v43  ;;  %v2566_v62 = vpop.eup %2565 }
  0xeb   :  { %2571 = vpow2.f32 %v1012_v25  ;;  %v461_v51 = vsub.f32 0.0, %v3229_v38  ;;  %v312_v63 = vmul.f32 1.0614054, %v3184_v31  ;;  %v3273_v47 = vadd.f32 1.0, %v738_v54 }
  0xec   :  { %1319 = vmatmul.f32.gmra.mxu0 %v3020_v39  ;;  %v3264_v39 = vadd.f32 %v3044_v8, %v156_v57  ;;  %v978_v13 = vsub.f32 0.0, %v722_v29  ;;  %v583_v34 = vmul.f32 0.5, %v567_v20  ;;  %v861_v6 = vmul.f32 %v845_v15, %v3190_v30 }
  0xed   :  { %v3277_v18 = vmul.f32 %v3215_v27, %v799_v37  ;;  %v283_v16 = vsub.f32 2.0, %v267_v24  ;;  %v497_v21 = vmul.f32 1.442695, %v476_v3  ;;  %v1014_v57 = vmul.f32 1.442695, %v993_v10 }
  0xee   :  { %4765 = vst [vmem:[#allocation18_spill] sm:$0xff] %v3264_v39  ;;  %v4722_v56 = vand.u32 2147483647, %v3264_v39  ;;  %v3280_v43 = vpop.eup %2567  ;;  %2573 = vrcp.f32 %v3267_v35  ;;  %1213 = vmatmul.f32.vlgmr.msra.gmra.mxu3 %v583_v34  ;;  %v877_v36 = vadd.f32 1.4214138, %v861_v6  ;;  %v800_v54 = vsub.f32 2.0, %v784_v49 }
  0xef   :  { %v328_v25 = vadd.f32 -1.4531521, %v312_v63  ;;  %v2570_v41 = vpop.eup %2569  ;;  %v268_v46 = vmul.f32 %v2566_v62, %v3225_v23  ;;  %v477_v20 = vmul.f32 %v461_v51, %v3229_v38  ;;  %v3286_v27 = vadd.f32 %v3046_v9, %v673_v28 }
  0xf0   :  { %2575 = vrcp.f32 %v3273_v47  ;;  %v994_v37 = vmul.f32 %v978_v13, %v722_v29  ;;  %v893_v24 = vmul.f32 %v877_v36, %v3190_v30  ;;  %v3294_v15 = vmul.f32 %v2558_v53, %v283_v16 }
  0xf1   :  { %4766 = vst [vmem:[#allocation19_spill] sm:$0xff] %v3286_v27  ;;  %v344_v3 = vmul.f32 %v328_v25, %v3184_v31  ;;  %v3292_v10 = vpop.eup %2571  ;;  %2577 = vpow2.f32 %v497_v21  ;;  %v206_v23 = vmul.f32 0.70710677, %v4722_v56  ;;  %v159_v38 = vpop.f32.mrf.mxu0  ;;  %v830_v28 = vmul.f32 1.0614054, %v3251_v5 }
  0xf2   :  { %2579 = vpow2.f32 %v1014_v57  ;;  %v909_v49 = vadd.f32 -0.28449672, %v893_v24  ;;  %v676_v51 = vpop.f32.mrf.mxu1  ;;  %v3300_v63 = vmul.f32 %v2562_v17, %v800_v54  ;;  %v284_v13 = vsub.f32 2.0, %v268_v46 }
  0xf3   :  { %v360_v29 = vadd.f32 1.4214138, %v344_v3  ;;  %v499_v34 = vmul.f32 1.442695, %v477_v20  ;;  %v4723_v53 = vand.u32 2147483647, %v3286_v27  ;;  %v3308_v25 = vadd.f32 %v3044_v8, %v159_v38 }
  0xf4   :  { %1322 = vmatmul.f32.gmra.mxu0 %v3024_v40  ;;  %v785_v40 = vmul.f32 %v2570_v41, %v3241_v52  ;;  %v3303_v6 = vpop.eup %2573  ;;  %v1016_v16 = vmul.f32 1.442695, %v994_v37  ;;  %v925_v21 = vmul.f32 %v909_v49, %v3190_v30  ;;  %v222_v52 = vmul.f32 0.3275911, %v206_v23 }
  0xf5   :  { %v376_v36 = vmul.f32 %v360_v29, %v3184_v31  ;;  %v3311_v57 = vadd.f32 %v3046_v9, %v676_v51  ;;  %v846_v17 = vadd.f32 -1.4531521, %v830_v28  ;;  %v313_v54 = vmul.f32 1.0614054, %v3221_v1 }
  0xf6   :  { %v2576_v46 = vpop.eup %2575  ;;  %v801_v20 = vsub.f32 2.0, %v785_v40  ;;  %v462_v24 = vsub.f32 0.0, %v206_v23  ;;  %v941_v3 = vadd.f32 0.2548296, %v925_v21  ;;  %v3316_v49 = vmul.f32 %v2566_v62, %v284_v13  ;;  %v1873_v13 = vld [vmem:[#allocation5 + $0x1b8] sm:$0xff] }
  0xf7   :  { %v392_v56 = vadd.f32 -0.28449672, %v376_v36  ;;  %v3314_v37 = vpop.eup %2577  ;;  %v269_v38 = vmul.f32 %v3303_v6, %v3267_v35  ;;  %2581 = vpow2.f32 %v499_v34  ;;  %v723_v29 = vmul.f32 0.70710677, %v4723_v53  ;;  %1882 = vmatpush.msrb.mxu2 %v1873_v13 }
  0xf8   :  { %v3323_v28 = vpop.eup %2579  ;;  %v957_v40 = vmul.f32 %v941_v3, %v3190_v30  ;;  %v862_v62 = vmul.f32 %v846_v17, %v3251_v5  ;;  %v786_v36 = vmul.f32 %v2576_v46, %v3273_v47  ;;  %v3330_v35 = vadd.f32 1.0, %v222_v52 }
  0xf9   :  { %v408_v51 = vmul.f32 %v392_v56, %v3184_v31  ;;  %v4741_v34 = vand.u32 2147483647, %v3311_v57  ;;  %v329_v53 = vadd.f32 -1.4531521, %v313_v54  ;;  %v3334_v3 = vmul.f32 %v2570_v41, %v801_v20  ;;  %v162_v54 = vpop.f32.mrf.mxu0 }
  0xfa   :  { %v1037_v39 = vmul.f32 %v3182_v0, %v957_v40  ;;  %v878_v30 = vadd.f32 1.4214138, %v862_v62  ;;  %v285_v56 = vsub.f32 2.0, %v269_v38  ;;  %2583 = vpow2.f32 %v1016_v16  ;;  %v679_v20 = vpop.f32.mrf.mxu1 }
  0xfb   :  { %v424_v27 = vadd.f32 0.2548296, %v408_v51  ;;  %v739_v21 = vmul.f32 0.3275911, %v723_v29  ;;  %v979_v17 = vsub.f32 0.0, %v723_v29  ;;  %v345_v16 = vmul.f32 %v329_v53, %v3221_v1 }
  0xfc   :  { %1325 = vmatmul.f32.gmra.mxu0 %v3028_v45  ;;  %v478_v45 = vmul.f32 %v462_v24, %v206_v23  ;;  %v1053_v22 = vsub.f32 1.0, %v1037_v39  ;;  %v4767_v52 = vand.u32 2147483647, %v3308_v25  ;;  %v802_v23 = vsub.f32 2.0, %v786_v36 }
  0xfd   :  { %v440_v47 = vmul.f32 %v424_v27, %v3184_v31  ;;  %v3341_v13 = vpop.eup %2581  ;;  %v3345_v0 = vmul.f32 0.70710677, %v4741_v34  ;;  %v894_v41 = vmul.f32 %v878_v30, %v3251_v5  ;;  %2585 = vrcp.f32 %v3330_v35 }
  0xfe   :  { %v3339_v7 = vmul.f32 0.70710677, %v4767_v52  ;;  %v501_v31 = vmul.f32 1.442695, %v478_v45  ;;  %v4768_v39 = vand.u32 2147483647, %v3071_v48  ;;  %v3356_v62 = vadd.f32 %v3044_v8, %v162_v54 }
  0xff   :  { %v520_v24 = vmul.f32 %v3171_v26, %v440_v47  ;;  %v3353_v38 = vadd.f32 1.0, %v739_v21  ;;  %v910_v40 = vadd.f32 -0.28449672, %v894_v41  ;;  %v361_v51 = vadd.f32 1.4214138, %v345_v16 }
 0x100   :  { %v1069_v27 = vmul.f32 %v1053_v22, %v4768_v39  ;;  %v223_v30 = vmul.f32 0.3275911, %v3339_v7  ;;  %v3362_v45 = vadd.f32 %v3046_v9, %v679_v20  ;;  %v3364_v22 = vpop.eup %2583  ;;  %v3367_v26 = vmul.f32 %v3303_v6, %v285_v56 }
 0x101   :  { %v536_v36 = vsub.f32 1.0, %v520_v24  ;;  %v740_v21 = vmul.f32 0.3275911, %v3345_v0  ;;  %v926_v47 = vmul.f32 %v910_v40, %v3251_v5  ;;  %v377_v52 = vmul.f32 %v361_v51, %v3221_v1 }
 0x102   :  { %v1085_v53 = vadd.f32 %v1069_v27, %v3071_v48  ;;  %v995_v48 = vmul.f32 %v979_v17, %v723_v29  ;;  %v4769_v41 = vand.u32 2147483647, %v3068_v44  ;;  %2587 = vrcp.f32 %v3353_v38  ;;  %v1872_v17 = vld [vmem:[#allocation5 + $0x198] sm:$0xff] }
 0x103   :  { %v942_v20 = vadd.f32 0.2548296, %v926_v47  ;;  %v393_v39 = vadd.f32 -0.28449672, %v377_v52  ;;  %v4737_v6 = vand.u32 2147483647, %v3356_v62  ;;  %v2586_v56 = vpop.eup %2585  ;;  %1883 = vmatpush.msrb.mxu2 %v1872_v17  ;;  %2589 = vpow2.f32 %v501_v31  ;;  %v165_v31 = vpop.f32.mrf.mxu0 }
 0x104   :  { %1328 = vmatmul.f32.gmra.mxu0 %v3032_v50  ;;  %v3372_v50 = vmul.f32 %v2576_v46, %v802_v23  ;;  %v1101_v54 = vmul.f32 0.5, %v1085_v53  ;;  %v552_v16 = vmul.f32 %v536_v36, %v4769_v41  ;;  %v3379_v24 = vadd.f32 1.0, %v223_v30  ;;  %v682_v17 = vpop.f32.mrf.mxu1 }
 0x105   :  { %v4740_v46 = vand.u32 2147483647, %v3362_v45  ;;  %v831_v29 = vmul.f32 1.0614054, %v3277_v18  ;;  %v3383_v23 = vadd.f32 1.0, %v740_v21  ;;  %v958_v40 = vmul.f32 %v942_v20, %v3251_v5 }
 0x106   :  { %1151 = vmatmul.f32.gmra.mxu2 %v1101_v54  ;;  %v568_v27 = vadd.f32 %v552_v16, %v3068_v44  ;;  %v409_v51 = vmul.f32 %v393_v39, %v3221_v1  ;;  %v314_v53 = vmul.f32 1.0614054, %v3254_v59  ;;  %v1018_v36 = vmul.f32 1.442695, %v995_v48 }
 0x107   :  { %v463_v44 = vsub.f32 0.0, %v3339_v7  ;;  %v980_v30 = vsub.f32 0.0, %v3345_v0  ;;  %v270_v52 = vmul.f32 %v2586_v56, %v3330_v35  ;;  %v1038_v54 = vmul.f32 %v3210_v60, %v958_v40 }
 0x108   :  { %v584_v47 = vmul.f32 0.5, %v568_v27  ;;  %v425_v21 = vadd.f32 0.2548296, %v409_v51  ;;  %2591 = vrcp.f32 %v3379_v24  ;;  %v3396_v5 = vmul.f32 0.70710677, %v4737_v6  ;;  %v3402_v16 = vpop.eup %2587 }
 0x109   :  { %v3400_v48 = vmul.f32 0.70710677, %v4740_v46  ;;  %v847_v41 = vadd.f32 -1.4531521, %v831_v29  ;;  %2593 = vrcp.f32 %v3383_v23  ;;  %v1054_v60 = vsub.f32 1.0, %v1038_v54 }
 0x10a   :  { %1216 = vmatmul.f32.gmra.mxu3 %v584_v47  ;;  %v441_v35 = vmul.f32 %v425_v21, %v3221_v1  ;;  %2595 = vpow2.f32 %v1018_v36  ;;  %v479_v20 = vmul.f32 %v463_v44, %v3339_v7  ;;  %v996_v39 = vmul.f32 %v980_v30, %v3345_v0  ;;  %v3418_v0 = vpop.eup %2589 }
 0x10b   :  { %v863_v27 = vmul.f32 %v847_v41, %v3277_v18  ;;  %v286_v40 = vsub.f32 2.0, %v270_v52  ;;  %v4770_v29 = vand.u32 2147483647, %v3080_v61  ;;  %v224_v1 = vmul.f32 0.3275911, %v3396_v5 }
 0x10c   :  { %1331 = vmatmul.f32.gmra.mxu0 %v3036_v55  ;;  %v330_v55 = vadd.f32 -1.4531521, %v314_v53  ;;  %v521_v47 = vmul.f32 %v3205_v2, %v441_v35  ;;  %v741_v53 = vmul.f32 0.3275911, %v3400_v48  ;;  %v3416_v7 = vadd.f32 %v3044_v8, %v165_v31 }
 0x10d   :  { %v1070_v51 = vmul.f32 %v1054_v60, %v4770_v29  ;;  %v879_v36 = vadd.f32 1.4214138, %v863_v27  ;;  %v3422_v21 = vadd.f32 %v3046_v9, %v682_v17  ;;  %v787_v41 = vmul.f32 %v3402_v16, %v3353_v38 }
 0x10e   :  { %v346_v54 = vmul.f32 %v330_v55, %v3254_v59  ;;  %v537_v30 = vsub.f32 1.0, %v521_v47  ;;  %v2592_v2 = vpop.eup %2591  ;;  %v503_v60 = vmul.f32 1.442695, %v479_v20  ;;  %v1020_v35 = vmul.f32 1.442695, %v996_v39 }
 0x10f   :  { %v1086_v44 = vadd.f32 %v1070_v51, %v3080_v61  ;;  %v895_v55 = vmul.f32 %v879_v36, %v3277_v18  ;;  %v2594_v27 = vpop.eup %2593  ;;  %v3427_v8 = vmul.f32 %v2586_v56, %v286_v40  ;;  %v4771_v29 = vand.u32 2147483647, %v3077_v33 }
 0x110   :  { %v362_v52 = vadd.f32 1.4214138, %v346_v54  ;;  %v3433_v9 = vpop.eup %2595  ;;  %v3435_v17 = vadd.f32 1.0, %v224_v1  ;;  %v3437_v38 = vadd.f32 1.0, %v741_v53  ;;  %v4732_v39 = vand.u32 2147483647, %v3416_v7 }
 0x111   :  { %v1102_v31 = vmul.f32 0.5, %v1086_v44  ;;  %v553_v61 = vmul.f32 %v537_v30, %v4771_v29  ;;  %v911_v20 = vadd.f32 -0.28449672, %v895_v55  ;;  %v4733_v47 = vand.u32 2147483647, %v3422_v21  ;;  %v1871_v53 = vld [vmem:[#allocation5 + $0x178] sm:$0xff] }
 0x112   :  { %v378_v51 = vmul.f32 %v362_v52, %v3254_v59  ;;  %v832_v54 = vmul.f32 1.0614054, %v3300_v63  ;;  %v803_v36 = vsub.f32 2.0, %v787_v41  ;;  %v788_v44 = vmul.f32 %v2594_v27, %v3383_v23  ;;  %1884 = vmatpush.msrb.mxu2 %v1871_v53  ;;  %v2785_v53 = vld [vmem:[#allocation2 + $0x68] sm:$0xff] }
 0x113   :  { %1154 = vmatmul.f32.gmra.mxu2 %v1102_v31  ;;  %v569_v56 = vadd.f32 %v553_v61, %v3077_v33  ;;  %v927_v1 = vmul.f32 %v911_v20, %v3277_v18  ;;  %2597 = vpow2.f32 %v503_v60  ;;  %v464_v52 = vsub.f32 0.0, %v3396_v5 }
 0x114   :  { %1334 = vmatmul.f32.gmra.mxu0 %v3040_v58  ;;  %v394_v40 = vadd.f32 -0.28449672, %v378_v51  ;;  %v271_v58 = vmul.f32 %v2592_v2, %v3379_v24  ;;  %2599 = vrcp.f32 %v3435_v17  ;;  %v981_v33 = vsub.f32 0.0, %v3400_v48 }
 0x115   :  { %v585_v30 = vmul.f32 0.5, %v569_v56  ;;  %v943_v31 = vadd.f32 0.2548296, %v927_v1  ;;  %v3452_v24 = vmul.f32 0.70710677, %v4732_v39  ;;  %2601 = vrcp.f32 %v3437_v38 }
 0x116   :  { %v410_v55 = vmul.f32 %v394_v40, %v3254_v59  ;;  %v3457_v41 = vmul.f32 0.70710677, %v4733_v47  ;;  %v848_v60 = vadd.f32 -1.4531521, %v832_v54  ;;  %v287_v29 = vsub.f32 2.0, %v271_v58 }
 0x117   :  { %1219 = vmatmul.f32.gmra.mxu3 %v585_v30  ;;  %v804_v61 = vsub.f32 2.0, %v788_v44  ;;  %v959_v51 = vmul.f32 %v943_v31, %v3277_v18  ;;  %v315_v20 = vmul.f32 1.0614054, %v3294_v15  ;;  %2603 = vpow2.f32 %v1020_v35  ;;  %v168_v44 = vpop.f32.mrf.mxu0 }
 0x118   :  { %v426_v23 = vadd.f32 0.2548296, %v410_v55  ;;  %v480_v56 = vmul.f32 %v464_v52, %v3396_v5  ;;  %v864_v1 = vmul.f32 %v848_v60, %v3300_v63  ;;  %v997_v30 = vmul.f32 %v981_v33, %v3400_v48 }
 0x119   :  { %v1039_v55 = vmul.f32 %v3258_v12, %v959_v51  ;;  %v225_v54 = vmul.f32 0.3275911, %v3452_v24  ;;  %v331_v58 = vadd.f32 -1.4531521, %v315_v20  ;;  %v3467_v18 = vpop.eup %2597  ;;  %v3470_v35 = vmul.f32 %v3402_v16, %v803_v36  ;;  %v3480_v16 = vld [vmem:[#allocation7] ss:$0 sm:$0xff] }
 0x11a   :  { %v442_v40 = vmul.f32 %v426_v23, %v3254_v59  ;;  %v742_v59 = vmul.f32 0.3275911, %v3457_v41  ;;  %v880_v52 = vadd.f32 1.4214138, %v864_v1  ;;  %v2600_v31 = vpop.eup %2599  ;;  %v3474_v23 = vmul.f32 %v2592_v2, %v287_v29 }
 0x11b   :  { %v3476_v48 = vmul.f32 %v2594_v27, %v804_v61  ;;  %v1055_v12 = vsub.f32 1.0, %v1039_v55  ;;  %v347_v33 = vmul.f32 %v331_v58, %v3294_v15  ;;  %v2602_v60 = vpop.eup %2601  ;;  %v505_v51 = vmul.f32 1.442695, %v480_v56  ;;  %v685_v61 = vpop.f32.mrf.mxu1 }
 0x11c   :  { %1337 = vmatmul.f32.gmra.mxu0 %v2785_v53  ;;  %v522_v5 = vmul.f32 %v3248_v4, %v442_v40  ;;  %v896_v53 = vmul.f32 %v880_v52, %v3300_v63  ;;  %v3483_v4 = vadd.f32 %v3480_v16, %v168_v44  ;;  %v1022_v36 = vmul.f32 1.442695, %v997_v30 }
 0x11d   :  { %v4772_v40 = vand.u32 2147483647, %v3105_v42  ;;  %v3487_v29 = vadd.f32 1.0, %v225_v54  ;;  %v363_v27 = vadd.f32 1.4214138, %v347_v33  ;;  %v3489_v1 = vpop.eup %2603  ;;  %v272_v56 = vmul.f32 %v2600_v31, %v3435_v17 }
 0x11e   :  { %v538_v20 = vsub.f32 1.0, %v522_v5  ;;  %v4773_v55 = vand.u32 2147483647, %v3102_v32  ;;  %v3494_v5 = vadd.f32 1.0, %v742_v59  ;;  %v912_v52 = vadd.f32 -0.28449672, %v896_v53 }
 0x11f   :  { %v1071_v2 = vmul.f32 %v1055_v12, %v4772_v40  ;;  %v789_v44 = vmul.f32 %v2602_v60, %v3437_v38  ;;  %v379_v12 = vmul.f32 %v363_v27, %v3294_v15  ;;  %v833_v54 = vmul.f32 1.0614054, %v3334_v3  ;;  %v2787_v59 = vld [vmem:[#allocation2 + $0x70] sm:$0xff] }
 0x120   :  { %v554_v58 = vmul.f32 %v538_v20, %v4773_v55  ;;  %v465_v40 = vsub.f32 0.0, %v3452_v24  ;;  %v928_v17 = vmul.f32 %v912_v52, %v3300_v63  ;;  %v4734_v39 = vand.u32 2147483647, %v3483_v4  ;;  %v1870_v20 = vld [vmem:[#allocation5 + $0x158] sm:$0xff] }
 0x121   :  { %v1087_v30 = vadd.f32 %v1071_v2, %v3105_v42  ;;  %2605 = vrcp.f32 %v3487_v29  ;;  %v395_v38 = vadd.f32 -0.28449672, %v379_v12  ;;  %v3505_v42 = vld [vmem:[#allocation7 + $0x1] ss:$0 sm:$0xff]  ;;  %1885 = vmatpush.msrb.mxu2 %v1870_v20  ;;  %v982_v27 = vsub.f32 0.0, %v3457_v41 }
 0x122   :  { %v570_v33 = vadd.f32 %v554_v58, %v3102_v32  ;;  %v3508_v2 = vadd.f32 %v3505_v42, %v685_v61  ;;  %2607 = vrcp.f32 %v3494_v5  ;;  %v944_v55 = vadd.f32 0.2548296, %v928_v17 }
 0x123   :  { %v1103_v53 = vmul.f32 0.5, %v1087_v30  ;;  %v288_v58 = vsub.f32 2.0, %v272_v56  ;;  %v805_v52 = vsub.f32 2.0, %v789_v44  ;;  %v411_v30 = vmul.f32 %v395_v38, %v3294_v15 }
 0x124   :  { %1340 = vmatmul.f32.gmra.mxu0 %v2787_v59  ;;  %v586_v32 = vmul.f32 0.5, %v570_v33  ;;  %v849_v59 = vadd.f32 -1.4531521, %v833_v54  ;;  %2609 = vpow2.f32 %v505_v51  ;;  %v960_v12 = vmul.f32 %v944_v55, %v3300_v63  ;;  %v688_v55 = vpop.f32.mrf.mxu1 }
 0x125   :  { %1157 = vmatmul.f32.gmra.mxu2 %v1103_v53  ;;  %v210_v61 = vmul.f32 0.70710677, %v4734_v39  ;;  %v316_v33 = vmul.f32 1.0614054, %v3316_v49  ;;  %v481_v20 = vmul.f32 %v465_v40, %v3452_v24  ;;  %v427_v47 = vadd.f32 0.2548296, %v411_v30  ;;  %v171_v53 = vpop.f32.mrf.mxu0 }
 0x126   :  { %1222 = vmatmul.f32.gmra.mxu3 %v586_v32  ;;  %v4735_v17 = vand.u32 2147483647, %v3508_v2  ;;  %v865_v56 = vmul.f32 %v849_v59, %v3334_v3  ;;  %2611 = vpow2.f32 %v1022_v36  ;;  %v998_v44 = vmul.f32 %v982_v27, %v3457_v41 }
 0x127   :  { %v1040_v51 = vmul.f32 %v3292_v10, %v960_v12  ;;  %v332_v54 = vadd.f32 -1.4531521, %v316_v33  ;;  %v3522_v63 = vpop.eup %2605  ;;  %v3524_v38 = vmul.f32 %v2600_v31, %v288_v58  ;;  %v3526_v32 = vmul.f32 %v2602_v60, %v805_v52  ;;  %v2789_v10 = vld [vmem:[#allocation2 + $0x78] sm:$0xff] }
 0x128   :  { %v443_v24 = vmul.f32 %v427_v47, %v3294_v15  ;;  %v881_v40 = vadd.f32 1.4214138, %v865_v56  ;;  %v3529_v30 = vpop.eup %2607  ;;  %v226_v36 = vmul.f32 0.3275911, %v210_v61  ;;  %v466_v39 = vsub.f32 0.0, %v210_v61 }
 0x129   :  { %v1056_v59 = vsub.f32 1.0, %v1040_v51  ;;  %v348_v41 = vmul.f32 %v332_v54, %v3316_v49  ;;  %v507_v27 = vmul.f32 1.442695, %v481_v20  ;;  %v3535_v31 = vmul.f32 0.70710677, %v4735_v17 }
 0x12a   :  { %v523_v12 = vmul.f32 %v3280_v43, %v443_v24  ;;  %v897_v15 = vmul.f32 %v881_v40, %v3334_v3  ;;  %v3538_v47 = vpop.eup %2609  ;;  %v1024_v60 = vmul.f32 1.442695, %v998_v44  ;;  %v4774_v58 = vand.u32 2147483647, %v3130_v19 }
 0x12b   :  { %v364_v33 = vadd.f32 1.4214138, %v348_v41  ;;  %v3543_v56 = vadd.f32 %v3480_v16, %v171_v53  ;;  %v273_v20 = vmul.f32 %v3522_v63, %v3487_v29  ;;  %v790_v43 = vmul.f32 %v3529_v30, %v3494_v5 }
 0x12c   :  { %1343 = vmatmul.f32.gmra.mxu0 %v2789_v10  ;;  %v1072_v52 = vmul.f32 %v1056_v59, %v4774_v58  ;;  %v539_v51 = vsub.f32 1.0, %v523_v12  ;;  %v913_v54 = vadd.f32 -0.28449672, %v897_v15  ;;  %v3549_v24 = vpop.eup %2611  ;;  %v3552_v44 = vadd.f32 1.0, %v226_v36  ;;  %v1869_v36 = vld [vmem:[#allocation5 + $0x138] sm:$0xff] }
 0x12d   :  { %4775 = vst [vmem:[#allocation20_spill] sm:$0xff] %v3543_v56  ;;  %v482_v10 = vmul.f32 %v466_v39, %v210_v61  ;;  %v380_v59 = vmul.f32 %v364_v33, %v3316_v49  ;;  %v4776_v53 = vand.u32 2147483647, %v3123_v14  ;;  %v743_v58 = vmul.f32 0.3275911, %v3535_v31  ;;  %1886 = vmatpush.msrb.mxu2 %v1869_v36 }
 0x12e   :  { %v1088_v40 = vadd.f32 %v1072_v52, %v3130_v19  ;;  %v929_v29 = vmul.f32 %v913_v54, %v3334_v3  ;;  %v834_v5 = vmul.f32 1.0614054, %v3372_v50  ;;  %2613 = vpow2.f32 %v507_v27  ;;  %v174_v27 = vpop.f32.mrf.mxu0 }
 0x12f   :  { %v555_v41 = vmul.f32 %v539_v51, %v4776_v53  ;;  %v396_v15 = vadd.f32 -0.28449672, %v380_v59  ;;  %v4736_v17 = vand.u32 2147483647, %v3543_v56  ;;  %v289_v19 = vsub.f32 2.0, %v273_v20 }
 0x130   :  { %v1104_v12 = vmul.f32 0.5, %v1088_v40  ;;  %2615 = vpow2.f32 %v1024_v60  ;;  %v945_v61 = vadd.f32 0.2548296, %v929_v29  ;;  %v806_v52 = vsub.f32 2.0, %v790_v43  ;;  %v691_v60 = vpop.f32.mrf.mxu1 }
 0x131   :  { %v571_v39 = vadd.f32 %v555_v41, %v3123_v14  ;;  %2617 = vrcp.f32 %v3552_v44  ;;  %v412_v33 = vmul.f32 %v396_v15, %v3316_v49  ;;  %v3565_v51 = vadd.f32 %v3505_v42, %v688_v55 }
 0x132   :  { %1160 = vmatmul.f32.gmra.mxu2 %v1104_v12  ;;  %v509_v40 = vmul.f32 1.442695, %v482_v10  ;;  %v961_v59 = vmul.f32 %v945_v61, %v3334_v3  ;;  %v850_v20 = vadd.f32 -1.4531521, %v834_v5  ;;  %v3568_v14 = vadd.f32 1.0, %v743_v58 }
 0x133   :  { %v587_v54 = vmul.f32 0.5, %v571_v39  ;;  %v983_v43 = vsub.f32 0.0, %v3535_v31  ;;  %v428_v53 = vadd.f32 0.2548296, %v412_v33  ;;  %v211_v41 = vmul.f32 0.70710677, %v4736_v17 }
 0x134   :  { %v1041_v55 = vmul.f32 %v3323_v28, %v961_v59  ;;  %v866_v29 = vmul.f32 %v850_v20, %v3372_v50  ;;  %v317_v10 = vmul.f32 1.0614054, %v3367_v26  ;;  %v3577_v3 = vadd.f32 %v3480_v16, %v174_v27  ;;  %v3579_v5 = vpop.eup %2613 }
 0x135   :  { %1225 = vmatmul.f32.gmra.mxu3 %v587_v54  ;;  %v444_v58 = vmul.f32 %v428_v53, %v3316_v49  ;;  %v4738_v12 = vand.u32 2147483647, %v3565_v51  ;;  %v3584_v15 = vadd.f32 %v3505_v42, %v691_v60  ;;  %v835_v39 = vmul.f32 1.0614054, %v3470_v35 }
 0x136   :  { %4777 = vst [vmem:[#allocation21_spill] sm:$0xff] %v3577_v3  ;;  %v3587_v61 = vpop.eup %2615  ;;  %v3590_v28 = vmul.f32 %v3522_v63, %v289_v19  ;;  %v1057_v36 = vsub.f32 1.0, %v1041_v55  ;;  %v882_v33 = vadd.f32 1.4214138, %v866_v29  ;;  %v333_v27 = vadd.f32 -1.4531521, %v317_v10 }
 0x137   :  { %4778 = vst [vmem:[#allocation22_spill] sm:$0xff] %v3584_v15  ;;  %v3592_v54 = vpop.eup %2617  ;;  %v3595_v59 = vmul.f32 %v3529_v30, %v806_v52  ;;  %2619 = vrcp.f32 %v3568_v14  ;;  %v524_v49 = vmul.f32 %v3314_v37, %v444_v58  ;;  %v4739_v20 = vand.u32 2147483647, %v3577_v3 }
 0x138   :  { %v4779_v60 = vand.u32 2147483647, %v3154_v11  ;;  %v227_v17 = vmul.f32 0.3275911, %v211_v41  ;;  %v898_v63 = vmul.f32 %v882_v33, %v3372_v50  ;;  %v349_v19 = vmul.f32 %v333_v27, %v3367_v26  ;;  %v4780_v33 = vld [vmem:[#allocation15_spill] sm:$0xff] }
 0x139   :  { %v999_v55 = vmul.f32 %v983_v43, %v3535_v31  ;;  %v540_v29 = vsub.f32 1.0, %v524_v49  ;;  %v728_v30 = vmul.f32 0.70710677, %v4738_v12  ;;  %v4742_v52 = vand.u32 2147483647, %v3584_v15 }
 0x13a   :  { %v1073_v53 = vmul.f32 %v1057_v36, %v4779_v60  ;;  %v914_v10 = vadd.f32 -0.28449672, %v898_v63  ;;  %v365_v58 = vadd.f32 1.4214138, %v349_v19  ;;  %v851_v6 = vadd.f32 -1.4531521, %v835_v39 }
 0x13b   :  { %v274_v36 = vmul.f32 %v3592_v54, %v3552_v44  ;;  %2621 = vpow2.f32 %v509_v40  ;;  %v4781_v60 = vand.u32 2147483647, %v4780_v33  ;;  %v3615_v31 = vmul.f32 0.70710677, %v4739_v20  ;;  %v1868_v19 = vld [vmem:[#allocation5 + $0x118] sm:$0xff] }
 0x13c   :  { %v1089_v37 = vadd.f32 %v1073_v53, %v3154_v11  ;;  %v467_v49 = vsub.f32 0.0, %v211_v41  ;;  %v930_v12 = vmul.f32 %v914_v10, %v3372_v50  ;;  %v381_v11 = vmul.f32 %v365_v58, %v3367_v26  ;;  %1887 = vmatpush.msrb.mxu2 %v1868_v19 }
 0x13d   :  { %v556_v27 = vmul.f32 %v540_v29, %v4781_v60  ;;  %v3619_v53 = vpop.eup %2619  ;;  %v1026_v39 = vmul.f32 1.442695, %v999_v55  ;;  %v243_v44 = vadd.f32 1.0, %v227_v17  ;;  %v3624_v40 = vmul.f32 0.70710677, %v4742_v52 }
 0x13e   :  { %v1105_v43 = vmul.f32 0.5, %v1089_v37  ;;  %v744_v29 = vmul.f32 0.3275911, %v728_v30  ;;  %v946_v60 = vadd.f32 0.2548296, %v930_v12  ;;  %v867_v20 = vmul.f32 %v851_v6, %v3470_v35 }
 0x13f   :  { %v572_v63 = vadd.f32 %v556_v27, %v4780_v33  ;;  %v397_v37 = vadd.f32 -0.28449672, %v381_v11  ;;  %v290_v10 = vsub.f32 2.0, %v274_v36  ;;  %v984_v58 = vsub.f32 0.0, %v728_v30 }
 0x140   :  { %1163 = vmatmul.f32.gmra.mxu2 %v1105_v43  ;;  %v228_v34 = vmul.f32 0.3275911, %v3615_v31  ;;  %v483_v55 = vmul.f32 %v467_v49, %v211_v41  ;;  %v962_v17 = vmul.f32 %v946_v60, %v3372_v50  ;;  %v883_v27 = vadd.f32 1.4214138, %v867_v20  ;;  %v177_v43 = vpop.f32.mrf.mxu0 }
 0x141   :  { %v588_v46 = vmul.f32 0.5, %v572_v63  ;;  %v413_v33 = vmul.f32 %v397_v37, %v3367_v26  ;;  %v3630_v52 = vpop.eup %2621  ;;  %v791_v12 = vmul.f32 %v3619_v53, %v3568_v14  ;;  %2623 = vrcp.f32 %v243_v44 }
 0x142   :  { %v745_v6 = vmul.f32 0.3275911, %v3624_v40  ;;  %v318_v36 = vmul.f32 1.0614054, %v3427_v8  ;;  %v3636_v11 = vadd.f32 1.0, %v744_v29  ;;  %v1042_v41 = vmul.f32 %v3364_v22, %v962_v17 }
 0x143   :  { %1228 = vmatmul.f32.gmra.mxu3 %v588_v46  ;;  %v429_v50 = vadd.f32 0.2548296, %v413_v33  ;;  %v899_v49 = vmul.f32 %v883_v27, %v3470_v35  ;;  %2625 = vpow2.f32 %v1026_v39  ;;  %v1000_v20 = vmul.f32 %v984_v58, %v728_v30  ;;  %v694_v39 = vpop.f32.mrf.mxu1 }
 0x144   :  { %v3640_v63 = vadd.f32 1.0, %v228_v34  ;;  %v334_v19 = vadd.f32 -1.4531521, %v318_v36  ;;  %v1058_v14 = vsub.f32 1.0, %v1042_v41  ;;  %v3644_v37 = vadd.f32 %v3480_v16, %v177_v43  ;;  %v4783_v34 = vld [vmem:[#allocation17_spill] sm:$0xff] }
 0x145   :  { %v445_v46 = vmul.f32 %v429_v50, %v3367_v26  ;;  %v915_v60 = vadd.f32 -0.28449672, %v899_v49  ;;  %v3647_v29 = vmul.f32 %v3592_v54, %v290_v10  ;;  %v511_v3 = vmul.f32 1.442695, %v483_v55 }
 0x146   :  { %4782 = vst [vmem:[#allocation15_spill] sm:$0xff] %v3644_v37  ;;  %v3649_v22 = vadd.f32 1.0, %v745_v6  ;;  %v350_v17 = vmul.f32 %v334_v19, %v3427_v8  ;;  %v807_v30 = vsub.f32 2.0, %v791_v12  ;;  %2627 = vrcp.f32 %v3636_v11 }
 0x147   :  { %v4784_v58 = vand.u32 2147483647, %v4783_v34  ;;  %v525_v26 = vmul.f32 %v3341_v13, %v445_v46  ;;  %v3656_v27 = vpop.eup %2623  ;;  %v1028_v36 = vmul.f32 1.442695, %v1000_v20  ;;  %2629 = vrcp.f32 %v3640_v63 }
 0x148   :  { %v931_v54 = vmul.f32 %v915_v60, %v3470_v35  ;;  %v366_v10 = vadd.f32 1.4214138, %v350_v17  ;;  %v4745_v12 = vand.u32 2147483647, %v3644_v37  ;;  %v3663_v43 = vadd.f32 %v3505_v42, %v694_v39 }
 0x149   :  { %v1074_v33 = vmul.f32 %v1058_v14, %v4784_v58  ;;  %v541_v6 = vsub.f32 1.0, %v525_v26  ;;  %v3665_v41 = vpop.eup %2625  ;;  %2631 = vrcp.f32 %v3649_v22  ;;  %v836_v49 = vmul.f32 1.0614054, %v3476_v48  ;;  %v4786_v14 = vld [vmem:[#allocation16_spill] sm:$0xff] }
 0x14a   :  { %4785 = vst [vmem:[#allocation17_spill] sm:$0xff] %v3663_v43  ;;  %v947_v13 = vadd.f32 0.2548296, %v931_v54  ;;  %v382_v50 = vmul.f32 %v366_v10, %v3427_v8  ;;  %v275_v20 = vmul.f32 %v3656_v27, %v243_v44  ;;  %v4787_v46 = vand.u32 2147483647, %v4786_v14 }
 0x14b   :  { %v1090_v55 = vadd.f32 %v1074_v33, %v4783_v34  ;;  %v468_v17 = vsub.f32 0.0, %v3615_v31  ;;  %v3675_v39 = vmul.f32 %v3619_v53, %v807_v30  ;;  %2633 = vpow2.f32 %v511_v3  ;;  %v1867_v33 = vld [vmem:[#allocation5 + $0xf8] sm:$0xff] }
 0x14c   :  { %v557_v60 = vmul.f32 %v541_v6, %v4787_v46  ;;  %v963_v34 = vmul.f32 %v947_v13, %v3470_v35  ;;  %v398_v58 = vadd.f32 -0.28449672, %v382_v50  ;;  %v2628_v26 = vpop.eup %2627  ;;  %v985_v44 = vsub.f32 0.0, %v3624_v40  ;;  %1888 = vmatpush.msrb.mxu2 %v1867_v33 }
 0x14d   :  { %v1106_v19 = vmul.f32 0.5, %v1090_v55  ;;  %v213_v10 = vmul.f32 0.70710677, %v4745_v12  ;;  %v3683_v6 = vpop.eup %2629  ;;  %2635 = vpow2.f32 %v1028_v36  ;;  %v852_v53 = vadd.f32 -1.4531521, %v836_v49 }
 0x14e   :  { %v573_v54 = vadd.f32 %v557_v60, %v4786_v14  ;;  %v1043_v3 = vmul.f32 %v3433_v9, %v963_v34  ;;  %v414_v35 = vmul.f32 %v398_v58, %v3427_v8  ;;  %v291_v30 = vsub.f32 2.0, %v275_v20  ;;  %v180_v58 = vpop.f32.mrf.mxu0 }
 0x14f   :  { %1166 = vmatmul.f32.gmra.mxu2 %v1106_v19  ;;  %v484_v50 = vmul.f32 %v468_v17, %v3615_v31  ;;  %v469_v19 = vsub.f32 0.0, %v213_v10  ;;  %v2632_v14 = vpop.eup %2631  ;;  %v868_v12 = vmul.f32 %v852_v53, %v3476_v48  ;;  %v319_v55 = vmul.f32 1.0614054, %v3474_v23  ;;  %v4789_v31 = vld [vmem:[#allocation19_spill] sm:$0xff] }
 0x150   :  { %v589_v13 = vmul.f32 0.5, %v573_v54  ;;  %v1059_v46 = vsub.f32 1.0, %v1043_v3  ;;  %v430_v60 = vadd.f32 0.2548296, %v414_v35  ;;  %v792_v36 = vmul.f32 %v2628_v26, %v3636_v11 }
 0x151   :  { %v1001_v9 = vmul.f32 %v985_v44, %v3624_v40  ;;  %v229_v34 = vmul.f32 0.3275911, %v213_v10  ;;  %v4788_v49 = vand.u32 2147483647, %v3663_v43  ;;  %v3694_v33 = vpop.eup %2633  ;;  %v4790_v17 = vand.u32 2147483647, %v4789_v31 }
 0x152   :  { %1231 = vmatmul.f32.gmra.mxu3 %v589_v13  ;;  %v446_v3 = vmul.f32 %v430_v60, %v3427_v8  ;;  %v884_v35 = vadd.f32 1.4214138, %v868_v12  ;;  %v335_v53 = vadd.f32 -1.4531521, %v319_v55  ;;  %v276_v11 = vmul.f32 %v3683_v6, %v3640_v63 }
 0x153   :  { %v730_v20 = vmul.f32 0.70710677, %v4788_v49  ;;  %v1075_v54 = vmul.f32 %v1059_v46, %v4790_v17  ;;  %v513_v13 = vmul.f32 1.442695, %v484_v50  ;;  %v793_v40 = vmul.f32 %v2632_v14, %v3649_v22  ;;  %v3702_v37 = vpop.eup %2635 }
 0x154   :  { %v485_v44 = vmul.f32 %v469_v19, %v213_v10  ;;  %v526_v43 = vmul.f32 %v3418_v0, %v446_v3  ;;  %v900_v15 = vmul.f32 %v884_v35, %v3476_v48  ;;  %v351_v46 = vmul.f32 %v335_v53, %v3474_v23  ;;  %v4791_v0 = vld [vmem:[#allocation18_spill] sm:$0xff] }
 0x155   :  { %v1091_v49 = vadd.f32 %v1075_v54, %v4789_v31  ;;  %v808_v8 = vsub.f32 2.0, %v792_v36  ;;  %v1030_v12 = vmul.f32 1.442695, %v1001_v9  ;;  %v245_v55 = vadd.f32 1.0, %v229_v34 }
 0x156   :  { %v746_v60 = vmul.f32 0.3275911, %v730_v20  ;;  %v542_v63 = vsub.f32 1.0, %v526_v43  ;;  %v916_v50 = vadd.f32 -0.28449672, %v900_v15  ;;  %v3709_v22 = vmul.f32 %v3656_v27, %v291_v30  ;;  %v1866_v27 = vld [vmem:[#allocation5 + $0xd8] sm:$0xff] }
 0x157   :  { %v1107_v17 = vmul.f32 0.5, %v1091_v49  ;;  %v367_v56 = vadd.f32 1.4214138, %v351_v46  ;;  %v292_v10 = vsub.f32 2.0, %v276_v11  ;;  %2637 = vpow2.f32 %v513_v13  ;;  %v697_v11 = vpop.f32.mrf.mxu1  ;;  %1889 = vmatpush.msrb.mxu2 %v1866_v27  ;;  %v3720_v13 = vld [vmem:[#allocation7 + $0x2] ss:$0 sm:$0xff] }
 0x158   :  { %v515_v19 = vmul.f32 1.442695, %v485_v44  ;;  %v809_v31 = vsub.f32 2.0, %v793_v40  ;;  %v4792_v54 = vand.u32 2147483647, %v4791_v0  ;;  %v932_v36 = vmul.f32 %v916_v50, %v3476_v48  ;;  %v1299_v44 = vpop.f32.mrf.mxu0 }
 0x159   :  { %1169 = vmatmul.f32.gmra.mxu2 %v1107_v17  ;;  %v383_v9 = vmul.f32 %v367_v56, %v3474_v23  ;;  %v3715_v34 = vmul.f32 %v2628_v26, %v808_v8  ;;  %2639 = vrcp.f32 %v245_v55  ;;  %v3717_v15 = vadd.f32 1.0, %v746_v60 }
 0x15a   :  { %v558_v3 = vmul.f32 %v542_v63, %v4792_v54  ;;  %v986_v43 = vsub.f32 0.0, %v730_v20  ;;  %2641 = vpow2.f32 %v1030_v12  ;;  %v948_v35 = vadd.f32 0.2548296, %v932_v36 }
 0x15b   :  { %v399_v53 = vadd.f32 -0.28449672, %v383_v9  ;;  %v3723_v40 = vmul.f32 %v3683_v6, %v292_v10  ;;  %2643 = vpow2.f32 %v515_v19  ;;  %v3726_v56 = vadd.f32 %v3480_v16, %v180_v58 }
 0x15c   :  { %v574_v30 = vadd.f32 %v558_v3, %v4791_v0  ;;  %v837_v26 = vmul.f32 1.0614054, %v3526_v32  ;;  %v3729_v49 = vmul.f32 %v2632_v14, %v809_v31  ;;  %v964_v8 = vmul.f32 %v948_v35, %v3476_v48 }
 0x15d   :  { %v415_v12 = vmul.f32 %v399_v53, %v3474_v23  ;;  %v3733_v60 = vpop.eup %2637  ;;  %v1002_v17 = vmul.f32 %v986_v43, %v730_v20  ;;  %v3736_v6 = vadd.f32 %v3505_v42, %v697_v11  ;;  %v320_v16 = vmul.f32 1.0614054, %v3524_v38 }
 0x15e   :  { %v590_v46 = vmul.f32 0.5, %v574_v30  ;;  %v853_v63 = vadd.f32 -1.4531521, %v837_v26  ;;  %2645 = vrcp.f32 %v3717_v15  ;;  %v1044_v14 = vmul.f32 %v3489_v1, %v964_v8 }
 0x15f   :  { %v431_v58 = vadd.f32 0.2548296, %v415_v12  ;;  %v3742_v50 = vadd.f32 %v3720_v13, %v1299_v44  ;;  %v2640_v48 = vpop.eup %2639  ;;  %v4754_v10 = vand.u32 2147483647, %v3726_v56  ;;  %v336_v19 = vadd.f32 -1.4531521, %v320_v16 }
 0x160   :  { %1234 = vmatmul.f32.gmra.mxu3 %v590_v46  ;;  %v869_v20 = vmul.f32 %v853_v63, %v3526_v32  ;;  %v838_v42 = vmul.f32 1.0614054, %v3595_v59  ;;  %v3747_v31 = vpop.eup %2641  ;;  %v1060_v0 = vsub.f32 1.0, %v1044_v14  ;;  %v321_v1 = vmul.f32 1.0614054, %v3590_v28 }
 0x161   :  { %v447_v54 = vmul.f32 %v431_v58, %v3474_v23  ;;  %v4756_v3 = vand.u32 2147483647, %v3742_v50  ;;  %v3752_v36 = vpop.eup %2643  ;;  %v4755_v9 = vand.u32 2147483647, %v3736_v6  ;;  %v352_v27 = vmul.f32 %v336_v19, %v3524_v38 }
 0x162   :  { %v885_v43 = vadd.f32 1.4214138, %v869_v20  ;;  %v854_v30 = vadd.f32 -1.4531521, %v838_v42  ;;  %v277_v35 = vmul.f32 %v2640_v48, %v245_v55  ;;  %v4793_v53 = vand.u32 2147483647, %v3311_v57 }
 0x163   :  { %v527_v26 = vmul.f32 %v3467_v18, %v447_v54  ;;  %v3761_v23 = vmul.f32 0.70710677, %v4756_v3  ;;  %v3765_v44 = vmul.f32 0.70710677, %v4754_v10  ;;  %v368_v8 = vadd.f32 1.4214138, %v352_v27 }
 0x164   :  { %v1076_v11 = vmul.f32 %v1060_v0, %v4793_v53  ;;  %v901_v46 = vmul.f32 %v885_v43, %v3526_v32  ;;  %v870_v12 = vmul.f32 %v854_v30, %v3595_v59  ;;  %v3769_v63 = vpop.eup %2645  ;;  %v337_v14 = vadd.f32 -1.4531521, %v321_v1 }
 0x165   :  { %v543_v16 = vsub.f32 1.0, %v527_v26  ;;  %v1379_v18 = vmul.f32 0.3275911, %v3761_v23  ;;  %v1032_v58 = vmul.f32 1.442695, %v1002_v17  ;;  %v384_v42 = vmul.f32 %v368_v8, %v3524_v38 }
 0x166   :  { %v1092_v55 = vadd.f32 %v1076_v11, %v3311_v57  ;;  %v3775_v20 = vmul.f32 0.70710677, %v4755_v9  ;;  %v917_v19 = vadd.f32 -0.28449672, %v901_v46  ;;  %v293_v0 = vsub.f32 2.0, %v277_v35 }
 0x167   :  { %v4794_v43 = vand.u32 2147483647, %v3308_v25  ;;  %v1395_v30 = vadd.f32 1.0, %v1379_v18  ;;  %v230_v57 = vmul.f32 0.3275911, %v3765_v44  ;;  %v353_v46 = vmul.f32 %v337_v14, %v3590_v28 }
 0x168   :  { %v1108_v54 = vmul.f32 0.5, %v1092_v55  ;;  %v933_v53 = vmul.f32 %v917_v19, %v3526_v32  ;;  %v400_v11 = vadd.f32 -0.28449672, %v384_v42  ;;  %v839_v17 = vmul.f32 1.0614054, %v3675_v39 }
 0x169   :  { %v559_v27 = vmul.f32 %v543_v16, %v4794_v43  ;;  %2647 = vrcp.f32 %v1395_v30  ;;  %v886_v26 = vadd.f32 1.4214138, %v870_v12  ;;  %v747_v35 = vmul.f32 0.3275911, %v3775_v20  ;;  %v1302_v16 = vpop.f32.mrf.mxu0 }
 0x16a   :  { %1172 = vmatmul.f32.gmra.mxu2 %v1108_v54  ;;  %2649 = vpow2.f32 %v1032_v58  ;;  %v949_v8 = vadd.f32 0.2548296, %v933_v53  ;;  %v416_v55 = vmul.f32 %v400_v11, %v3524_v38  ;;  %v3787_v18 = vmul.f32 %v2640_v48, %v293_v0 }
 0x16b   :  { %v575_v1 = vadd.f32 %v559_v27, %v3308_v25  ;;  %v902_v42 = vmul.f32 %v886_v26, %v3595_v59  ;;  %v369_v43 = vadd.f32 1.4214138, %v353_v46  ;;  %v470_v54 = vsub.f32 0.0, %v3765_v44 }
 0x16c   :  { %v965_v25 = vmul.f32 %v949_v8, %v3526_v32  ;;  %v432_v12 = vadd.f32 0.2548296, %v416_v55  ;;  %v855_v27 = vadd.f32 -1.4531521, %v839_v17  ;;  %v3794_v14 = vmul.f32 %v3769_v63, %v3717_v15 }
 0x16d   :  { %v591_v19 = vmul.f32 0.5, %v575_v1  ;;  %v3796_v58 = vadd.f32 1.0, %v230_v57  ;;  %v918_v53 = vadd.f32 -0.28449672, %v902_v42  ;;  %v385_v48 = vmul.f32 %v369_v43, %v3590_v28  ;;  %v1865_v42 = vld [vmem:[#allocation5 + $0xb8] sm:$0xff] }
 0x16e   :  { %v3799_v0 = vadd.f32 1.0, %v747_v35  ;;  %v1045_v11 = vmul.f32 %v3549_v24, %v965_v25  ;;  %v448_v1 = vmul.f32 %v432_v12, %v3524_v38  ;;  %v871_v32 = vmul.f32 %v855_v27, %v3675_v39  ;;  %v1864_v43 = vld [vmem:[#allocation5 + $0x98] sm:$0xff]  ;;  %1890 = vmatpush.msrb.mxu2 %v1865_v42 }
 0x16f   :  { %1237 = vmatmul.f32.gmra.mxu3 %v591_v19  ;;  %v2648_v26 = vpop.eup %2647  ;;  %v987_v17 = vsub.f32 0.0, %v3775_v20  ;;  %v934_v15 = vmul.f32 %v918_v53, %v3595_v59  ;;  %v401_v46 = vadd.f32 -0.28449672, %v385_v48  ;;  %v322_v57 = vmul.f32 1.0614054, %v3647_v29 }
 0x170   :  { %v3807_v8 = vpop.eup %2649  ;;  %v1061_v55 = vsub.f32 1.0, %v1045_v11  ;;  %v528_v35 = vmul.f32 %v3538_v47, %v448_v1  ;;  %v1427_v19 = vmul.f32 %v2648_v26, %v1395_v30  ;;  %v887_v24 = vadd.f32 1.4214138, %v871_v32  ;;  %1891 = vmatpush.msrb.mxu2 %v1864_v43 }
 0x171   :  { %v810_v38 = vsub.f32 2.0, %v3794_v14  ;;  %v950_v25 = vadd.f32 0.2548296, %v934_v15  ;;  %v417_v12 = vmul.f32 %v401_v46, %v3590_v28  ;;  %v3813_v27 = vadd.f32 %v3720_v13, %v1302_v16 }
 0x172   :  { %v4795_v53 = vand.u32 2147483647, %v3362_v45  ;;  %v544_v10 = vsub.f32 1.0, %v528_v35  ;;  %v1443_v11 = vsub.f32 2.0, %v1427_v19  ;;  %v903_v47 = vmul.f32 %v887_v24, %v3675_v39 }
 0x173   :  { %v1619_v30 = vsub.f32 0.0, %v3761_v23  ;;  %v966_v1 = vmul.f32 %v950_v25, %v3595_v59  ;;  %v433_v32 = vadd.f32 0.2548296, %v417_v12  ;;  %v338_v9 = vadd.f32 -1.4531521, %v322_v57 }
 0x174   :  { %v1077_v48 = vmul.f32 %v1061_v55, %v4795_v53  ;;  %v4796_v46 = vand.u32 2147483647, %v3356_v62  ;;  %v3823_v42 = vmul.f32 %v2648_v26, %v1443_v11  ;;  %v919_v3 = vadd.f32 -0.28449672, %v903_v47  ;;  %v3825_v55 = vpop.f32.mrf.mxu0 }
 0x175   :  { %v1046_v35 = vmul.f32 %v3587_v61, %v966_v1  ;;  %v449_v19 = vmul.f32 %v433_v32, %v3590_v28  ;;  %v1348_v24 = vand.u32 2147483647, %v3813_v27  ;;  %v840_v59 = vmul.f32 1.0614054, %v3715_v34 }
 0x176   :  { %v1093_v15 = vadd.f32 %v1077_v48, %v3362_v45  ;;  %v560_v16 = vmul.f32 %v544_v10, %v4796_v46  ;;  %v1475_v45 = vmul.f32 1.0614054, %v3823_v42  ;;  %v935_v10 = vmul.f32 %v919_v3, %v3675_v39 }
 0x177   :  { %2651 = vrcp.f32 %v3796_v58  ;;  %v1062_v26 = vsub.f32 1.0, %v1046_v35  ;;  %v529_v25 = vmul.f32 %v3579_v5, %v449_v19  ;;  %v354_v61 = vmul.f32 %v338_v9, %v3647_v29  ;;  %v1863_v35 = vld [vmem:[#allocation5 + $0x78] sm:$0xff] }
 0x178   :  { %v1109_v57 = vmul.f32 0.5, %v1093_v15  ;;  %v576_v43 = vadd.f32 %v560_v16, %v3356_v62  ;;  %v1491_v12 = vadd.f32 -1.4531521, %v1475_v45  ;;  %v1635_v53 = vmul.f32 %v1619_v30, %v3761_v23  ;;  %v1778_v19 = vld [vmem:[#allocation8 + $0x178] sm:$0xff]  ;;  %1892 = vmatpush.msrb.mxu2 %v1863_v35 }
 0x179   :  { %v951_v48 = vadd.f32 0.2548296, %v935_v10  ;;  %v4797_v11 = vand.u32 2147483647, %v3422_v21  ;;  %v545_v47 = vsub.f32 1.0, %v529_v25  ;;  %2653 = vrcp.f32 %v3799_v0  ;;  %1779 = vmatpush.msrb.mxu1 %v1778_v19 }
 0x17a   :  { %1175 = vmatmul.f32.gmra.mxu2 %v1109_v57  ;;  %v592_v28 = vmul.f32 0.5, %v576_v43  ;;  %v370_v1 = vadd.f32 1.4214138, %v354_v61  ;;  %v856_v32 = vadd.f32 -1.4531521, %v840_v59  ;;  %v1507_v3 = vmul.f32 %v1491_v12, %v3823_v42  ;;  %v1777_v59 = vld [vmem:[#allocation8 + $0x170] sm:$0xff] }
 0x17b   :  { %v1078_v62 = vmul.f32 %v1062_v26, %v4797_v11  ;;  %v3844_v5 = vmul.f32 0.70710677, %v1348_v24  ;;  %v967_v9 = vmul.f32 %v951_v48, %v3675_v39  ;;  %v4798_v30 = vand.u32 2147483647, %v3416_v7  ;;  %1780 = vmatpush.msrb.mxu1 %v1777_v59 }
 0x17c   :  { %1240 = vmatmul.f32.gmra.mxu3 %v592_v28  ;;  %v386_v46 = vmul.f32 %v370_v1, %v3647_v29  ;;  %v872_v16 = vmul.f32 %v856_v32, %v3715_v34  ;;  %v1523_v57 = vadd.f32 1.4214138, %v1507_v3  ;;  %v1651_v43 = vmul.f32 1.442695, %v1635_v53  ;;  %v1776_v28 = vld [vmem:[#allocation8 + $0x168] sm:$0xff]  ;;  %v1308_v11 = vpop.f32.mrf.mxu0  ;;  %v1775_v32 = vld [vmem:[#allocation8 + $0x160] sm:$0xff] }
 0x17d   :  { %v1094_v23 = vadd.f32 %v1078_v62, %v3422_v21  ;;  %v561_v15 = vmul.f32 %v545_v47, %v4798_v30  ;;  %v1047_v45 = vmul.f32 %v3665_v41, %v967_v9  ;;  %v323_v10 = vmul.f32 1.0614054, %v3709_v22  ;;  %v3854_v39 = vpop.eup %2651  ;;  %1781 = vmatpush.msrb.mxu1 %v1776_v28 }
 0x17e   :  { %v402_v25 = vadd.f32 -0.28449672, %v386_v46  ;;  %v888_v61 = vadd.f32 1.4214138, %v872_v16  ;;  %v486_v12 = vmul.f32 %v470_v54, %v3765_v44  ;;  %v1003_v41 = vmul.f32 %v987_v17, %v3775_v20 }
 0x17f   :  { %v1110_v21 = vmul.f32 0.5, %v1094_v23  ;;  %v577_v26 = vadd.f32 %v561_v15, %v3416_v7  ;;  %v1539_v53 = vmul.f32 %v1523_v57, %v3823_v42  ;;  %v1063_v48 = vsub.f32 1.0, %v1047_v45  ;;  %v3867_v3 = vpop.eup %2653  ;;  %1782 = vmatpush.msrb.mxu1 %v1775_v32 }
 0x180   :  { %v1380_v47 = vmul.f32 0.3275911, %v3844_v5  ;;  %v418_v7 = vmul.f32 %v402_v25, %v3647_v29  ;;  %v904_v1 = vmul.f32 %v888_v61, %v3715_v34  ;;  %v3872_v44 = vmul.f32 %v3769_v63, %v810_v38 }
 0x181   :  { %v593_v62 = vmul.f32 0.5, %v577_v26  ;;  %v1555_v20 = vadd.f32 -0.28449672, %v1539_v53  ;;  %2655 = vpow2.f32 %v1651_v43  ;;  %v4799_v54 = vand.u32 2147483647, %v3508_v2 }
 0x182   :  { %1178 = vmatmul.f32.gmra.mxu2 %v1110_v21  ;;  %v434_v9 = vadd.f32 0.2548296, %v418_v7  ;;  %v3878_v23 = vadd.f32 %v3720_v13, %v3825_v55  ;;  %v920_v30 = vadd.f32 -0.28449672, %v904_v1  ;;  %v339_v15 = vadd.f32 -1.4531521, %v323_v10 }
 0x183   :  { %v1079_v17 = vmul.f32 %v1063_v48, %v4799_v54  ;;  %v517_v46 = vmul.f32 1.442695, %v486_v12  ;;  %v1571_v14 = vmul.f32 %v1555_v20, %v3823_v42  ;;  %v3883_v38 = vadd.f32 %v3720_v13, %v1308_v11  ;;  %v1773_v20 = vld [vmem:[#allocation8 + $0x150] sm:$0xff] }
 0x184   :  { %1243 = vmatmul.f32.gmra.mxu3 %v593_v62  ;;  %v3885_v16 = vadd.f32 1.0, %v1380_v47  ;;  %v450_v35 = vmul.f32 %v434_v9, %v3647_v29  ;;  %v936_v19 = vmul.f32 %v920_v30, %v3715_v34  ;;  %v355_v55 = vmul.f32 %v339_v15, %v3709_v22  ;;  %v1311_v62 = vpop.f32.mrf.mxu0 }
 0x185   :  { %v1095_v63 = vadd.f32 %v1079_v17, %v3508_v2  ;;  %v278_v59 = vmul.f32 %v3854_v39, %v3796_v58  ;;  %v795_v57 = vmul.f32 %v3867_v3, %v3799_v0  ;;  %v1587_v43 = vadd.f32 0.2548296, %v1571_v14 }
 0x186   :  { %v530_v45 = vmul.f32 %v3630_v52, %v450_v35  ;;  %v1349_v10 = vand.u32 2147483647, %v3878_v23  ;;  %v952_v21 = vadd.f32 0.2548296, %v936_v19  ;;  %v371_v26 = vadd.f32 1.4214138, %v355_v55 }
 0x187   :  { %v1111_v2 = vmul.f32 0.5, %v1095_v63  ;;  %v2656_v25 = vpop.eup %2655  ;;  %v3896_v29 = vmul.f32 1.442695, %v1003_v41  ;;  %v1603_v61 = vmul.f32 %v1587_v43, %v3823_v42  ;;  %v1350_v28 = vand.u32 2147483647, %v3883_v38  ;;  %v1862_v41 = vld [vmem:[#allocation5 + $0x58] sm:$0xff] }
 0x188   :  { %v841_v58 = vmul.f32 1.0614054, %v3729_v49  ;;  %2657 = vrcp.f32 %v3885_v16  ;;  %v546_v0 = vsub.f32 1.0, %v530_v45  ;;  %v968_v12 = vmul.f32 %v952_v21, %v3715_v34  ;;  %1893 = vmatpush.msrb.mxu2 %v1862_v41  ;;  %v1774_v34 = vld [vmem:[#allocation8 + $0x158] sm:$0xff] }
 0x189   :  { %v387_v52 = vmul.f32 %v371_v26, %v3709_v22  ;;  %v294_v53 = vsub.f32 2.0, %v278_v59  ;;  %2659 = vpow2.f32 %v517_v46  ;;  %v811_v48 = vsub.f32 2.0, %v795_v57  ;;  %1783 = vmatpush.msrb.mxu1 %v1774_v34  ;;  %v1771_v26 = vld [vmem:[#allocation8 + $0x140] sm:$0xff]  ;;  %v1770_v34 = vld [vmem:[#allocation8 + $0x138] sm:$0xff] }
 0x18a   :  { %1181 = vmatmul.f32.gmra.mxu2 %v1111_v2  ;;  %v857_v11 = vadd.f32 -1.4531521, %v841_v58  ;;  %v4800_v42 = vand.u32 2147483647, %v3483_v4  ;;  %v3908_v7 = vmul.f32 0.70710677, %v1349_v10  ;;  %v1048_v1 = vmul.f32 %v3702_v37, %v968_v12 }
 0x18b   :  { %v403_v32 = vadd.f32 -0.28449672, %v387_v52  ;;  %v1683_v54 = vmul.f32 %v2656_v25, %v1603_v61  ;;  %v3913_v17 = vmul.f32 0.70710677, %v1350_v28  ;;  %v324_v30 = vmul.f32 1.0614054, %v3723_v40  ;;  %1784 = vmatpush.msrb.mxu1 %v1773_v20 }
 0x18c   :  { %v562_v47 = vmul.f32 %v546_v0, %v4800_v42  ;;  %v873_v9 = vmul.f32 %v857_v11, %v3729_v49  ;;  %v1064_v46 = vsub.f32 1.0, %v1048_v1  ;;  %v1772_v37 = vld [vmem:[#allocation8 + $0x148] sm:$0xff]  ;;  %v842_v63 = vmul.f32 1.0614054, %v3872_v44  ;;  %v1314_v1 = vpop.f32.mrf.mxu0  ;;  %v1769_v20 = vld [vmem:[#allocation8 + $0x130] sm:$0xff] }
 0x18d   :  { %v419_v14 = vmul.f32 %v403_v32, %v3709_v22  ;;  %v3921_v35 = vmul.f32 %v3854_v39, %v294_v53  ;;  %v3924_v19 = vmul.f32 %v3867_v3, %v811_v48  ;;  %v1620_v55 = vsub.f32 0.0, %v3844_v5  ;;  %1785 = vmatpush.msrb.mxu1 %v1772_v37 }
 0x18e   :  { %v578_v15 = vadd.f32 %v562_v47, %v3483_v4  ;;  %v889_v59 = vadd.f32 1.4214138, %v873_v9  ;;  %v3927_v57 = vpop.eup %2657  ;;  %v1381_v4 = vmul.f32 0.3275911, %v3908_v7  ;;  %v4801_v2 = vand.u32 2147483647, %v3565_v51 }
 0x18f   :  { %v435_v21 = vadd.f32 0.2548296, %v419_v14  ;;  %v3932_v25 = vpop.eup %2659  ;;  %v1699_v39 = vsub.f32 1.0, %v1683_v54  ;;  %v1382_v3 = vmul.f32 0.3275911, %v3913_v17  ;;  %v3939_v52 = vadd.f32 %v3720_v13, %v1311_v62  ;;  %1786 = vmatpush.msrb.mxu1 %v1771_v26  ;;  %v1861_v47 = vld [vmem:[#allocation5 + $0x38] sm:$0xff] }
 0x190   :  { %v594_v43 = vmul.f32 0.5, %v578_v15  ;;  %v1080_v45 = vmul.f32 %v1064_v46, %v4801_v2  ;;  %v905_v61 = vmul.f32 %v889_v59, %v3729_v49  ;;  %v340_v58 = vadd.f32 -1.4531521, %v324_v30  ;;  %1894 = vmatpush.msrb.mxu2 %v1861_v47 }
 0x191   :  { %v451_v12 = vmul.f32 %v435_v21, %v3709_v22  ;;  %v858_v53 = vadd.f32 -1.4531521, %v842_v63  ;;  %v3943_v48 = vmul.f32 %v3927_v57, %v3885_v16  ;;  %v325_v42 = vmul.f32 1.0614054, %v3787_v18  ;;  %1787 = vmatpush.msrb.mxu1 %v1770_v34  ;;  %v1768_v63 = vld [vmem:[#allocation8 + $0x128] sm:$0xff] }
 0x192   :  { %1246 = vmatmul.f32.gmra.mxu3 %v594_v43  ;;  %v1096_v0 = vadd.f32 %v1080_v45, %v3565_v51  ;;  %v921_v11 = vadd.f32 -0.28449672, %v905_v61  ;;  %v356_v41 = vmul.f32 %v340_v58, %v3723_v40  ;;  %v1351_v22 = vand.u32 2147483647, %v3939_v52 }
 0x193   :  { %v531_v51 = vmul.f32 %v3694_v33, %v451_v12  ;;  %v874_v62 = vmul.f32 %v858_v53, %v3872_v44  ;;  %v341_v9 = vadd.f32 -1.4531521, %v325_v42  ;;  %v3952_v30 = vadd.f32 %v3720_v13, %v1314_v1  ;;  %1788 = vmatpush.msrb.mxu1 %v1769_v20  ;;  %v1767_v12 = vld [vmem:[#allocation8 + $0x120] sm:$0xff] }
 0x194   :  { %v1112_v32 = vmul.f32 0.5, %v1096_v0  ;;  %v937_v16 = vmul.f32 %v921_v11, %v3729_v49  ;;  %v372_v54 = vadd.f32 1.4214138, %v356_v41  ;;  %v4802_v15 = vand.u32 2147483647, %v3742_v50  ;;  %v1317_v34 = vpop.f32.mrf.mxu0 }
 0x195   :  { %v547_v33 = vsub.f32 1.0, %v531_v51  ;;  %v3958_v14 = vmul.f32 0.70710677, %v1351_v22  ;;  %v890_v37 = vadd.f32 1.4214138, %v874_v62  ;;  %v1636_v59 = vmul.f32 %v1620_v55, %v3844_v5  ;;  %1789 = vmatpush.msrb.mxu1 %v1768_v63  ;;  %v4805_v63 = vld [vmem:[#allocation22_spill] sm:$0xff] }
 0x196   :  { %v1715_v46 = vmul.f32 %v1699_v39, %v4802_v15  ;;  %1184 = vmatmul.f32.gmra.mxu2 %v1112_v32  ;;  %v953_v43 = vadd.f32 0.2548296, %v937_v16  ;;  %v388_v2 = vmul.f32 %v372_v54, %v3723_v40  ;;  %v357_v45 = vmul.f32 %v341_v9, %v3787_v18  ;;  %v4803_v39 = vld [vmem:[#allocation20_spill] sm:$0xff]  ;;  %v1766_v9 = vld [vmem:[#allocation8 + $0x118] sm:$0xff] }
 0x197   :  { %v1444_v21 = vsub.f32 2.0, %v3943_v48  ;;  %v3964_v26 = vadd.f32 1.0, %v1381_v4  ;;  %v4804_v61 = vand.u32 2147483647, %v4803_v39  ;;  %v1352_v0 = vand.u32 2147483647, %v3952_v30  ;;  %1790 = vmatpush.msrb.mxu1 %v1767_v12 }
 0x198   :  { %v969_v53 = vmul.f32 %v953_v43, %v3729_v49  ;;  %v404_v11 = vadd.f32 -0.28449672, %v388_v2  ;;  %v906_v5 = vmul.f32 %v890_v37, %v3872_v44  ;;  %v373_v55 = vadd.f32 1.4214138, %v357_v45  ;;  %v1765_v37 = vld [vmem:[#allocation8 + $0x110] sm:$0xff] }
 0x199   :  { %v563_v58 = vmul.f32 %v547_v33, %v4804_v61  ;;  %v1731_v41 = vadd.f32 %v1715_v46, %v3742_v50  ;;  %v3973_v48 = vadd.f32 1.0, %v1382_v3  ;;  %v1383_v4 = vmul.f32 0.3275911, %v3958_v14  ;;  %v1860_v3 = vld [vmem:[#allocation5 + $0x18] sm:$0xff]  ;;  %1791 = vmatpush.msrb.mxu1 %v1766_v9 }
 0x19a   :  { %v1049_v47 = vmul.f32 %v3747_v31, %v969_v53  ;;  %v420_v1 = vmul.f32 %v404_v11, %v3723_v40  ;;  %v922_v32 = vadd.f32 -0.28449672, %v906_v5  ;;  %v389_v49 = vmul.f32 %v373_v55, %v3787_v18  ;;  %1895 = vmatpush.msrb.mxu2 %v1860_v3  ;;  %v4008_v3 = vpop.f32.mrf.mxu2 }
 0x19b   :  { %v579_v42 = vadd.f32 %v563_v58, %v4803_v39  ;;  %2661 = vrcp.f32 %v3964_v26  ;;  %v1621_v51 = vsub.f32 0.0, %v3908_v7  ;;  %v3983_v50 = vmul.f32 0.70710677, %v1352_v0  ;;  %v1764_v58 = vld [vmem:[#allocation8 + $0x108] sm:$0xff]  ;;  %1792 = vmatpush.msrb.mxu1 %v1765_v37 }
 0x19c   :  { %v1065_v20 = vsub.f32 1.0, %v1049_v47  ;;  %v436_v16 = vadd.f32 0.2548296, %v420_v1  ;;  %v938_v31 = vmul.f32 %v922_v32, %v3872_v44  ;;  %v405_v54 = vadd.f32 -0.28449672, %v389_v49  ;;  %v1320_v9 = vpop.f32.mrf.mxu0 }
 0x19d   :  { %v595_v62 = vmul.f32 0.5, %v579_v42  ;;  %v1747_v15 = vmul.f32 0.5, %v1731_v41  ;;  %2663 = vrcp.f32 %v3973_v48  ;;  %v3987_v46 = vadd.f32 1.0, %v1383_v4  ;;  %1793 = vmatpush.msrb.mxu1 %v1764_v58 }
 0x19e   :  { %v843_v33 = vmul.f32 1.0614054, %v3924_v19  ;;  %v4806_v43 = vand.u32 2147483647, %v4805_v63  ;;  %v452_v45 = vmul.f32 %v436_v16, %v3723_v40  ;;  %v954_v39 = vadd.f32 0.2548296, %v938_v31 }
 0x19f   :  { %1249 = vmatmul.f32.gmra.mxu3 %v595_v62  ;;  %v421_v61 = vmul.f32 %v405_v54, %v3787_v18  ;;  %2665 = vpow2.f32 %v3896_v29  ;;  %v1384_v12 = vmul.f32 0.3275911, %v3983_v50  ;;  %v326_v11 = vmul.f32 1.0614054, %v3921_v35  ;;  %v1763_v40 = vld [vmem:[#allocation8 + $0x100] sm:$0xff] }
 0x1a0   :  { %v1081_v2 = vmul.f32 %v1065_v20, %v4806_v43  ;;  %v859_v53 = vadd.f32 -1.4531521, %v843_v33  ;;  %v532_v55 = vmul.f32 %v3733_v60, %v452_v45  ;;  %v970_v41 = vmul.f32 %v954_v39, %v3872_v44  ;;  %v4010_v44 = vpop.f32.mrf.mxu3  ;;  %1794 = vmatpush.msrb.mxu1 %v1763_v40 }
 0x1a1   :  { %v437_v42 = vadd.f32 0.2548296, %v421_v61  ;;  %v4000_v4 = vpop.eup %2661  ;;  %v1653_v47 = vmul.f32 1.442695, %v1636_v59  ;;  %2667 = vrcp.f32 %v3987_v46  ;;  %v342_v1 = vadd.f32 -1.4531521, %v326_v11  ;;  %1795 = vmatmul.f32.vlgmr.msrb.gmra.mxu1 %v1747_v15 }
 0x1a2   :  { %v1097_v5 = vadd.f32 %v1081_v2, %v4805_v63  ;;  %v875_v29 = vmul.f32 %v859_v53, %v3924_v19  ;;  %v4005_v32 = vmul.f32 %v3927_v57, %v1444_v21  ;;  %v548_v62 = vsub.f32 1.0, %v532_v55  ;;  %v4807_v21 = vld [vmem:[#allocation21_spill] sm:$0xff] }
 0x1a3   :  { %v1050_v60 = vmul.f32 %v3807_v8, %v970_v41  ;;  %v2664_v20 = vpop.eup %2663  ;;  %v453_v59 = vmul.f32 %v437_v42, %v3787_v18  ;;  %v4013_v16 = vadd.f32 1.0, %v1384_v12  ;;  %v358_v54 = vmul.f32 %v342_v1, %v3921_v35  ;;  %v4809_v61 = vld [vmem:[#allocation17_spill] sm:$0xff]  ;;  %v4811_v42 = vld [vmem:[#allocation15_spill] sm:$0xff] }
 0x1a4   :  { %v1113_v49 = vmul.f32 0.5, %v1097_v5  ;;  %v891_v31 = vadd.f32 1.4214138, %v875_v29  ;;  %v1637_v57 = vmul.f32 %v1621_v51, %v3908_v7  ;;  %v4808_v33 = vand.u32 2147483647, %v4807_v21 }
 0x1a5   :  { %v1066_v37 = vsub.f32 1.0, %v1050_v60  ;;  %v4020_v63 = vadd.f32 %v3720_v13, %v1317_v34  ;;  %v2666_v43 = vpop.eup %2665  ;;  %v1429_v18 = vmul.f32 %v4000_v4, %v3964_v26  ;;  %v533_v2 = vmul.f32 %v3752_v36, %v453_v59 }
 0x1a6   :  { %1187 = vmatmul.f32.gmra.mxu2 %v1113_v49  ;;  %v564_v8 = vmul.f32 %v548_v62, %v4808_v33  ;;  %v907_v45 = vmul.f32 %v891_v31, %v3924_v19  ;;  %v374_v39 = vadd.f32 1.4214138, %v358_v54  ;;  %v1430_v7 = vmul.f32 %v2664_v20, %v3973_v48 }
 0x1a7   :  { %v4810_v58 = vand.u32 2147483647, %v4809_v61  ;;  %v1353_v34 = vand.u32 2147483647, %v4020_v63  ;;  %v2668_v53 = vpop.eup %2667  ;;  %v549_v15 = vsub.f32 1.0, %v533_v2  ;;  %2669 = vrcp.f32 %v4013_v16  ;;  %v4050_v2 = vpop.f32.mrf.mxu2 }
 0x1a8   :  { %v580_v51 = vadd.f32 %v564_v8, %v4807_v21  ;;  %v923_v11 = vadd.f32 -0.28449672, %v907_v45  ;;  %v390_v26 = vmul.f32 %v374_v39, %v3921_v35  ;;  %v1622_v36 = vsub.f32 0.0, %v3913_v17 }
 0x1a9   :  { %v1082_v12 = vmul.f32 %v1066_v37, %v4810_v58  ;;  %v4037_v48 = vmul.f32 0.70710677, %v1353_v34  ;;  %v1445_v41 = vsub.f32 2.0, %v1429_v18  ;;  %v4812_v40 = vand.u32 2147483647, %v4811_v42 }
 0x1aa   :  { %v596_v5 = vmul.f32 0.5, %v580_v51  ;;  %v939_v1 = vmul.f32 %v923_v11, %v3924_v19  ;;  %v406_v49 = vadd.f32 -0.28449672, %v390_v26  ;;  %v1431_v62 = vmul.f32 %v2668_v53, %v3987_v46  ;;  %v4052_v46 = vpop.f32.mrf.mxu3 }
 0x1ab   :  { %v1098_v55 = vadd.f32 %v1082_v12, %v4809_v61  ;;  %v565_v29 = vmul.f32 %v549_v15, %v4812_v40  ;;  %v1385_v59 = vmul.f32 0.3275911, %v4037_v48  ;;  %v4045_v31 = vadd.f32 %v3720_v13, %v1320_v9  ;;  %v1323_v61 = vpop.f32.mrf.mxu0 }
 0x1ac   :  { %1252 = vmatmul.f32.gmra.mxu3 %v596_v5  ;;  %v1446_v54 = vsub.f32 2.0, %v1430_v7  ;;  %v955_v33 = vadd.f32 0.2548296, %v939_v1  ;;  %v422_v8 = vmul.f32 %v406_v49, %v3921_v35  ;;  %2671 = vpow2.f32 %v1653_v47 }
 0x1ad   :  { %v1114_v60 = vmul.f32 0.5, %v1098_v55  ;;  %v581_v21 = vadd.f32 %v565_v29, %v4811_v42  ;;  %v1655_v37 = vmul.f32 1.442695, %v1637_v57  ;;  %v1476_v18 = vmul.f32 1.0614054, %v4005_v32  ;;  %v2670_v45 = vpop.eup %2669 }
 0x1ae   :  { %v4055_v39 = vmul.f32 %v4000_v4, %v1445_v41  ;;  %v971_v9 = vmul.f32 %v955_v33, %v3924_v19  ;;  %v438_v7 = vadd.f32 0.2548296, %v422_v8  ;;  %v1401_v51 = vadd.f32 1.0, %v1385_v59 }
 0x1af   :  { %1190 = vmatmul.f32.gmra.mxu2 %v1114_v60  ;;  %v1447_v58 = vsub.f32 2.0, %v1431_v62  ;;  %v597_v12 = vmul.f32 0.5, %v581_v21  ;;  %v1354_v47 = vand.u32 2147483647, %v4045_v31  ;;  %v1492_v57 = vadd.f32 -1.4531521, %v1476_v18 }
 0x1b0   :  { %v4059_v15 = vmul.f32 %v2664_v20, %v1446_v54  ;;  %v1638_v11 = vmul.f32 %v1622_v36, %v3913_v17  ;;  %v1051_v26 = vmul.f32 %v2666_v43, %v971_v9  ;;  %v454_v5 = vmul.f32 %v438_v7, %v3921_v35 }
 0x1b1   :  { %v1623_v4 = vsub.f32 0.0, %v3958_v14  ;;  %v1432_v55 = vmul.f32 %v2670_v45, %v4013_v16  ;;  %v1508_v19 = vmul.f32 %v1492_v57, %v4005_v32  ;;  %v4067_v41 = vadd.f32 %v3720_v13, %v1323_v61 }
 0x1b2   :  { %v1067_v42 = vsub.f32 1.0, %v1051_v26  ;;  %v534_v40 = vmul.f32 %v3932_v25, %v454_v5  ;;  %2673 = vrcp.f32 %v1401_v51  ;;  %v1477_v20 = vmul.f32 1.0614054, %v4055_v39  ;;  %v2672_v29 = vpop.eup %2671  ;;  %v4095_v57 = vpop.f32.mrf.mxu3 }
 0x1b3   :  { %v4071_v17 = vmul.f32 %v2668_v53, %v1447_v58  ;;  %v4075_v35 = vmul.f32 0.70710677, %v1354_v47  ;;  %v1524_v16 = vadd.f32 1.4214138, %v1508_v19  ;;  %v1355_v43 = vand.u32 2147483647, %v4067_v41  ;;  %v1326_v5 = vpop.f32.mrf.mxu0 }
 0x1b4   :  { %1255 = vmatmul.f32.gmra.mxu3 %v597_v12  ;;  %v4813_v36 = vand.u32 2147483647, %v3736_v6  ;;  %v550_v49 = vsub.f32 1.0, %v534_v40  ;;  %v1493_v62 = vadd.f32 -1.4531521, %v1477_v20  ;;  %v1448_v59 = vsub.f32 2.0, %v1432_v55  ;;  %v4093_v12 = vpop.f32.mrf.mxu2 }
 0x1b5   :  { %v1478_v25 = vmul.f32 1.0614054, %v4059_v15  ;;  %v1657_v60 = vmul.f32 1.442695, %v1638_v11  ;;  %v1540_v53 = vmul.f32 %v1524_v16, %v4005_v32  ;;  %v4084_v54 = vmul.f32 0.70710677, %v1355_v43 }
 0x1b6   :  { %v1083_v1 = vmul.f32 %v1067_v42, %v4813_v36  ;;  %v1639_v21 = vmul.f32 %v1623_v4, %v3958_v14  ;;  %v4814_v8 = vand.u32 2147483647, %v3726_v56  ;;  %v1509_v9 = vmul.f32 %v1493_v62, %v4055_v39 }
 0x1b7   :  { %v1386_v7 = vmul.f32 0.3275911, %v4075_v35  ;;  %v1556_v61 = vadd.f32 -0.28449672, %v1540_v53  ;;  %v1387_v58 = vmul.f32 0.3275911, %v4084_v54  ;;  %v4099_v55 = vmul.f32 %v2670_v45, %v1448_v59 }
 0x1b8   :  { %v1099_v33 = vadd.f32 %v1083_v1, %v3736_v6  ;;  %v566_v18 = vmul.f32 %v550_v49, %v4814_v8  ;;  %v2674_v11 = vpop.eup %2673  ;;  %v1494_v6 = vadd.f32 -1.4531521, %v1478_v25  ;;  %v1479_v4 = vmul.f32 1.0614054, %v4071_v17 }
 0x1b9   :  { %v1572_v19 = vmul.f32 %v1556_v61, %v4005_v32  ;;  %v1403_v42 = vadd.f32 1.0, %v1387_v58  ;;  %v1525_v40 = vadd.f32 1.4214138, %v1509_v9  ;;  %2675 = vpow2.f32 %v1655_v37 }
 0x1ba   :  { %v1115_v26 = vmul.f32 0.5, %v1099_v33  ;;  %v582_v14 = vadd.f32 %v566_v18, %v3726_v56  ;;  %v1659_v20 = vmul.f32 1.442695, %v1639_v21  ;;  %v1624_v16 = vsub.f32 0.0, %v3983_v50 }
 0x1bb   :  { %v1433_v1 = vmul.f32 %v2674_v11, %v1401_v51  ;;  %v1588_v49 = vadd.f32 0.2548296, %v1572_v19  ;;  %2677 = vrcp.f32 %v1403_v42  ;;  %v1541_v56 = vmul.f32 %v1525_v40, %v4055_v39  ;;  %v4124_v19 = vpop.f32.mrf.mxu3 }
 0x1bc   :  { %1193 = vmatmul.f32.gmra.mxu2 %v1115_v26  ;;  %v598_v36 = vmul.f32 0.5, %v582_v14  ;;  %v4104_v62 = vadd.f32 1.0, %v1386_v7  ;;  %v4107_v45 = vadd.f32 %v3720_v13, %v1326_v5  ;;  %v1510_v25 = vmul.f32 %v1494_v6, %v4059_v15  ;;  %v4116_v58 = vpop.f32.mrf.mxu2  ;;  %v1329_v14 = vpop.f32.mrf.mxu0 }
 0x1bd   :  { %v1495_v59 = vadd.f32 -1.4531521, %v1479_v4  ;;  %2679 = vpow2.f32 %v1657_v60  ;;  %v1604_v37 = vmul.f32 %v1588_v49, %v4005_v32  ;;  %v1557_v53 = vadd.f32 -0.28449672, %v1541_v56 }
 0x1be   :  { %1258 = vmatmul.f32.gmra.mxu3 %v598_v36  ;;  %v1480_v21 = vmul.f32 1.0614054, %v4099_v55  ;;  %2681 = vpow2.f32 %v1659_v20  ;;  %v1356_v51 = vand.u32 2147483647, %v4107_v45  ;;  %v1526_v33 = vadd.f32 1.4214138, %v1510_v25 }
 0x1bf   :  { %v1511_v8 = vmul.f32 %v1495_v59, %v4071_v17  ;;  %v1640_v18 = vmul.f32 %v1624_v16, %v3983_v50  ;;  %v1449_v9 = vsub.f32 2.0, %v1433_v1  ;;  %v1684_v7 = vmul.f32 %v2672_v29, %v1604_v37  ;;  %v2676_v60 = vpop.eup %2675  ;;  %v2790_v20 = vld [vmem:[#allocation2] sm:$0xff] }
 0x1c0   :  { %v1573_v61 = vmul.f32 %v1557_v53, %v4055_v39  ;;  %2683 = vrcp.f32 %v4104_v62  ;;  %v4121_v32 = vmul.f32 0.70710677, %v1356_v51  ;;  %v1542_v26 = vmul.f32 %v1526_v33, %v4059_v15 }
 0x1c1   :  { %v1527_v5 = vadd.f32 1.4214138, %v1511_v8  ;;  %v2678_v6 = vpop.eup %2677  ;;  %v1700_v4 = vsub.f32 1.0, %v1684_v7  ;;  %v4127_v29 = vadd.f32 %v3720_v13, %v1329_v14  ;;  %v1496_v40 = vadd.f32 -1.4531521, %v1480_v21 }
 0x1c2   :  { %v1589_v50 = vadd.f32 0.2548296, %v1573_v61  ;;  %v1435_v16 = vmul.f32 %v2678_v6, %v1403_v42  ;;  %v1388_v36 = vmul.f32 0.3275911, %v4121_v32  ;;  %v1558_v1 = vadd.f32 -0.28449672, %v1542_v26 }
 0x1c3   :  { %v1543_v49 = vmul.f32 %v1527_v5, %v4071_v17  ;;  %v2680_v56 = vpop.eup %2679  ;;  %v4131_v25 = vmul.f32 %v2674_v11, %v1449_v9  ;;  %v1716_v59 = vmul.f32 %v1700_v4, %v1348_v24  ;;  %v4759_v13 = vand.u32 2147483647, %v4127_v29 }
 0x1c4   :  { %1896 = vmatmul.f32.vlgmr.msrb.gmra.mxu2 %v2790_v20  ;;  %v1605_v37 = vmul.f32 %v1589_v50, %v4055_v39  ;;  %v2682_v53 = vpop.eup %2681  ;;  %v1451_v21 = vsub.f32 2.0, %v1435_v16  ;;  %v1404_v33 = vadd.f32 1.0, %v1388_v36  ;;  %v1574_v42 = vmul.f32 %v1558_v1, %v4059_v15  ;;  %v1332_v16 = vpop.f32.mrf.mxu0 }
 0x1c5   :  { %v1559_v8 = vadd.f32 -0.28449672, %v1543_v49  ;;  %v1732_v7 = vadd.f32 %v1716_v59, %v3813_v27  ;;  %v4141_v11 = vmul.f32 0.70710677, %v4759_v13  ;;  %v1512_v9 = vmul.f32 %v1496_v40, %v4099_v55  ;;  %v4154_v1 = vpop.f32.mrf.mxu2  ;;  %v4156_v49 = vld [vmem:[#allocation7 + $0x2] ss:$0 sm:$0xff] }
 0x1c6   :  { %v1685_v61 = vmul.f32 %v2676_v60, %v1605_v37  ;;  %v4144_v24 = vpop.eup %2683  ;;  %v4146_v39 = vmul.f32 %v2678_v6, %v1451_v21  ;;  %2685 = vrcp.f32 %v1404_v33  ;;  %v1590_v26 = vadd.f32 0.2548296, %v1574_v42  ;;  %v2792_v37 = vld [vmem:[#allocation2 + $0x8] sm:$0xff] }
 0x1c7   :  { %v1575_v14 = vmul.f32 %v1559_v8, %v4071_v17  ;;  %v1748_v5 = vmul.f32 0.5, %v1732_v7  ;;  %v1389_v50 = vmul.f32 0.3275911, %v4141_v11  ;;  %v1661_v36 = vmul.f32 1.442695, %v1640_v18  ;;  %v4165_v7 = vpop.f32.mrf.mxu3 }
 0x1c8   :  { %v1701_v4 = vsub.f32 1.0, %v1685_v61  ;;  %v1483_v27 = vmul.f32 1.0614054, %v4146_v39  ;;  %v1606_v60 = vmul.f32 %v1590_v26, %v4059_v15  ;;  %v4159_v59 = vadd.f32 %v4156_v49, %v1332_v16 }
 0x1c9   :  { %v1591_v20 = vadd.f32 0.2548296, %v1575_v14  ;;  %1798 = vmatmul.f32.gmra.mxu1 %v1748_v5  ;;  %v1405_v40 = vadd.f32 1.0, %v1389_v50  ;;  %v1528_v42 = vadd.f32 1.4214138, %v1512_v9  ;;  %v1625_v8 = vsub.f32 0.0, %v4037_v48 }
 0x1ca   :  { %v1717_v6 = vmul.f32 %v1701_v4, %v1349_v10  ;;  %v1686_v21 = vmul.f32 %v2680_v56, %v1606_v60  ;;  %v1481_v18 = vmul.f32 1.0614054, %v4131_v25  ;;  %v4758_v61 = vand.u32 2147483647, %v4159_v59 }
 0x1cb   :  { %v1607_v15 = vmul.f32 %v1591_v20, %v4071_v17  ;;  %2687 = vrcp.f32 %v1405_v40  ;;  %v1499_v14 = vadd.f32 -1.4531521, %v1483_v27  ;;  %v1544_v56 = vmul.f32 %v1528_v42, %v4099_v55 }
 0x1cc   :  { %1899 = vmatmul.f32.gmra.mxu2 %v2792_v37  ;;  %v1733_v10 = vadd.f32 %v1717_v6, %v3878_v23  ;;  %v2686_v26 = vpop.eup %2685  ;;  %v1702_v5 = vsub.f32 1.0, %v1686_v21  ;;  %v1434_v17 = vmul.f32 %v4144_v24, %v4104_v62  ;;  %v4173_v60 = vmul.f32 0.70710677, %v4758_v61  ;;  %v1335_v21 = vpop.f32.mrf.mxu0 }
 0x1cd   :  { %v1687_v4 = vmul.f32 %v2682_v53, %v1607_v15  ;;  %v1436_v50 = vmul.f32 %v2686_v26, %v1404_v33  ;;  %2689 = vpow2.f32 %v1661_v36  ;;  %v1560_v20 = vadd.f32 -0.28449672, %v1544_v56  ;;  %v4186_v56 = vpop.f32.mrf.mxu2 }
 0x1ce   :  { %v1749_v9 = vmul.f32 0.5, %v1733_v10  ;;  %v1718_v23 = vmul.f32 %v1702_v5, %v1350_v28  ;;  %v1497_v16 = vadd.f32 -1.4531521, %v1481_v18  ;;  %v1641_v27 = vmul.f32 %v1625_v8, %v4037_v48  ;;  %v2793_v18 = vld [vmem:[#allocation2 + $0x10] sm:$0xff] }
 0x1cf   :  { %v1452_v53 = vsub.f32 2.0, %v1436_v50  ;;  %v1390_v6 = vmul.f32 0.3275911, %v4173_v60  ;;  %v1515_v37 = vmul.f32 %v1499_v14, %v4146_v39  ;;  %v1703_v62 = vsub.f32 1.0, %v1687_v4 }
 0x1d0   :  { %v1576_v33 = vmul.f32 %v1560_v20, %v4099_v55  ;;  %v1450_v42 = vsub.f32 2.0, %v1434_v17  ;;  %v1734_v28 = vadd.f32 %v1718_v23, %v3883_v38  ;;  %v1513_v8 = vmul.f32 %v1497_v16, %v4131_v25  ;;  %v4194_v23 = vpop.f32.mrf.mxu3 }
 0x1d1   :  { %v2688_v15 = vpop.eup %2687  ;;  %1801 = vmatmul.f32.gmra.mxu1 %v1749_v9  ;;  %v4181_v36 = vmul.f32 %v2686_v26, %v1452_v53  ;;  %v1406_v10 = vadd.f32 1.0, %v1390_v6  ;;  %v1663_v5 = vmul.f32 1.442695, %v1641_v27  ;;  %v1531_v20 = vadd.f32 1.4214138, %v1515_v37 }
 0x1d2   :  { %v1437_v48 = vmul.f32 %v2688_v15, %v1405_v40  ;;  %v1592_v4 = vadd.f32 0.2548296, %v1576_v33  ;;  %v1719_v26 = vmul.f32 %v1703_v62, %v1351_v22  ;;  %v4191_v38 = vmul.f32 %v4144_v24, %v1450_v42 }
 0x1d3   :  { %v1484_v14 = vmul.f32 1.0614054, %v4181_v36  ;;  %v2690_v50 = vpop.eup %2689  ;;  %2691 = vrcp.f32 %v1406_v10  ;;  %v1750_v9 = vmul.f32 0.5, %v1734_v28  ;;  %v4197_v16 = vadd.f32 %v4156_v49, %v1335_v21 }
 0x1d4   :  { %1902 = vmatmul.f32.gmra.mxu2 %v2793_v18  ;;  %v1453_v17 = vsub.f32 2.0, %v1437_v48  ;;  %v1608_v40 = vmul.f32 %v1592_v4, %v4099_v55  ;;  %v1529_v6 = vadd.f32 1.4214138, %v1513_v8  ;;  %v1547_v22 = vmul.f32 %v1531_v20, %v4146_v39  ;;  %v1338_v42 = vpop.f32.mrf.mxu0  ;;  %v2794_v8 = vld [vmem:[#allocation2 + $0x18] sm:$0xff] }
 0x1d5   :  { %v1500_v27 = vadd.f32 -1.4531521, %v1484_v14  ;;  %v4757_v33 = vand.u32 2147483647, %v4197_v16  ;;  %v1627_v24 = vsub.f32 0.0, %v4084_v54  ;;  %v1735_v62 = vadd.f32 %v1719_v26, %v3939_v52 }
 0x1d6   :  { %v4199_v53 = vmul.f32 %v2688_v15, %v1453_v17  ;;  %v1688_v37 = vmul.f32 %v2690_v50, %v1608_v40  ;;  %v1545_v55 = vmul.f32 %v1529_v6, %v4131_v25  ;;  %2693 = vpow2.f32 %v1663_v5 }
 0x1d7   :  { %v4208_v15 = vmul.f32 0.70710677, %v4757_v33  ;;  %v1482_v28 = vmul.f32 1.0614054, %v4191_v38  ;;  %v1516_v48 = vmul.f32 %v1500_v27, %v4181_v36  ;;  %v1626_v4 = vsub.f32 0.0, %v4075_v35 }
 0x1d8   :  { %v1704_v21 = vsub.f32 1.0, %v1688_v37  ;;  %v1485_v14 = vmul.f32 1.0614054, %v4199_v53  ;;  %v1561_v52 = vadd.f32 -0.28449672, %v1545_v55  ;;  %v1643_v17 = vmul.f32 %v1627_v24, %v4084_v54  ;;  %v4219_v37 = vpop.f32.mrf.mxu2  ;;  %v4224_v54 = vpop.f32.mrf.mxu3 }
 0x1d9   :  { %1804 = vmatmul.f32.gmra.mxu1 %v1750_v9  ;;  %v2692_v18 = vpop.eup %2691  ;;  %v1391_v5 = vmul.f32 0.3275911, %v4208_v15  ;;  %v1563_v20 = vadd.f32 -0.28449672, %v1547_v22  ;;  %v1751_v26 = vmul.f32 0.5, %v1735_v62  ;;  %v1642_v13 = vmul.f32 %v1626_v4, %v4075_v35 }
 0x1da   :  { %v1438_v50 = vmul.f32 %v2692_v18, %v1406_v10  ;;  %v1577_v9 = vmul.f32 %v1561_v52, %v4131_v25  ;;  %v1720_v27 = vmul.f32 %v1704_v21, %v1352_v0  ;;  %v1532_v55 = vadd.f32 1.4214138, %v1516_v48 }
 0x1db   :  { %v1407_v6 = vadd.f32 1.0, %v1391_v5  ;;  %v1501_v33 = vadd.f32 -1.4531521, %v1485_v14  ;;  %v1579_v24 = vmul.f32 %v1563_v20, %v4146_v39  ;;  %v1667_v62 = vmul.f32 1.442695, %v1643_v17 }
 0x1dc   :  { %1905 = vmatmul.f32.gmra.mxu2 %v2794_v8  ;;  %v1454_v40 = vsub.f32 2.0, %v1438_v50  ;;  %v1498_v8 = vadd.f32 -1.4531521, %v1482_v28  ;;  %v1593_v61 = vadd.f32 0.2548296, %v1577_v9  ;;  %v2694_v10 = vpop.eup %2693  ;;  %v1628_v0 = vsub.f32 0.0, %v4121_v32  ;;  %v1341_v52 = vpop.f32.mrf.mxu0 }
 0x1dd   :  { %2695 = vrcp.f32 %v1407_v6  ;;  %v1736_v48 = vadd.f32 %v1720_v27, %v3952_v30  ;;  %v4232_v35 = vadd.f32 %v4156_v49, %v1338_v42  ;;  %v1548_v14 = vmul.f32 %v1532_v55, %v4181_v36  ;;  %v2795_v50 = vld [vmem:[#allocation2 + $0x20] sm:$0xff] }
 0x1de   :  { %v4222_v22 = vmul.f32 %v2692_v18, %v1454_v40  ;;  %v1609_v21 = vmul.f32 %v1593_v61, %v4131_v25  ;;  %v1514_v18 = vmul.f32 %v1498_v8, %v4191_v38  ;;  %v1517_v4 = vmul.f32 %v1501_v33, %v4199_v53 }
 0x1df   :  { %v1665_v20 = vmul.f32 1.442695, %v1642_v13  ;;  %v1360_v25 = vand.u32 2147483647, %v4232_v35  ;;  %2697 = vpow2.f32 %v1667_v62  ;;  %v1644_v17 = vmul.f32 %v1628_v0, %v4121_v32 }
 0x1e0   :  { %v1486_v28 = vmul.f32 1.0614054, %v4222_v22  ;;  %v1689_v5 = vmul.f32 %v2694_v10, %v1609_v21  ;;  %v1530_v61 = vadd.f32 1.4214138, %v1514_v18  ;;  %v1595_v9 = vadd.f32 0.2548296, %v1579_v24  ;;  %v4247_v62 = vpop.f32.mrf.mxu2 }
 0x1e1   :  { %1807 = vmatmul.f32.gmra.mxu1 %v1751_v26  ;;  %v1752_v40 = vmul.f32 0.5, %v1736_v48  ;;  %v4241_v27 = vmul.f32 0.70710677, %v1360_v25  ;;  %v1564_v8 = vadd.f32 -0.28449672, %v1548_v14  ;;  %2699 = vpow2.f32 %v1665_v20 }
 0x1e2   :  { %v1502_v30 = vadd.f32 -1.4531521, %v1486_v28  ;;  %v1705_v26 = vsub.f32 1.0, %v1689_v5  ;;  %v1546_v33 = vmul.f32 %v1530_v61, %v4191_v38  ;;  %v1533_v55 = vadd.f32 1.4214138, %v1517_v4 }
 0x1e3   :  { %v2696_v42 = vpop.eup %2695  ;;  %v1392_v32 = vmul.f32 0.3275911, %v4241_v27  ;;  %v1669_v0 = vmul.f32 1.442695, %v1644_v17  ;;  %v1629_v24 = vsub.f32 0.0, %v4141_v11  ;;  %v1611_v5 = vmul.f32 %v1595_v9, %v4146_v39  ;;  %v2796_v17 = vld [vmem:[#allocation2 + $0x28] sm:$0xff] }
 0x1e4   :  { %1908 = vmatmul.f32.gmra.mxu2 %v2795_v50  ;;  %v1439_v13 = vmul.f32 %v2696_v42, %v1407_v6  ;;  %v1721_v10 = vmul.f32 %v1705_v26, %v1353_v34  ;;  %v1518_v21 = vmul.f32 %v1502_v30, %v4222_v22  ;;  %v1562_v14 = vadd.f32 -0.28449672, %v1546_v33  ;;  %v4252_v6 = vpop.f32.mrf.mxu3  ;;  %v1344_v4 = vpop.f32.mrf.mxu0 }
 0x1e5   :  { %v1408_v18 = vadd.f32 1.0, %v1392_v32  ;;  %v4255_v34 = vadd.f32 %v4156_v49, %v1341_v52  ;;  %v2698_v50 = vpop.eup %2697  ;;  %v1580_v20 = vmul.f32 %v1564_v8, %v4181_v36  ;;  %v1549_v61 = vmul.f32 %v1533_v55, %v4199_v53 }
 0x1e6   :  { %v1455_v28 = vsub.f32 2.0, %v1439_v13  ;;  %v1737_v48 = vadd.f32 %v1721_v10, %v4020_v63  ;;  %v1578_v63 = vmul.f32 %v1562_v14, %v4191_v38  ;;  %v1534_v26 = vadd.f32 1.4214138, %v1518_v21 }
 0x1e7   :  { %2701 = vrcp.f32 %v1408_v18  ;;  %v2700_v33 = vpop.eup %2699  ;;  %v1645_v39 = vmul.f32 %v1629_v24, %v4141_v11  ;;  %v4761_v55 = vand.u32 2147483647, %v4255_v34  ;;  %v1691_v13 = vmul.f32 %v2698_v50, %v1611_v5 }
 0x1e8   :  { %v4260_v30 = vmul.f32 %v2696_v42, %v1455_v28  ;;  %2703 = vpow2.f32 %v1669_v0  ;;  %v1753_v9 = vmul.f32 0.5, %v1737_v48  ;;  %v1594_v8 = vadd.f32 0.2548296, %v1578_v63  ;;  %v2797_v63 = vld [vmem:[#allocation2 + $0x30] sm:$0xff] }
 0x1e9   :  { %1810 = vmatmul.f32.gmra.mxu1 %v1752_v40  ;;  %v4265_v40 = vadd.f32 %v4156_v49, %v1344_v4  ;;  %v1596_v42 = vadd.f32 0.2548296, %v1580_v20  ;;  %v1565_v10 = vadd.f32 -0.28449672, %v1549_v61  ;;  %v4273_v21 = vmul.f32 0.70710677, %v4761_v55 }
 0x1ea   :  { %v1487_v52 = vmul.f32 1.0614054, %v4260_v30  ;;  %v1610_v0 = vmul.f32 %v1594_v8, %v4191_v38  ;;  %v1630_v49 = vsub.f32 0.0, %v4173_v60  ;;  %v1671_v48 = vmul.f32 1.442695, %v1645_v39  ;;  %v2376_v8 = vld [vmem:[#allocation8 + $0x1f8] sm:$0xff] }
 0x1eb   :  { %v4760_v32 = vand.u32 2147483647, %v4265_v40  ;;  %v1550_v14 = vmul.f32 %v1534_v26, %v4222_v22  ;;  %v1393_v50 = vmul.f32 0.3275911, %v4273_v21  ;;  %v1707_v20 = vsub.f32 1.0, %v1691_v13  ;;  %2377 = vmatpush.msrb.mxu3 %v2376_v8 }
 0x1ec   :  { %1911 = vmatmul.f32.gmra.mxu2 %v2796_v17  ;;  %v1503_v28 = vadd.f32 -1.4531521, %v1487_v52  ;;  %v1690_v4 = vmul.f32 %v2700_v33, %v1610_v0  ;;  %v1612_v61 = vmul.f32 %v1596_v42, %v4181_v36  ;;  %v1581_v17 = vmul.f32 %v1565_v10, %v4199_v53 }
 0x1ed   :  { %v4278_v11 = vmul.f32 0.70710677, %v4760_v32  ;;  %v2702_v24 = vpop.eup %2701  ;;  %v1173_v5 = vpop.f32.mrf.mxu2  ;;  %v1409_v26 = vadd.f32 1.0, %v1393_v50  ;;  %v1646_v0 = vmul.f32 %v1630_v49, %v4173_v60  ;;  %v1566_v36 = vadd.f32 -0.28449672, %v1550_v14 }
 0x1ee   :  { %v2704_v38 = vpop.eup %2703  ;;  %v1440_v52 = vmul.f32 %v2702_v24, %v1408_v18  ;;  %v1519_v32 = vmul.f32 %v1503_v28, %v4260_v30  ;;  %v1706_v39 = vsub.f32 1.0, %v1690_v4  ;;  %v1723_v10 = vmul.f32 %v1707_v20, %v1355_v43 }
 0x1ef   :  { %v1394_v33 = vmul.f32 0.3275911, %v4278_v11  ;;  %2705 = vrcp.f32 %v1409_v26  ;;  %v1692_v28 = vmul.f32 %v2704_v38, %v1612_v61  ;;  %v1597_v50 = vadd.f32 0.2548296, %v1581_v17  ;;  %v2375_v61 = vld [vmem:[#allocation8 + $0x1f0] sm:$0xff] }
 0x1f0   :  { %v1456_v55 = vsub.f32 2.0, %v1440_v52  ;;  %v1722_v42 = vmul.f32 %v1706_v39, %v1354_v47  ;;  %2707 = vpow2.f32 %v1671_v48  ;;  %v1582_v14 = vmul.f32 %v1566_v36, %v4222_v22  ;;  %v2798_v39 = vld [vmem:[#allocation2 + $0x38] sm:$0xff]  ;;  %2378 = vmatpush.msrb.mxu3 %v2375_v61 }
 0x1f1   :  { %1813 = vmatmul.f32.gmra.mxu1 %v1753_v9  ;;  %v1410_v18 = vadd.f32 1.0, %v1394_v33  ;;  %v1631_v47 = vsub.f32 0.0, %v4208_v15 }
 0x1f2   :  { %v1238_v9 = vpop.f32.mrf.mxu3  ;;  %v4293_v4 = vmul.f32 %v2702_v24, %v1456_v55  ;;  %v1738_v60 = vadd.f32 %v1722_v42, %v4045_v31  ;;  %v1739_v55 = vadd.f32 %v1723_v10, %v4067_v41  ;;  %v1708_v24 = vsub.f32 1.0, %v1692_v28  ;;  %v2374_v42 = vld [vmem:[#allocation8 + $0x1e8] sm:$0xff] }
 0x1f3   :  { %v4287_v13 = vadd.f32 %v1238_v9, %v1173_v5  ;;  %2709 = vrcp.f32 %v1410_v18  ;;  %v1673_v5 = vmul.f32 1.442695, %v1646_v0  ;;  %v1598_v9 = vadd.f32 0.2548296, %v1582_v14  ;;  %2379 = vmatpush.msrb.mxu3 %v2374_v42 }
 0x1f4   :  { %1914 = vmatmul.f32.gmra.mxu2 %v2797_v63  ;;  %v1535_v63 = vadd.f32 1.4214138, %v1519_v32  ;;  %v1488_v49 = vmul.f32 1.0614054, %v4293_v4  ;;  %v1754_v52 = vmul.f32 0.5, %v1738_v60  ;;  %v1613_v32 = vmul.f32 %v1597_v50, %v4199_v53  ;;  %v2373_v53 = vld [vmem:[#allocation8 + $0x1e0] sm:$0xff] }
 0x1f5   :  { %v2706_v43 = vpop.eup %2705  ;;  %2711 = vpow2.f32 %v1673_v5  ;;  %v1647_v33 = vmul.f32 %v1631_v47, %v4208_v15  ;;  %v1755_v28 = vmul.f32 0.5, %v1739_v55  ;;  %v1724_v50 = vmul.f32 %v1708_v24, %v1356_v51  ;;  %v2372_v5 = vld [vmem:[#allocation8 + $0x1d8] sm:$0xff]  ;;  %2380 = vmatpush.msrb.mxu3 %v2373_v53 }
 0x1f6   :  { %v1504_v8 = vadd.f32 -1.4531521, %v1488_v49  ;;  %v1551_v31 = vmul.f32 %v1535_v63, %v4260_v30  ;;  %v2708_v48 = vpop.eup %2707  ;;  %v1441_v20 = vmul.f32 %v2706_v43, %v1409_v26  ;;  %v1632_v47 = vsub.f32 0.0, %v4241_v27 }
 0x1f7   :  { %v1693_v63 = vmul.f32 %v2708_v48, %v1613_v32  ;;  %v1675_v15 = vmul.f32 1.442695, %v1647_v33  ;;  %v1740_v32 = vadd.f32 %v1724_v50, %v4107_v45  ;;  %2381 = vmatpush.msrb.mxu3 %v2372_v5  ;;  %v4815_v45 = vand.u32 2147483647, %v4127_v29 }
 0x1f8   :  { %v1520_v38 = vmul.f32 %v1504_v8, %v4293_v4  ;;  %v1457_v36 = vsub.f32 2.0, %v1441_v20  ;;  %v1567_v60 = vadd.f32 -0.28449672, %v1551_v31  ;;  %v2370_v20 = vld [vmem:[#allocation8 + $0x1c8] sm:$0xff] }
 0x1f9   :  { %1816 = vmatmul.f32.gmra.mxu1 %v1754_v52  ;;  %v2710_v17 = vpop.eup %2709  ;;  %v1709_v31 = vsub.f32 1.0, %v1693_v63  ;;  %2713 = vpow2.f32 %v1675_v15 }
 0x1fa   :  { %v1536_v0 = vadd.f32 1.4214138, %v1520_v38  ;;  %v1442_v41 = vmul.f32 %v2710_v17, %v1410_v18  ;;  %v4306_v26 = vmul.f32 %v2706_v43, %v1457_v36  ;;  %v1614_v18 = vmul.f32 %v1598_v9, %v4222_v22  ;;  %v2371_v43 = vld [vmem:[#allocation8 + $0x1d0] sm:$0xff] }
 0x1fb   :  { %v2712_v24 = vpop.eup %2711  ;;  %v1583_v48 = vmul.f32 %v1567_v60, %v4260_v30  ;;  %2382 = vmatpush.msrb.mxu3 %v2371_v43  ;;  %v1756_v36 = vmul.f32 0.5, %v1740_v32 }
 0x1fc   :  { %1917 = vmatmul.f32.gmra.mxu2 %v2798_v39  ;;  %v1458_v49 = vsub.f32 2.0, %v1442_v41  ;;  %v1552_v8 = vmul.f32 %v1536_v0, %v4293_v4  ;;  %v1489_v51 = vmul.f32 1.0614054, %v4306_v26  ;;  %v2799_v39 = vld [vmem:[#allocation2 + $0x40] sm:$0xff]  ;;  %v1694_v61 = vmul.f32 %v2712_v24, %v1614_v18 }
 0x1fd   :  { %v1176_v10 = vpop.f32.mrf.mxu2  ;;  %v1725_v41 = vmul.f32 %v1709_v31, %v4815_v45  ;;  %v1599_v42 = vadd.f32 0.2548296, %v1583_v48  ;;  %2383 = vmatpush.msrb.mxu3 %v2370_v20  ;;  %v1634_v20 = vsub.f32 0.0, %v4278_v11 }
 0x1fe   :  { %v4314_v55 = vmul.f32 %v2710_v17, %v1458_v49  ;;  %v1505_v38 = vadd.f32 -1.4531521, %v1489_v51  ;;  %v1568_v9 = vadd.f32 -0.28449672, %v1552_v8  ;;  %v1648_v17 = vmul.f32 %v1632_v47, %v4241_v27 }
 0x1ff   :  { %v1241_v14 = vpop.f32.mrf.mxu3  ;;  %v1710_v63 = vsub.f32 1.0, %v1694_v61  ;;  %v1633_v27 = vsub.f32 0.0, %v4273_v21  ;;  %v2714_v5 = vpop.eup %2713  ;;  %v1741_v15 = vadd.f32 %v1725_v41, %v4127_v29  ;;  %v1615_v47 = vmul.f32 %v1599_v42, %v4260_v30  ;;  %v2801_v61 = vld [vmem:[#allocation2 + $0x50] sm:$0xff] }
 0x200   :  { %v4309_v52 = vadd.f32 %v1241_v14, %v1176_v10  ;;  %v1490_v22 = vmul.f32 1.0614054, %v4314_v55  ;;  %v1521_v33 = vmul.f32 %v1505_v38, %v4306_v26  ;;  %v1584_v60 = vmul.f32 %v1568_v9, %v4293_v4  ;;  %v2800_v14 = vld [vmem:[#allocation2 + $0x48] sm:$0xff] }
 0x201   :  { %1819 = vmatmul.f32.gmra.mxu1 %v1755_v28  ;;  %v1677_v49 = vmul.f32 1.442695, %v1648_v17  ;;  %v4816_v51 = vand.u32 2147483647, %v4159_v59  ;;  %v1649_v24 = vmul.f32 %v1633_v27, %v4273_v21  ;;  %v1757_v32 = vmul.f32 0.5, %v1741_v15  ;;  %v2802_v27 = vld [vmem:[#allocation2 + $0x58] sm:$0xff] }
 0x202   :  { %v1506_v10 = vadd.f32 -1.4531521, %v1490_v22  ;;  %v1537_v53 = vadd.f32 1.4214138, %v1521_v33  ;;  %v1600_v43 = vadd.f32 0.2548296, %v1584_v60  ;;  %v1695_v31 = vmul.f32 %v2714_v5, %v1615_v47 }
 0x203   :  { %2715 = vpow2.f32 %v1677_v49  ;;  %v2369_v22 = vld [vmem:[#allocation8 + $0x1c0] sm:$0xff]  ;;  %v1679_v30 = vmul.f32 1.442695, %v1649_v24  ;;  %v2368_v60 = vld [vmem:[#allocation8 + $0x1b8] sm:$0xff]  ;;  %v2367_v24 = vld [vmem:[#allocation8 + $0x1b0] sm:$0xff] }
 0x204   :  { %1920 = vmatmul.f32.gmra.mxu2 %v2799_v39  ;;  %v1553_v18 = vmul.f32 %v1537_v53, %v4306_v26  ;;  %v1522_v8 = vmul.f32 %v1506_v10, %v4314_v55  ;;  %v1726_v39 = vmul.f32 %v1710_v63, %v4816_v51  ;;  %2384 = vmatpush.msrb.mxu3 %v2369_v22  ;;  %v1711_v9 = vsub.f32 1.0, %v1695_v31  ;;  %v2803_v31 = vld [vmem:[#allocation2 + $0x60] sm:$0xff] }
 0x205   :  { %v1179_v0 = vpop.f32.mrf.mxu2  ;;  %v1616_v17 = vmul.f32 %v1600_v43, %v4293_v4  ;;  %2717 = vpow2.f32 %v1679_v30  ;;  %v4817_v10 = vand.u32 2147483647, %v4197_v16 }
 0x206   :  { %v1569_v48 = vadd.f32 -0.28449672, %v1553_v18  ;;  %v1538_v38 = vadd.f32 1.4214138, %v1522_v8  ;;  %v1742_v29 = vadd.f32 %v1726_v39, %v4159_v59  ;;  %v1650_v59 = vmul.f32 %v1634_v20, %v4278_v11  ;;  %2385 = vmatpush.msrb.mxu3 %v2368_v60 }
 0x207   :  { %v1244_v28 = vpop.f32.mrf.mxu3  ;;  %v1727_v53 = vmul.f32 %v1711_v9, %v4817_v10  ;;  %v2804_v9 = vld [vmem:[#allocation2 + $0x68] sm:$0xff] }
 0x208   :  { %v4323_v50 = vadd.f32 %v1244_v28, %v1179_v0  ;;  %v1585_v33 = vmul.f32 %v1569_v48, %v4306_v26  ;;  %v1554_v21 = vmul.f32 %v1538_v38, %v4314_v55  ;;  %v1758_v41 = vmul.f32 0.5, %v1742_v29  ;;  %2386 = vmatpush.msrb.mxu3 %v2367_v24 }
 0x209   :  { %1822 = vmatmul.f32.gmra.mxu1 %v1756_v36  ;;  %v2716_v36 = vpop.eup %2715  ;;  %v1681_v49 = vmul.f32 1.442695, %v1650_v59 }
 0x20a   :  { %v1696_v28 = vmul.f32 %v2716_v36, %v1616_v17  ;;  %v1601_v63 = vadd.f32 0.2548296, %v1585_v33  ;;  %v1570_v4 = vadd.f32 -0.28449672, %v1554_v21 }
 0x20b   :  { %v2718_v47 = vpop.eup %2717  ;;  %2719 = vpow2.f32 %v1681_v49 }
 0x20c   :  { %1923 = vmatmul.f32.gmra.mxu2 %v2800_v14  ;;  %v1743_v14 = vadd.f32 %v1727_v53, %v4197_v16  ;;  %v1712_v5 = vsub.f32 1.0, %v1696_v28  ;;  %v1617_v15 = vmul.f32 %v1601_v63, %v4306_v26  ;;  %v1586_v11 = vmul.f32 %v1570_v4, %v4314_v55  ;;  %v4365_v4 = vld [vmem:[#allocation7 + $0x3] ss:$0 sm:$0xff] }
 0x20d   :  { %v1182_v0 = vpop.f32.mrf.mxu2 }
 0x20e   :  { %v1759_v18 = vmul.f32 0.5, %v1743_v14  ;;  %v1728_v8 = vmul.f32 %v1712_v5, %v1360_v25  ;;  %v1697_v51 = vmul.f32 %v2718_v47, %v1617_v15  ;;  %v1602_v39 = vadd.f32 0.2548296, %v1586_v11  ;;  %v2366_v47 = vld [vmem:[#allocation8 + $0x1a8] sm:$0xff] }
 0x20f   :  { %v4818_v25 = vand.u32 2147483647, %v4255_v34  ;;  %2387 = vmatpush.msrb.mxu3 %v2366_v47 }
 0x210   :  { %v1744_v26 = vadd.f32 %v1728_v8, %v4232_v35  ;;  %v1713_v48 = vsub.f32 1.0, %v1697_v51  ;;  %v1618_v38 = vmul.f32 %v1602_v39, %v4314_v55  ;;  %v4819_v35 = vand.u32 2147483647, %v4265_v40  ;;  %v2365_v8 = vld [vmem:[#allocation8 + $0x1a0] sm:$0xff]  ;;  %v2364_v39 = vld [vmem:[#allocation8 + $0x198] sm:$0xff] }
 0x211   :  { %1825 = vmatmul.f32.gmra.mxu1 %v1757_v32  ;;  %v2720_v22 = vpop.eup %2719  ;;  %2388 = vmatpush.msrb.mxu3 %v2365_v8 }
 0x212   :  { %v1760_v29 = vmul.f32 0.5, %v1744_v26  ;;  %v1729_v30 = vmul.f32 %v1713_v48, %v4818_v25  ;;  %v1698_v20 = vmul.f32 %v2720_v22, %v1618_v38  ;;  %v2362_v22 = vld [vmem:[#allocation8 + $0x188] sm:$0xff] }
 0x213   :  { %2389 = vmatpush.msrb.mxu3 %v2364_v39 }
 0x214   :  { %1926 = vmatmul.f32.gmra.mxu2 %v2801_v61  ;;  %v1745_v17 = vadd.f32 %v1729_v30, %v4255_v34  ;;  %v1714_v33 = vsub.f32 1.0, %v1698_v20  ;;  %v2806_v34 = vld [vmem:[#allocation2 + $0x78] sm:$0xff]  ;;  %v2361_v30 = vld [vmem:[#allocation8 + $0x180] sm:$0xff] }
 0x215   :  { %v1247_v45 = vpop.f32.mrf.mxu3 }
 0x216   :  { %v4340_v42 = vadd.f32 %v1247_v45, %v1182_v0  ;;  %v1761_v0 = vmul.f32 0.5, %v1745_v17  ;;  %v1730_v36 = vmul.f32 %v1714_v33, %v4819_v35  ;;  %v2805_v45 = vld [vmem:[#allocation2 + $0x70] sm:$0xff] }
 0x219   :  { %1828 = vmatmul.f32.gmra.mxu1 %v1758_v41  ;;  %v1185_v43 = vpop.f32.mrf.mxu2  ;;  %v1746_v41 = vadd.f32 %v1730_v36, %v4265_v40 }
 0x21b   :  { %v1762_v53 = vmul.f32 0.5, %v1746_v41 }
 0x21c   :  { %1929 = vmatmul.f32.gmra.mxu2 %v2802_v27 }
 0x221   :  { %1831 = vmatmul.f32.gmra.mxu1 %v1759_v18 }
 0x222   :  { %v1250_v32 = vpop.f32.mrf.mxu3 }
 0x223   :  { %v4349_v16 = vadd.f32 %v1250_v32, %v1185_v43  ;;  %v2363_v32 = vld [vmem:[#allocation8 + $0x190] sm:$0xff] }
 0x224   :  { %1932 = vmatmul.f32.gmra.mxu2 %v2803_v31  ;;  %2390 = vmatpush.msrb.mxu3 %v2363_v32 }
 0x226   :  { %2391 = vmatpush.msrb.mxu3 %v2362_v22 }
 0x228   :  { %2392 = vmatpush.msrb.mxu3 %v2361_v30 }
 0x229   :  { %v1188_v61 = vpop.f32.mrf.mxu2  ;;  %1834 = vmatmul.f32.gmra.mxu1 %v1760_v29 }
 0x22c   :  { %1935 = vmatmul.f32.gmra.mxu2 %v2804_v9 }
 0x22f   :  { %v1253_v21 = vpop.f32.mrf.mxu3 }
 0x230   :  { %v4358_v55 = vadd.f32 %v1253_v21, %v1188_v61 }
 0x231   :  { %1837 = vmatmul.f32.gmra.mxu1 %v1761_v0 }
 0x232   :  { %v1191_v59 = vpop.f32.mrf.mxu2 }
 0x234   :  { %1938 = vmatmul.f32.gmra.mxu2 %v2805_v45 }
 0x237   :  { %v1256_v10 = vpop.f32.mrf.mxu3 }
 0x238   :  { %v4361_v28 = vadd.f32 %v1256_v10, %v1191_v59 }
 0x239   :  { %1840 = vmatmul.f32.gmra.mxu1 %v1762_v53 }
 0x23c   :  { %1941 = vmatmul.f32.gmra.mxu2 %v2806_v34 }
 0x23f   :  { %v4363_v63 = vpop.f32.mrf.mxu2 }
 0x247   :  { %v1897_v60 = vpop.f32.mrf.mxu2 }
 0x248   :  { %v4368_v49 = vadd.f32 %v4365_v4, %v1897_v60 }
 0x24a   :  { %v1945_v27 = vand.u32 2147483647, %v4368_v49 }
 0x24c   :  { %v1961_v40 = vmul.f32 0.70710677, %v1945_v27 }
 0x24e   :  { %v1977_v14 = vmul.f32 0.3275911, %v1961_v40  ;;  %v2217_v20 = vsub.f32 0.0, %v1961_v40 }
 0x24f   :  { %v1900_v5 = vpop.f32.mrf.mxu2 }
 0x250   :  { %v1993_v15 = vadd.f32 1.0, %v1977_v14  ;;  %v4374_v11 = vadd.f32 %v4365_v4, %v1900_v5  ;;  %v2233_v35 = vmul.f32 %v2217_v20, %v1961_v40 }
 0x252   :  { %2721 = vrcp.f32 %v1993_v15  ;;  %v1946_v18 = vand.u32 2147483647, %v4374_v11  ;;  %v2249_v60 = vmul.f32 1.442695, %v2233_v35 }
 0x254   :  { %v1962_v51 = vmul.f32 0.70710677, %v1946_v18 }
 0x256   :  { %v1978_v43 = vmul.f32 0.3275911, %v1962_v51  ;;  %v2218_v47 = vsub.f32 0.0, %v1962_v51 }
 0x257   :  { %v1903_v24 = vpop.f32.mrf.mxu2 }
 0x258   :  { %v2722_v31 = vpop.eup %2721  ;;  %v1994_v26 = vadd.f32 1.0, %v1978_v43  ;;  %v4380_v48 = vadd.f32 %v4365_v4, %v1903_v24 }
 0x259   :  { %v2025_v38 = vmul.f32 %v2722_v31, %v1993_v15 }
 0x25a   :  { %2723 = vrcp.f32 %v1994_v26  ;;  %v1947_v29 = vand.u32 2147483647, %v4380_v48 }
 0x25b   :  { %v2041_v25 = vsub.f32 2.0, %v2025_v38  ;;  %v2234_v38 = vmul.f32 %v2218_v47, %v1962_v51 }
 0x25c   :  { %v1963_v61 = vmul.f32 0.70710677, %v1947_v29 }
 0x25d   :  { %v2057_v9 = vmul.f32 %v2722_v31, %v2041_v25 }
 0x25e   :  { %v1979_v17 = vmul.f32 0.3275911, %v1963_v61 }
 0x25f   :  { %v2073_v33 = vmul.f32 1.0614054, %v2057_v9  ;;  %v1906_v21 = vpop.f32.mrf.mxu2 }
 0x260   :  { %v2724_v0 = vpop.eup %2723  ;;  %v1995_v36 = vadd.f32 1.0, %v1979_v17  ;;  %v4386_v45 = vadd.f32 %v4365_v4, %v1906_v21  ;;  %v2219_v21 = vsub.f32 0.0, %v1963_v61 }
 0x261   :  { %v2089_v41 = vadd.f32 -1.4531521, %v2073_v33  ;;  %v2026_v59 = vmul.f32 %v2724_v0, %v1994_v26 }
 0x262   :  { %2725 = vrcp.f32 %v1995_v36  ;;  %v1948_v10 = vand.u32 2147483647, %v4386_v45 }
 0x263   :  { %v2105_v53 = vmul.f32 %v2089_v41, %v2057_v9  ;;  %v2042_v34 = vsub.f32 2.0, %v2026_v59  ;;  %2727 = vpow2.f32 %v2249_v60  ;;  %v2251_v41 = vmul.f32 1.442695, %v2234_v38 }
 0x264   :  { %v1964_v14 = vmul.f32 0.70710677, %v1948_v10 }
 0x265   :  { %v2121_v5 = vadd.f32 1.4214138, %v2105_v53  ;;  %v2058_v15 = vmul.f32 %v2724_v0, %v2042_v34 }
 0x266   :  { %v1980_v8 = vmul.f32 0.3275911, %v1964_v14 }
 0x267   :  { %v2137_v40 = vmul.f32 %v2121_v5, %v2057_v9  ;;  %v1909_v39 = vpop.f32.mrf.mxu2  ;;  %v2074_v43 = vmul.f32 1.0614054, %v2058_v15 }
 0x268   :  { %v2726_v24 = vpop.eup %2725  ;;  %v1996_v32 = vadd.f32 1.0, %v1980_v8  ;;  %v4392_v31 = vadd.f32 %v4365_v4, %v1909_v39 }
 0x269   :  { %v2153_v26 = vadd.f32 -0.28449672, %v2137_v40  ;;  %v2027_v22 = vmul.f32 %v2726_v24, %v1995_v36  ;;  %v2090_v25 = vadd.f32 -1.4531521, %v2074_v43  ;;  %v2728_v34 = vpop.eup %2727  ;;  %v2235_v40 = vmul.f32 %v2219_v21, %v1963_v61 }
 0x26a   :  { %2729 = vrcp.f32 %v1996_v32  ;;  %v1949_v30 = vand.u32 2147483647, %v4392_v31 }
 0x26b   :  { %v2169_v20 = vmul.f32 %v2153_v26, %v2057_v9  ;;  %v2043_v17 = vsub.f32 2.0, %v2027_v22  ;;  %v2106_v33 = vmul.f32 %v2090_v25, %v2058_v15  ;;  %2731 = vpow2.f32 %v2251_v41 }
 0x26c   :  { %v4397_v0 = vmul.f32 0.70710677, %v1949_v30 }
 0x26d   :  { %v2185_v35 = vadd.f32 0.2548296, %v2169_v20  ;;  %v4399_v59 = vmul.f32 %v2726_v24, %v2043_v17  ;;  %v2122_v53 = vadd.f32 1.4214138, %v2106_v33  ;;  %v2220_v17 = vsub.f32 0.0, %v1964_v14 }
 0x26e   :  { %v1981_v51 = vmul.f32 0.3275911, %v4397_v0 }
 0x26f   :  { %v2201_v36 = vmul.f32 %v2185_v35, %v2057_v9  ;;  %v1912_v60 = vpop.f32.mrf.mxu2  ;;  %v2138_v5 = vmul.f32 %v2122_v53, %v2058_v15  ;;  %v2075_v47 = vmul.f32 1.0614054, %v4399_v59  ;;  %v2253_v35 = vmul.f32 1.442695, %v2235_v40 }
 0x270   :  { %v2730_v8 = vpop.eup %2729  ;;  %v1997_v39 = vadd.f32 1.0, %v1981_v51  ;;  %v4404_v43 = vadd.f32 %v4365_v4, %v1912_v60 }
 0x271   :  { %v2281_v26 = vmul.f32 %v2728_v34, %v2201_v36  ;;  %v2028_v38 = vmul.f32 %v2730_v8, %v1996_v32  ;;  %v2154_v24 = vadd.f32 -0.28449672, %v2138_v5  ;;  %v2091_v25 = vadd.f32 -1.4531521, %v2075_v47  ;;  %v2732_v36 = vpop.eup %2731 }
 0x272   :  { %2733 = vrcp.f32 %v1997_v39  ;;  %v1950_v22 = vand.u32 2147483647, %v4404_v43  ;;  %v2236_v5 = vmul.f32 %v2220_v17, %v1964_v14 }
 0x273   :  { %v2297_v20 = vsub.f32 1.0, %v2281_v26  ;;  %v2044_v9 = vsub.f32 2.0, %v2028_v38  ;;  %v2170_v33 = vmul.f32 %v2154_v24, %v2058_v15  ;;  %v2107_v21 = vmul.f32 %v2091_v25, %v4399_v59 }
 0x274   :  { %v4409_v61 = vmul.f32 0.70710677, %v1950_v22  ;;  %2735 = vpow2.f32 %v2253_v35  ;;  %v2255_v17 = vmul.f32 1.442695, %v2236_v5 }
 0x275   :  { %v2313_v41 = vmul.f32 %v2297_v20, %v1945_v27  ;;  %v4414_v32 = vmul.f32 %v2730_v8, %v2044_v9  ;;  %v2186_v53 = vadd.f32 0.2548296, %v2170_v33  ;;  %v2123_v51 = vadd.f32 1.4214138, %v2107_v21 }
 0x276   :  { %v1982_v34 = vmul.f32 0.3275911, %v4409_v61 }
 0x277   :  { %v2329_v60 = vadd.f32 %v2313_v41, %v4368_v49  ;;  %v1915_v47 = vpop.f32.mrf.mxu2  ;;  %v2202_v40 = vmul.f32 %v2186_v53, %v2058_v15  ;;  %v2076_v26 = vmul.f32 1.0614054, %v4414_v32  ;;  %v2139_v27 = vmul.f32 %v2123_v51, %v4399_v59 }
 0x278   :  { %v2734_v38 = vpop.eup %2733  ;;  %v1998_v24 = vadd.f32 1.0, %v1982_v34  ;;  %v4420_v25 = vadd.f32 %v4365_v4, %v1915_v47  ;;  %v2221_v41 = vsub.f32 0.0, %v4397_v0 }
 0x279   :  { %v2345_v8 = vmul.f32 0.5, %v2329_v60  ;;  %v2029_v20 = vmul.f32 %v2734_v38, %v1997_v39  ;;  %v2282_v9 = vmul.f32 %v2732_v36, %v2202_v40  ;;  %v2092_v33 = vadd.f32 -1.4531521, %v2076_v26 }
 0x27a   :  { %2737 = vrcp.f32 %v1998_v24  ;;  %v1951_v49 = vand.u32 2147483647, %v4420_v25  ;;  %v2155_v14 = vadd.f32 -0.28449672, %v2139_v27  ;;  %v2736_v60 = vpop.eup %2735 }
 0x27b   :  { %v2045_v15 = vsub.f32 2.0, %v2029_v20  ;;  %2393 = vmatmul.f32.vlgmr.msrb.gmra.mxu3 %v2345_v8  ;;  %v2298_v21 = vsub.f32 1.0, %v2282_v9  ;;  %v2108_v35 = vmul.f32 %v2092_v33, %v4414_v32  ;;  %2739 = vpow2.f32 %v2255_v17 }
 0x27c   :  { %v4428_v53 = vmul.f32 0.70710677, %v1951_v49  ;;  %v2171_v39 = vmul.f32 %v2155_v14, %v4399_v59 }
 0x27d   :  { %v4431_v34 = vmul.f32 %v2734_v38, %v2045_v15  ;;  %v2314_v51 = vmul.f32 %v2298_v21, %v1946_v18  ;;  %v2124_v36 = vadd.f32 1.4214138, %v2108_v35  ;;  %v2237_v38 = vmul.f32 %v2221_v41, %v4397_v0 }
 0x27e   :  { %v1983_v5 = vmul.f32 0.3275911, %v4428_v53  ;;  %v2187_v47 = vadd.f32 0.2548296, %v2171_v39 }
 0x27f   :  { %v1918_v40 = vpop.f32.mrf.mxu2  ;;  %v2330_v26 = vadd.f32 %v2314_v51, %v4374_v11  ;;  %v2140_v27 = vmul.f32 %v2124_v36, %v4414_v32  ;;  %v2077_v8 = vmul.f32 1.0614054, %v4431_v34  ;;  %v2222_v51 = vsub.f32 0.0, %v4409_v61 }
 0x280   :  { %v2738_v20 = vpop.eup %2737  ;;  %v1999_v9 = vadd.f32 1.0, %v1983_v5  ;;  %v4441_v33 = vadd.f32 %v4365_v4, %v1918_v40  ;;  %v2203_v18 = vmul.f32 %v2187_v47, %v4399_v59  ;;  %v2257_v36 = vmul.f32 1.442695, %v2237_v38 }
 0x281   :  { %v2030_v14 = vmul.f32 %v2738_v20, %v1998_v24  ;;  %v2346_v15 = vmul.f32 0.5, %v2330_v26  ;;  %v2156_v21 = vadd.f32 -0.28449672, %v2140_v27  ;;  %v2093_v17 = vadd.f32 -1.4531521, %v2077_v8  ;;  %v2740_v5 = vpop.eup %2739 }
 0x282   :  { %2741 = vrcp.f32 %v1999_v9  ;;  %v1952_v11 = vand.u32 2147483647, %v4441_v33  ;;  %v2283_v35 = vmul.f32 %v2736_v60, %v2203_v18  ;;  %v2238_v8 = vmul.f32 %v2222_v51, %v4409_v61 }
 0x283   :  { %v2046_v39 = vsub.f32 2.0, %v2030_v14  ;;  %2396 = vmatmul.f32.gmra.mxu3 %v2346_v15  ;;  %v2172_v0 = vmul.f32 %v2156_v21, %v4414_v32  ;;  %v2109_v41 = vmul.f32 %v2093_v17, %v4431_v34  ;;  %2743 = vpow2.f32 %v2257_v36 }
 0x284   :  { %v4450_v59 = vmul.f32 0.70710677, %v1952_v11  ;;  %v2299_v24 = vsub.f32 1.0, %v2283_v35  ;;  %v2259_v51 = vmul.f32 1.442695, %v2238_v8  ;;  %v2223_v36 = vsub.f32 0.0, %v4428_v53 }
 0x285   :  { %v4452_v47 = vmul.f32 %v2738_v20, %v2046_v39  ;;  %v2188_v40 = vadd.f32 0.2548296, %v2172_v0  ;;  %v2125_v26 = vadd.f32 1.4214138, %v2109_v41 }
 0x286   :  { %v1984_v60 = vmul.f32 0.3275911, %v4450_v59  ;;  %v2315_v27 = vmul.f32 %v2299_v24, %v1947_v29 }
 0x287   :  { %v1921_v18 = vpop.f32.mrf.mxu2  ;;  %v2204_v38 = vmul.f32 %v2188_v40, %v4414_v32  ;;  %v2141_v14 = vmul.f32 %v2125_v26, %v4431_v34  ;;  %v2078_v15 = vmul.f32 1.0614054, %v4452_v47 }
 0x288   :  { %v2742_v21 = vpop.eup %2741  ;;  %v2000_v20 = vadd.f32 1.0, %v1984_v60  ;;  %v4462_v17 = vadd.f32 %v4365_v4, %v1921_v18  ;;  %v2331_v35 = vadd.f32 %v2315_v27, %v4380_v48 }
 0x289   :  { %v2031_v39 = vmul.f32 %v2742_v21, %v1999_v9  ;;  %v2284_v0 = vmul.f32 %v2740_v5, %v2204_v38  ;;  %v2157_v29 = vadd.f32 -0.28449672, %v2141_v14  ;;  %v2094_v41 = vadd.f32 -1.4531521, %v2078_v15  ;;  %v2744_v8 = vpop.eup %2743 }
 0x28a   :  { %2745 = vrcp.f32 %v2000_v20  ;;  %v1953_v61 = vand.u32 2147483647, %v4462_v17  ;;  %v2347_v32 = vmul.f32 0.5, %v2331_v35 }
 0x28b   :  { %v2047_v24 = vsub.f32 2.0, %v2031_v39  ;;  %v2300_v40 = vsub.f32 1.0, %v2284_v0  ;;  %v2173_v26 = vmul.f32 %v2157_v29, %v4431_v34  ;;  %v2110_v48 = vmul.f32 %v2094_v41, %v4452_v47 }
 0x28c   :  { %v4470_v60 = vmul.f32 0.70710677, %v1953_v61  ;;  %2399 = vmatmul.f32.gmra.mxu3 %v2347_v32  ;;  %2747 = vpow2.f32 %v2259_v51 }
 0x28d   :  { %v4473_v9 = vmul.f32 %v2742_v21, %v2047_v24  ;;  %v2316_v5 = vmul.f32 %v2300_v40, %v1948_v10  ;;  %v2189_v27 = vadd.f32 0.2548296, %v2173_v26  ;;  %v2126_v38 = vadd.f32 1.4214138, %v2110_v48 }
 0x28e   :  { %v1985_v18 = vmul.f32 0.3275911, %v4470_v60  ;;  %v2239_v21 = vmul.f32 %v2223_v36, %v4428_v53  ;;  %v2224_v48 = vsub.f32 0.0, %v4450_v59 }
 0x28f   :  { %v1924_v14 = vpop.f32.mrf.mxu2  ;;  %v2332_v15 = vadd.f32 %v2316_v5, %v4386_v45  ;;  %v2205_v35 = vmul.f32 %v2189_v27, %v4431_v34  ;;  %v2079_v39 = vmul.f32 1.0614054, %v4473_v9  ;;  %v2142_v10 = vmul.f32 %v2126_v38, %v4452_v47 }
 0x290   :  { %v2746_v0 = vpop.eup %2745  ;;  %v2001_v29 = vadd.f32 1.0, %v1985_v18  ;;  %v4483_v41 = vadd.f32 %v4365_v4, %v1924_v14  ;;  %v2261_v36 = vmul.f32 1.442695, %v2239_v21 }
 0x291   :  { %v2032_v32 = vmul.f32 %v2746_v0, %v2000_v20  ;;  %v2348_v24 = vmul.f32 0.5, %v2332_v15  ;;  %v2285_v40 = vmul.f32 %v2744_v8, %v2205_v35  ;;  %v2095_v51 = vadd.f32 -1.4531521, %v2079_v39 }
 0x292   :  { %2749 = vrcp.f32 %v2001_v29  ;;  %v1954_v45 = vand.u32 2147483647, %v4483_v41  ;;  %v2158_v26 = vadd.f32 -0.28449672, %v2142_v10  ;;  %v2748_v8 = vpop.eup %2747  ;;  %v2240_v39 = vmul.f32 %v2224_v48, %v4450_v59 }
 0x293   :  { %v2048_v34 = vsub.f32 2.0, %v2032_v32  ;;  %v2301_v5 = vsub.f32 1.0, %v2285_v40  ;;  %v2111_v53 = vmul.f32 %v2095_v51, %v4473_v9  ;;  %2751 = vpow2.f32 %v2261_v36 }
 0x294   :  { %v4491_v27 = vmul.f32 0.70710677, %v1954_v45  ;;  %2402 = vmatmul.f32.gmra.mxu3 %v2348_v24  ;;  %v2174_v20 = vmul.f32 %v2158_v26, %v4452_v47  ;;  %v2263_v48 = vmul.f32 1.442695, %v2240_v39 }
 0x295   :  { %v4494_v18 = vmul.f32 %v2746_v0, %v2048_v34  ;;  %v2317_v38 = vmul.f32 %v2301_v5, %v1949_v30  ;;  %v2127_v14 = vadd.f32 1.4214138, %v2111_v53 }
 0x296   :  { %v1986_v15 = vmul.f32 0.3275911, %v4491_v27  ;;  %v2190_v35 = vadd.f32 0.2548296, %v2174_v20 }
 0x297   :  { %v1927_v21 = vpop.f32.mrf.mxu2  ;;  %v2333_v10 = vadd.f32 %v2317_v38, %v4392_v31  ;;  %v2143_v32 = vmul.f32 %v2127_v14, %v4473_v9  ;;  %v2080_v24 = vmul.f32 1.0614054, %v4494_v18  ;;  %v2225_v14 = vsub.f32 0.0, %v4470_v60 }
 0x298   :  { %v2750_v40 = vpop.eup %2749  ;;  %v2002_v0 = vadd.f32 1.0, %v1986_v15  ;;  %v4504_v51 = vadd.f32 %v4365_v4, %v1927_v21  ;;  %v2206_v30 = vmul.f32 %v2190_v35, %v4452_v47 }
 0x299   :  { %v2033_v26 = vmul.f32 %v2750_v40, %v2001_v29  ;;  %v2349_v34 = vmul.f32 0.5, %v2333_v10  ;;  %v2159_v5 = vadd.f32 -0.28449672, %v2143_v32  ;;  %v2096_v53 = vadd.f32 -1.4531521, %v2080_v24  ;;  %v2752_v10 = vpop.eup %2751 }
 0x29a   :  { %2753 = vrcp.f32 %v2002_v0  ;;  %v1955_v59 = vand.u32 2147483647, %v4504_v51  ;;  %v2286_v31 = vmul.f32 %v2748_v8, %v2206_v30 }
 0x29b   :  { %v2049_v20 = vsub.f32 2.0, %v2033_v26  ;;  %v2175_v38 = vmul.f32 %v2159_v5, %v4473_v9  ;;  %v2112_v36 = vmul.f32 %v2096_v53, %v4494_v18  ;;  %2755 = vpow2.f32 %v2263_v48 }
 0x29c   :  { %v4513_v15 = vmul.f32 0.70710677, %v1955_v59  ;;  %2405 = vmatmul.f32.gmra.mxu3 %v2349_v34  ;;  %v2302_v47 = vsub.f32 1.0, %v2286_v31 }
 0x29d   :  { %v4515_v29 = vmul.f32 %v2750_v40, %v2049_v20  ;;  %v2191_v35 = vadd.f32 0.2548296, %v2175_v38  ;;  %v2128_v21 = vadd.f32 1.4214138, %v2112_v36  ;;  %v2241_v40 = vmul.f32 %v2225_v14, %v4470_v60 }
 0x29e   :  { %v1987_v8 = vmul.f32 0.3275911, %v4513_v15  ;;  %v2318_v39 = vmul.f32 %v2302_v47, %v1950_v22 }
 0x29f   :  { %v2081_v32 = vmul.f32 1.0614054, %v4515_v29  ;;  %v1930_v24 = vpop.f32.mrf.mxu2  ;;  %v2207_v30 = vmul.f32 %v2191_v35, %v4473_v9  ;;  %v2144_v26 = vmul.f32 %v2128_v21, %v4494_v18  ;;  %v2226_v21 = vsub.f32 0.0, %v4491_v27 }
 0x2a0   :  { %v2754_v34 = vpop.eup %2753  ;;  %v2003_v5 = vadd.f32 1.0, %v1987_v8  ;;  %v4525_v53 = vadd.f32 %v4365_v4, %v1930_v24  ;;  %v2334_v31 = vadd.f32 %v2318_v39, %v4404_v43  ;;  %v2265_v14 = vmul.f32 1.442695, %v2241_v40 }
 0x2a1   :  { %v2097_v20 = vadd.f32 -1.4531521, %v2081_v32  ;;  %v2034_v38 = vmul.f32 %v2754_v34, %v2002_v0  ;;  %v2287_v22 = vmul.f32 %v2752_v10, %v2207_v30  ;;  %v2160_v48 = vadd.f32 -0.28449672, %v2144_v26  ;;  %v2756_v0 = vpop.eup %2755 }
 0x2a2   :  { %2757 = vrcp.f32 %v2003_v5  ;;  %v1956_v36 = vand.u32 2147483647, %v4525_v53  ;;  %v2350_v47 = vmul.f32 0.5, %v2334_v31  ;;  %v2242_v31 = vmul.f32 %v2226_v21, %v4491_v27 }
 0x2a3   :  { %v2113_v9 = vmul.f32 %v2097_v20, %v4515_v29  ;;  %v2050_v35 = vsub.f32 2.0, %v2034_v38  ;;  %v2303_v60 = vsub.f32 1.0, %v2287_v22  ;;  %v2176_v43 = vmul.f32 %v2160_v48, %v4494_v18 }
 0x2a4   :  { %v4533_v8 = vmul.f32 0.70710677, %v1956_v36  ;;  %2408 = vmatmul.f32.gmra.mxu3 %v2350_v47  ;;  %2759 = vpow2.f32 %v2265_v14  ;;  %v2267_v21 = vmul.f32 1.442695, %v2242_v31 }
 0x2a5   :  { %v2129_v10 = vadd.f32 1.4214138, %v2113_v9  ;;  %v4536_v39 = vmul.f32 %v2754_v34, %v2050_v35  ;;  %v2319_v32 = vmul.f32 %v2303_v60, %v1951_v49  ;;  %v2192_v30 = vadd.f32 0.2548296, %v2176_v43 }
 0x2a6   :  { %v1988_v24 = vmul.f32 0.3275911, %v4533_v8 }
 0x2a7   :  { %v2145_v26 = vmul.f32 %v2129_v10, %v4515_v29  ;;  %v2082_v40 = vmul.f32 1.0614054, %v4536_v39  ;;  %v1933_v20 = vpop.f32.mrf.mxu2  ;;  %v2335_v38 = vadd.f32 %v2319_v32, %v4420_v25  ;;  %v2208_v49 = vmul.f32 %v2192_v30, %v4494_v18 }
 0x2a8   :  { %v2758_v22 = vpop.eup %2757  ;;  %v2004_v48 = vadd.f32 1.0, %v1988_v24  ;;  %v4546_v34 = vadd.f32 %v4365_v4, %v1933_v20  ;;  %v2227_v32 = vsub.f32 0.0, %v4513_v15 }
 0x2a9   :  { %v2161_v47 = vadd.f32 -0.28449672, %v2145_v26  ;;  %v2098_v9 = vadd.f32 -1.4531521, %v2082_v40  ;;  %v2035_v35 = vmul.f32 %v2758_v22, %v2003_v5  ;;  %v2351_v60 = vmul.f32 0.5, %v2335_v38 }
 0x2aa   :  { %2761 = vrcp.f32 %v2004_v48  ;;  %v1957_v43 = vand.u32 2147483647, %v4546_v34  ;;  %v2288_v10 = vmul.f32 %v2756_v0, %v2208_v49  ;;  %v2760_v40 = vpop.eup %2759 }
 0x2ab   :  { %v2177_v27 = vmul.f32 %v2161_v47, %v4515_v29  ;;  %v2114_v25 = vmul.f32 %v2098_v9, %v4536_v39  ;;  %v2051_v14 = vsub.f32 2.0, %v2035_v35  ;;  %2763 = vpow2.f32 %v2267_v21 }
 0x2ac   :  { %v4555_v24 = vmul.f32 0.70710677, %v1957_v43  ;;  %2411 = vmatmul.f32.gmra.mxu3 %v2351_v60  ;;  %v2304_v18 = vsub.f32 1.0, %v2288_v10  ;;  %v2243_v35 = vmul.f32 %v2227_v32, %v4513_v15 }
 0x2ad   :  { %v2193_v5 = vadd.f32 0.2548296, %v2177_v27  ;;  %v2130_v30 = vadd.f32 1.4214138, %v2114_v25  ;;  %v4557_v26 = vmul.f32 %v2758_v22, %v2051_v14 }
 0x2ae   :  { %v1989_v0 = vmul.f32 0.3275911, %v4555_v24  ;;  %v2320_v20 = vmul.f32 %v2304_v18, %v1952_v11  ;;  %v2269_v32 = vmul.f32 1.442695, %v2243_v35 }
 0x2af   :  { %v2209_v31 = vmul.f32 %v2193_v5, %v4515_v29  ;;  %v2146_v38 = vmul.f32 %v2130_v30, %v4536_v39  ;;  %v2083_v49 = vmul.f32 1.0614054, %v4557_v26  ;;  %v1936_v47 = vpop.f32.mrf.mxu2 }
 0x2b0   :  { %v2762_v9 = vpop.eup %2761  ;;  %v2005_v60 = vadd.f32 1.0, %v1989_v0  ;;  %v4567_v22 = vadd.f32 %v4365_v4, %v1936_v47  ;;  %v2336_v10 = vadd.f32 %v2320_v20, %v4441_v33  ;;  %v2228_v0 = vsub.f32 0.0, %v4533_v8 }
 0x2b1   :  { %v2289_v27 = vmul.f32 %v2760_v40, %v2209_v31  ;;  %v2162_v25 = vadd.f32 -0.28449672, %v2146_v38  ;;  %v2099_v11 = vadd.f32 -1.4531521, %v2083_v49  ;;  %v2036_v14 = vmul.f32 %v2762_v9, %v2004_v48  ;;  %v2764_v40 = vpop.eup %2763 }
 0x2b2   :  { %2765 = vrcp.f32 %v2005_v60  ;;  %v1958_v29 = vand.u32 2147483647, %v4567_v22  ;;  %v2352_v21 = vmul.f32 0.5, %v2336_v10 }
 0x2b3   :  { %v2305_v18 = vsub.f32 1.0, %v2289_v27  ;;  %v2178_v5 = vmul.f32 %v2162_v25, %v4536_v39  ;;  %v2115_v30 = vmul.f32 %v2099_v11, %v4557_v26  ;;  %v2052_v15 = vsub.f32 2.0, %v2036_v14 }
 0x2b4   :  { %v4576_v33 = vmul.f32 0.70710677, %v1958_v29  ;;  %2414 = vmatmul.f32.gmra.mxu3 %v2352_v21  ;;  %2767 = vpow2.f32 %v2269_v32  ;;  %v2244_v14 = vmul.f32 %v2228_v0, %v4533_v8 }
 0x2b5   :  { %v2321_v48 = vmul.f32 %v2305_v18, %v1953_v61  ;;  %v2194_v20 = vadd.f32 0.2548296, %v2178_v5  ;;  %v2131_v31 = vadd.f32 1.4214138, %v2115_v30  ;;  %v4580_v38 = vmul.f32 %v2762_v9, %v2052_v15 }
 0x2b6   :  { %v1990_v49 = vmul.f32 0.3275911, %v4576_v33  ;;  %v2271_v32 = vmul.f32 1.442695, %v2244_v14  ;;  %v2229_v14 = vsub.f32 0.0, %v4555_v24 }
 0x2b7   :  { %v2337_v47 = vadd.f32 %v2321_v48, %v4462_v17  ;;  %v2210_v35 = vmul.f32 %v2194_v20, %v4536_v39  ;;  %v2147_v10 = vmul.f32 %v2131_v31, %v4557_v26  ;;  %v2084_v27 = vmul.f32 1.0614054, %v4580_v38  ;;  %v1939_v25 = vpop.f32.mrf.mxu2 }
 0x2b8   :  { %v2766_v11 = vpop.eup %2765  ;;  %v2006_v61 = vadd.f32 1.0, %v1990_v49  ;;  %v4589_v21 = vadd.f32 %v4365_v4, %v1939_v25 }
 0x2b9   :  { %v2353_v9 = vmul.f32 0.5, %v2337_v47  ;;  %v2290_v18 = vmul.f32 %v2764_v40, %v2210_v35  ;;  %v2163_v5 = vadd.f32 -0.28449672, %v2147_v10  ;;  %v2100_v30 = vadd.f32 -1.4531521, %v2084_v27 }
 0x2ba   :  { %v2037_v17 = vmul.f32 %v2766_v11, %v2005_v60  ;;  %2769 = vrcp.f32 %v2006_v61  ;;  %v1959_v39 = vand.u32 2147483647, %v4589_v21  ;;  %v2768_v49 = vpop.eup %2767 }
 0x2bb   :  { %v2306_v15 = vsub.f32 1.0, %v2290_v18  ;;  %v2179_v48 = vmul.f32 %v2163_v5, %v4557_v26  ;;  %v2116_v20 = vmul.f32 %v2100_v30, %v4580_v38  ;;  %2771 = vpow2.f32 %v2271_v32 }
 0x2bc   :  { %v2053_v31 = vsub.f32 2.0, %v2037_v17  ;;  %v4596_v8 = vmul.f32 0.70710677, %v1959_v39  ;;  %2417 = vmatmul.f32.gmra.mxu3 %v2353_v9 }
 0x2bd   :  { %v2322_v0 = vmul.f32 %v2306_v15, %v1954_v45  ;;  %v2195_v40 = vadd.f32 0.2548296, %v2179_v48  ;;  %v2132_v60 = vadd.f32 1.4214138, %v2116_v20 }
 0x2be   :  { %v4600_v47 = vmul.f32 %v2766_v11, %v2053_v31  ;;  %v1991_v35 = vmul.f32 0.3275911, %v4596_v8 }
 0x2bf   :  { %v2338_v10 = vadd.f32 %v2322_v0, %v4483_v41  ;;  %v2211_v27 = vmul.f32 %v2195_v40, %v4557_v26  ;;  %v2148_v25 = vmul.f32 %v2132_v60, %v4580_v38  ;;  %v1942_v18 = vpop.f32.mrf.mxu2  ;;  %v2245_v0 = vmul.f32 %v2229_v14, %v4555_v24 }
 0x2c0   :  { %v2770_v9 = vpop.eup %2769  ;;  %v2085_v45 = vmul.f32 1.0614054, %v4600_v47  ;;  %v2007_v5 = vadd.f32 1.0, %v1991_v35  ;;  %v4609_v30 = vadd.f32 %v4365_v4, %v1942_v18 }
 0x2c1   :  { %v2354_v11 = vmul.f32 0.5, %v2338_v10  ;;  %v2291_v17 = vmul.f32 %v2768_v49, %v2211_v27  ;;  %v2164_v15 = vadd.f32 -0.28449672, %v2148_v25  ;;  %v2038_v48 = vmul.f32 %v2770_v9, %v2006_v61  ;;  %v2772_v35 = vpop.eup %2771 }
 0x2c2   :  { %v2101_v41 = vadd.f32 -1.4531521, %v2085_v45  ;;  %2773 = vrcp.f32 %v2007_v5  ;;  %v1960_v26 = vand.u32 2147483647, %v4609_v30  ;;  %v2230_v27 = vsub.f32 0.0, %v4576_v33 }
 0x2c3   :  { %v2307_v20 = vsub.f32 1.0, %v2291_v17  ;;  %v2180_v31 = vmul.f32 %v2164_v15, %v4580_v38  ;;  %v2054_v32 = vsub.f32 2.0, %v2038_v48  ;;  %v2273_v18 = vmul.f32 1.442695, %v2245_v0 }
 0x2c4   :  { %v2117_v40 = vmul.f32 %v2101_v41, %v4600_v47  ;;  %v4617_v4 = vmul.f32 0.70710677, %v1960_v26  ;;  %2420 = vmatmul.f32.gmra.mxu3 %v2354_v11 }
 0x2c5   :  { %v2323_v61 = vmul.f32 %v2307_v20, %v1955_v59  ;;  %v2196_v60 = vadd.f32 0.2548296, %v2180_v31  ;;  %v2070_v49 = vmul.f32 %v2770_v9, %v2054_v32  ;;  %v2246_v31 = vmul.f32 %v2230_v27, %v4576_v33 }
 0x2c6   :  { %v2133_v10 = vadd.f32 1.4214138, %v2117_v40  ;;  %v1992_v25 = vmul.f32 0.3275911, %v4617_v4 }
 0x2c7   :  { %v2339_v24 = vadd.f32 %v2323_v61, %v4504_v51  ;;  %v2212_v14 = vmul.f32 %v2196_v60, %v4580_v38  ;;  %v2086_v45 = vmul.f32 1.0614054, %v2070_v49 }
 0x2c8   :  { %v2774_v17 = vpop.eup %2773  ;;  %v2149_v11 = vmul.f32 %v2133_v10, %v4600_v47  ;;  %v2008_v15 = vadd.f32 1.0, %v1992_v25 }
 0x2c9   :  { %v2355_v48 = vmul.f32 0.5, %v2339_v24  ;;  %v2292_v59 = vmul.f32 %v2772_v35, %v2212_v14  ;;  %v2102_v41 = vadd.f32 -1.4531521, %v2086_v45  ;;  %v2039_v9 = vmul.f32 %v2774_v17, %v2007_v5 }
 0x2ca   :  { %v2165_v20 = vadd.f32 -0.28449672, %v2149_v11  ;;  %2775 = vrcp.f32 %v2008_v15  ;;  %v2275_v35 = vmul.f32 1.442695, %v2246_v31  ;;  %v2231_v5 = vsub.f32 0.0, %v4596_v8 }
 0x2cb   :  { %v2308_v32 = vsub.f32 1.0, %v2292_v59  ;;  %2777 = vpow2.f32 %v2273_v18  ;;  %v2118_v40 = vmul.f32 %v2102_v41, %v2070_v49  ;;  %v2055_v51 = vsub.f32 2.0, %v2039_v9 }
 0x2cc   :  { %v2181_v38 = vmul.f32 %v2165_v20, %v4600_v47  ;;  %2423 = vmatmul.f32.gmra.mxu3 %v2355_v48  ;;  %2779 = vpow2.f32 %v2275_v35 }
 0x2cd   :  { %v2324_v0 = vmul.f32 %v2308_v32, %v1956_v36  ;;  %v2134_v61 = vadd.f32 1.4214138, %v2118_v40  ;;  %v2071_v60 = vmul.f32 %v2774_v17, %v2055_v51  ;;  %v2247_v36 = vmul.f32 %v2231_v5, %v4596_v8 }
 0x2ce   :  { %v2197_v10 = vadd.f32 0.2548296, %v2181_v38  ;;  %v2232_v38 = vsub.f32 0.0, %v4617_v4 }
 0x2cf   :  { %v2340_v25 = vadd.f32 %v2324_v0, %v4525_v53  ;;  %v2150_v33 = vmul.f32 %v2134_v61, %v2070_v49  ;;  %v2087_v27 = vmul.f32 1.0614054, %v2071_v60  ;;  %v2277_v51 = vmul.f32 1.442695, %v2247_v36 }
 0x2d0   :  { %v2776_v24 = vpop.eup %2775  ;;  %v2213_v14 = vmul.f32 %v2197_v10, %v4600_v47 }
 0x2d1   :  { %v2778_v18 = vpop.eup %2777  ;;  %v2356_v45 = vmul.f32 0.5, %v2340_v25  ;;  %v2166_v11 = vadd.f32 -0.28449672, %v2150_v33  ;;  %v2103_v48 = vadd.f32 -1.4531521, %v2087_v27  ;;  %v2040_v59 = vmul.f32 %v2776_v24, %v2008_v15 }
 0x2d2   :  { %v2293_v41 = vmul.f32 %v2778_v18, %v2213_v14  ;;  %v2780_v10 = vpop.eup %2779  ;;  %2781 = vpow2.f32 %v2277_v51  ;;  %v2248_v27 = vmul.f32 %v2232_v38, %v4617_v4 }
 0x2d3   :  { %v2182_v17 = vmul.f32 %v2166_v11, %v2070_v49  ;;  %v2119_v9 = vmul.f32 %v2103_v48, %v2071_v60  ;;  %v2056_v20 = vsub.f32 2.0, %v2040_v59 }
 0x2d4   :  { %v2309_v31 = vsub.f32 1.0, %v2293_v41  ;;  %2426 = vmatmul.f32.gmra.mxu3 %v2356_v45  ;;  %v2279_v48 = vmul.f32 1.442695, %v2248_v27 }
 0x2d5   :  { %v2198_v53 = vadd.f32 0.2548296, %v2182_v17  ;;  %v2135_v32 = vadd.f32 1.4214138, %v2119_v9  ;;  %v2072_v40 = vmul.f32 %v2776_v24, %v2056_v20 }
 0x2d6   :  { %v2325_v47 = vmul.f32 %v2309_v31, %v1957_v43  ;;  %v1796_v43 = vpop.f32.mrf.mxu1  ;;  %2783 = vpow2.f32 %v2279_v48 }
 0x2d7   :  { %v2214_v0 = vmul.f32 %v2198_v53, %v2070_v49  ;;  %v2151_v15 = vmul.f32 %v2135_v32, %v2071_v60  ;;  %v2088_v61 = vmul.f32 1.0614054, %v2072_v40 }
 0x2d8   :  { %v2341_v8 = vadd.f32 %v2325_v47, %v4546_v34  ;;  %v2782_v36 = vpop.eup %2781 }
 0x2d9   :  { %v2294_v35 = vmul.f32 %v2780_v10, %v2214_v0  ;;  %v2167_v5 = vadd.f32 -0.28449672, %v2151_v15  ;;  %v2104_v25 = vadd.f32 -1.4531521, %v2088_v61 }
 0x2da   :  { %v2357_v33 = vmul.f32 0.5, %v2341_v8 }
 0x2db   :  { %v2310_v24 = vsub.f32 1.0, %v2294_v35  ;;  %v2183_v14 = vmul.f32 %v2167_v5, %v2071_v60  ;;  %v2120_v18 = vmul.f32 %v2104_v25, %v2072_v40  ;;  %v4648_v35 = vpop.f32.mrf.mxu3  ;;  %v4655_v5 = vld [vmem:[%s4706_s4] ss:$0 sm:$0xff]  ;;  %s2943_s4 = smov [#allocation10]  }
 0x2dc   :  { %2429 = vmatmul.f32.gmra.mxu3 %v2357_v33  ;;  %v2784_v38 = vpop.eup %2783  ;;  %s2498_s15 = sshll.u32 %s2943_s4, 4  ;;  %s2499_s15 = int_to_ptr.vmem [resolvable:$true] %s2498_s15 }
 0x2dd   :  { %v2326_v49 = vmul.f32 %v2310_v24, %v1958_v29  ;;  %v2199_v45 = vadd.f32 0.2548296, %v2183_v14  ;;  %v2136_v11 = vadd.f32 1.4214138, %v2120_v18 }
 0x2de   :  { %v1799_v29 = vpop.f32.mrf.mxu1 }
 0x2df   :  { %v2342_v34 = vadd.f32 %v2326_v49, %v4567_v22  ;;  %v2215_v59 = vmul.f32 %v2199_v45, %v2071_v60  ;;  %v2152_v41 = vmul.f32 %v2136_v11, %v2072_v40 }
 0x2e1   :  { %v2358_v17 = vmul.f32 0.5, %v2342_v34  ;;  %v2295_v9 = vmul.f32 %v2782_v36, %v2215_v59  ;;  %v2168_v20 = vadd.f32 -0.28449672, %v2152_v41 }
 0x2e3   :  { %v2311_v4 = vsub.f32 1.0, %v2295_v9  ;;  %v2184_v31 = vmul.f32 %v2168_v20, %v2072_v40 }
 0x2e4   :  { %2432 = vmatmul.f32.gmra.mxu3 %v2358_v17  ;;  %v1227_v17 = vadd.f32 %v4165_v7, %v4154_v1 }
 0x2e5   :  { %v2327_v53 = vmul.f32 %v2311_v4, %v1959_v39  ;;  %v2200_v32 = vadd.f32 0.2548296, %v2184_v31  ;;  %v1215_v39 = vadd.f32 %v4010_v44, %v4008_v3  ;;  %v1221_v44 = vadd.f32 %v4095_v57, %v4093_v12 }
 0x2e6   :  { %v1802_v10 = vpop.f32.mrf.mxu1 }
 0x2e7   :  { %v2343_v47 = vadd.f32 %v2327_v53, %v4589_v21  ;;  %v2216_v51 = vmul.f32 %v2200_v32, %v2072_v40  ;;  %v1844_v40 = vadd.f32 %v1796_v43, %v1215_v39  ;;  %v1846_v43 = vadd.f32 %v1802_v10, %v1221_v44 }
 0x2e9   :  { %v2359_v22 = vmul.f32 0.5, %v2343_v47  ;;  %v2296_v60 = vmul.f32 %v2784_v38, %v2216_v51 }
 0x2eb   :  { %v2312_v0 = vsub.f32 1.0, %v2296_v60 }
 0x2ec   :  { %2435 = vmatmul.f32.gmra.mxu3 %v2359_v22  ;;  %v1236_v22 = vadd.f32 %v4252_v6, %v4247_v62 }
 0x2ed   :  { %v2328_v15 = vmul.f32 %v2312_v0, %v1960_v26 }
 0x2ee   :  { %v1805_v21 = vpop.f32.mrf.mxu1 }
 0x2ef   :  { %v2344_v61 = vadd.f32 %v2328_v15, %v4609_v30  ;;  %v1218_v30 = vadd.f32 %v4052_v46, %v4050_v2  ;;  %v1224_v2 = vadd.f32 %v4124_v19, %v4116_v58  ;;  %v1230_v58 = vadd.f32 %v4194_v23, %v4186_v56 }
 0x2f1   :  { %v2360_v8 = vmul.f32 0.5, %v2344_v61  ;;  %v1845_v27 = vadd.f32 %v1799_v29, %v1218_v30  ;;  %v1847_v46 = vadd.f32 %v1805_v21, %v1224_v2  ;;  %v1233_v29 = vadd.f32 %v4224_v54, %v4219_v37 }
 0x2f4   :  { %2438 = vmatmul.f32.gmra.mxu3 %v2360_v8 }
 0x2f6   :  { %v1808_v24 = vpop.f32.mrf.mxu1 }
 0x2f7   :  { %v1848_v12 = vadd.f32 %v1808_v24, %v1227_v17 }
 0x2fe   :  { %v2394_v25 = vpop.f32.mrf.mxu3  ;;  %v1811_v49 = vpop.f32.mrf.mxu1 }
 0x2ff   :  { %v2442_v33 = vadd.f32 %v2394_v25, %v1844_v40  ;;  %v1849_v19 = vadd.f32 %v1811_v49, %v1230_v58 }
 0x301   :  { %v2462_v26 = vadd.f32 %v4655_v5, %v2442_v33 }
 0x303   :  { %2478 = vst [vmem:[#allocation10] sm:$0xff] %v2462_v26 }
 0x306   :  { %v2397_v14 = vpop.f32.mrf.mxu3  ;;  %v1814_v41 = vpop.f32.mrf.mxu1 }
 0x307   :  { %v2443_v18 = vadd.f32 %v2397_v14, %v1845_v27  ;;  %v1850_v7 = vadd.f32 %v1814_v41, %v1233_v29  ;;  %v1260_v41 = vadd.f32 %v4648_v35, %v4363_v63 }
 0x309   :  { %v2463_v3 = vadd.f32 %v4655_v5, %v2443_v18 }
 0x30b   :  { %2479 = vst [vmem:[#allocation10 + $0x8] sm:$0xff] %v2463_v3 }
 0x30e   :  { %v1817_v4 = vpop.f32.mrf.mxu1 }
 0x30f   :  { %v2400_v45 = vpop.f32.mrf.mxu3  ;;  %v1851_v56 = vadd.f32 %v1817_v4, %v1236_v22 }
 0x310   :  { %v2444_v11 = vadd.f32 %v2400_v45, %v1846_v43 }
 0x312   :  { %v2464_v48 = vadd.f32 %v4655_v5, %v2444_v11 }
 0x314   :  { %2480 = vst [vmem:[#allocation10 + $0x10] sm:$0xff] %v2464_v48 }
 0x316   :  { %v1820_v1 = vpop.f32.mrf.mxu1 }
 0x317   :  { %v2403_v34 = vpop.f32.mrf.mxu3  ;;  %v1852_v37 = vadd.f32 %v1820_v1, %v4287_v13 }
 0x318   :  { %v2445_v59 = vadd.f32 %v2403_v34, %v1847_v46 }
 0x31a   :  { %v2465_v36 = vadd.f32 %v4655_v5, %v2445_v59 }
 0x31c   :  { %2481 = vst [vmem:[#allocation10 + $0x18] sm:$0xff] %v2465_v36 }
 0x31e   :  { %v1823_v23 = vpop.f32.mrf.mxu1 }
 0x31f   :  { %v2406_v57 = vpop.f32.mrf.mxu3  ;;  %v1853_v39 = vadd.f32 %v1823_v23, %v4309_v52 }
 0x320   :  { %v2446_v9 = vadd.f32 %v2406_v57, %v1848_v12 }
 0x322   :  { %v2466_v20 = vadd.f32 %v4655_v5, %v2446_v9 }
 0x324   :  { %2482 = vst [vmem:[#allocation10 + $0x20] sm:$0xff] %v2466_v20 }
 0x326   :  { %v1826_v10 = vpop.f32.mrf.mxu1 }
 0x327   :  { %v2409_v31 = vpop.f32.mrf.mxu3  ;;  %v1854_v25 = vadd.f32 %v1826_v10, %v4323_v50 }
 0x328   :  { %v2447_v53 = vadd.f32 %v2409_v31, %v1849_v19 }
 0x32a   :  { %v2467_v32 = vadd.f32 %v4655_v5, %v2447_v53 }
 0x32c   :  { %2483 = vst [vmem:[#allocation10 + $0x28] sm:$0xff] %v2467_v32 }
 0x32e   :  { %v1829_v40 = vpop.f32.mrf.mxu1 }
 0x32f   :  { %v2412_v47 = vpop.f32.mrf.mxu3  ;;  %v1855_v27 = vadd.f32 %v1829_v40, %v4340_v42 }
 0x330   :  { %v2448_v51 = vadd.f32 %v2412_v47, %v1850_v7 }
 0x332   :  { %v2468_v38 = vadd.f32 %v4655_v5, %v2448_v51 }
 0x334   :  { %2484 = vst [vmem:[#allocation10 + $0x30] sm:$0xff] %v2468_v38 }
 0x336   :  { %v1832_v30 = vpop.f32.mrf.mxu1 }
 0x337   :  { %v2415_v60 = vpop.f32.mrf.mxu3  ;;  %v1856_v18 = vadd.f32 %v1832_v30, %v4349_v16 }
 0x338   :  { %v2449_v0 = vadd.f32 %v2415_v60, %v1851_v56 }
 0x33a   :  { %v2469_v15 = vadd.f32 %v4655_v5, %v2449_v0 }
 0x33c   :  { %2485 = vst [vmem:[#allocation10 + $0x38] sm:$0xff] %v2469_v15 }
 0x33e   :  { %v1835_v3 = vpop.f32.mrf.mxu1 }
 0x33f   :  { %v2418_v54 = vpop.f32.mrf.mxu3  ;;  %v1857_v49 = vadd.f32 %v1835_v3, %v4358_v55 }
 0x340   :  { %v2450_v61 = vadd.f32 %v2418_v54, %v1852_v37 }
 0x342   :  { %v2470_v8 = vadd.f32 %v4655_v5, %v2450_v61 }
 0x344   :  { %2486 = vst [vmem:[#allocation10 + $0x40] sm:$0xff] %v2470_v8 }
 0x346   :  { %v1838_v48 = vpop.f32.mrf.mxu1 }
 0x347   :  { %v2421_v21 = vpop.f32.mrf.mxu3  ;;  %v1858_v2 = vadd.f32 %v1838_v48, %v4361_v28 }
 0x348   :  { %v2451_v62 = vadd.f32 %v2421_v21, %v1853_v39 }
 0x34a   :  { %v2471_v6 = vadd.f32 %v4655_v5, %v2451_v62 }
 0x34c   :  { %2487 = vst [vmem:[#allocation10 + $0x48] sm:$0xff] %v2471_v6 }
 0x34e   :  { %v1841_v59 = vpop.f32.mrf.mxu1 }
 0x34f   :  { %v2424_v33 = vpop.f32.mrf.mxu3  ;;  %v1859_v36 = vadd.f32 %v1841_v59, %v1260_v41 }
 0x350   :  { %v2452_v26 = vadd.f32 %v2424_v33, %v1854_v25 }
 0x352   :  { %v2472_v13 = vadd.f32 %v4655_v5, %v2452_v26 }
 0x354   :  { %2488 = vst [vmem:[#allocation10 + $0x50] sm:$0xff] %v2472_v13 }
 0x357   :  { %v2427_v24 = vpop.f32.mrf.mxu3 }
 0x358   :  { %v2453_v14 = vadd.f32 %v2427_v24, %v1855_v27 }
 0x35a   :  { %v2473_v52 = vadd.f32 %v4655_v5, %v2453_v14 }
 0x35c   :  { %2489 = vst [vmem:[#allocation10 + $0x58] sm:$0xff] %v2473_v52 }
 0x35f   :  { %v2430_v44 = vpop.f32.mrf.mxu3 }
 0x360   :  { %v2454_v43 = vadd.f32 %v2430_v44, %v1856_v18 }
 0x362   :  { %v2474_v50 = vadd.f32 %v4655_v5, %v2454_v43 }
 0x364   :  { %2490 = vst [vmem:[#allocation10 + $0x60] sm:$0xff] %v2474_v50 }
 0x367   :  { %v2433_v45 = vpop.f32.mrf.mxu3 }
 0x368   :  { %v2455_v11 = vadd.f32 %v2433_v45, %v1857_v49 }
 0x36a   :  { %v2475_v42 = vadd.f32 %v4655_v5, %v2455_v11 }
 0x36c   :  { %2491 = vst [vmem:[#allocation10 + $0x68] sm:$0xff] %v2475_v42 }
 0x36f   :  { %v2436_v46 = vpop.f32.mrf.mxu3 }
 0x370   :  { %v2456_v34 = vadd.f32 %v2436_v46, %v1858_v2 }
 0x372   :  { %v2476_v16 = vadd.f32 %v4655_v5, %v2456_v34 }
 0x374   :  { %2492 = vst [vmem:[#allocation10 + $0x70] sm:$0xff] %v2476_v16 }
 0x377   :  { %v2439_v17 = vpop.f32.mrf.mxu3 }
 0x378   :  { %v2457_v55 = vadd.f32 %v2439_v17, %v1859_v36 }
 0x37a   :  { %v2477_v28 = vadd.f32 %v4655_v5, %v2457_v55 }
 0x37c   :  { %2493 = vst [vmem:[#allocation10 + $0x78] sm:$0xff] %v2477_v28 }
 0x37d   :  { %2506 = dma.vmem_to_hbm [thread:$0]  %s2499_s15, 2048, %s2501_s18, [#allocation4], %s2939_s30, %s2939_s30, %s2940_s6  }
 0x37e   :  { %2933 = dma.done.wait [#allocation4], 2048  }
 0x37f   :  { %2934 = vsyncadd [#allocation4], 4294965248 }
 0x380   :  { %2511 = vsyncpa [#allocation3], 1 }
 0x381   :  { %2512 = vsyncpa [#allocation6], 1 }
 0x382   :  { %2513 = vsyncpa [#allocation9], 1 }
 0x383   :  { %2514 = vsyncpa [#allocation4], 1 }

</bundles_post_ra>
